<compile_context>
chip_gen: v7x
topology: tpu7x:2x2x1
jax: 0.10.0
libtpu: 0.0.40
codegen_flags: <defaults>
</compile_context>

<pallas_src>
import functools
import math

import jax
import jax.numpy as jnp
from jax.experimental import pallas as pl
from jax.experimental.pallas import tpu as pltpu


# ----------------------------------------------------------------------------
# Tiling / VMEM configuration
# ----------------------------------------------------------------------------
_TM, _TN, _TK = 512, 1024, 2048       # GEMM tile targets (full block if smaller)


def _default_vmem_limit():
    # Generation-aware scoped-VMEM limit: ~3/4 of physical, capped at 100 MiB.
    # v5e/v6e (128 MiB physical) -> ~96-100 MiB;  v7x (64 MiB) -> ~48 MiB.
    cap = 128 * 1024 * 1024
    try:
        info = pltpu.get_tpu_info()
        cap = int(getattr(info, "vmem_capacity_bytes", cap)) or cap
    except Exception:
        pass
    return int(min(cap * 3 // 4, 100 * 1024 * 1024))


_VMEM_LIMIT = _default_vmem_limit()


# ----------------------------------------------------------------------------
# helpers
# ----------------------------------------------------------------------------
def _round_up(n, m):
    return ((n + m - 1) // m) * m


def _choose_tile(dim, target, aligns=(256, 128)):
    """Return (padded_dim, tile).  One full block when dim <= target; otherwise
    an align-multiple tile near `target` (zero-padding `dim` if nothing
    reasonably large divides it)."""
    if dim <= target:
        return dim, dim
    lo = max(aligns[-1], target // 2)
    for align in aligns:
        t = (target // align) * align
        while t >= lo:
            if dim % t == 0:
                return dim, t
            t -= align
    t = (target // aligns[-1]) * aligns[-1]
    return _round_up(dim, t), t


def _plan_m(m):
    return _choose_tile(m, _TM, (8,))


def _plan_n(n):
    # prefer 256-multiples (v6e/v7x MXU is 2x256x256)
    return _choose_tile(n, _TN, (256, 128))


def _plan_k(k, has_ln):
    if has_ln:
        return k, k        # fused LayerNorm needs the whole row in one K tile
    return _choose_tile(k, _TK, (256, 128))


def _pad2(x, rows, cols):
    r, c = x.shape
    if (r, c) == (rows, cols):
        return x
    return jnp.pad(x, ((0, rows - r), (0, cols - c)))


def _gelu(x):
    # GPT-2 "new gelu" (tanh approximation), f32.
    c = 0.7978845608028654  # sqrt(2/pi)
    return 0.5 * x * (1.0 + jnp.tanh(c * (x + 0.044715 * x * x * x)))


def _heads_per_block(n_head, dh):
    # Smallest head group whose output width is a multiple of 128 lanes;
    # otherwise all heads (output block == full D, a legal full-dim block).
    for hpb in range(1, n_head + 1):
        if n_head % hpb == 0 and (hpb * dh) % 128 == 0:
            return hpb
    return n_head


# ----------------------------------------------------------------------------
# Pallas kernels
# ----------------------------------------------------------------------------
def _make_linear_kernel(*, has_ln, has_res, use_gelu, eps):
    """Tiled matmul kernel:  o = [+res] [gelu]( LN(x) @ W_bf16 + b )."""

    def kernel(*refs):
        it = iter(refs)
        x_ref = next(it)
        w_ref = next(it)
        b_ref = next(it)
        g_ref = next(it) if has_ln else None
        be_ref = next(it) if has_ln else None
        r_ref = next(it) if has_res else None
        o_ref = next(it)
        acc_ref = next(it)
        lnx_ref = next(it) if has_ln else None

        j = pl.program_id(1)
        k = pl.program_id(2)

        @pl.when(k == 0)
        def _():
            acc_ref[...] = jnp.zeros_like(acc_ref)

        if has_ln:
            # K lives in a single tile (gk == 1) so the row stats are exact.
            # The normalized tile is cached in VMEM and only recomputed when
            # the x block changes (j == 0); j is "arbitrary" so this is safe.
            @pl.when(j == 0)
            def _():
                x = x_ref[...].astype(jnp.float32)
                mean = jnp.mean(x, axis=-1, keepdims=True)
                xc = x - mean
                var = jnp.mean(xc * xc, axis=-1, keepdims=True)
                xn = xc * jax.lax.rsqrt(var + eps) * g_ref[...] + be_ref[...]
                lnx_ref[...] = xn.astype(jnp.bfloat16)

            xin = lnx_ref[...]
        else:
            xin = x_ref[...]                      # already bf16

        acc_ref[...] += jnp.dot(xin, w_ref[...],
                                preferred_element_type=jnp.float32)

        @pl.when(k == pl.num_programs(2) - 1)
        def _():
            y = acc_ref[...] + b_ref[...]
            if use_gelu:
                y = _gelu(y)
            if has_res:
                y = y + r_ref[...].astype(jnp.float32)
            o_ref[...] = y.astype(o_ref.dtype)

    return kernel


def _embed_kernel(tok_ref, pos_ref, vis_ref, o_ref):
    # x = tok_emb + pos_emb (broadcast over batch) + vis_emb (broadcast over T)
    o_ref[0] = (tok_ref[0] + pos_ref[...] + vis_ref[0]).astype(o_ref.dtype)


def _attention_kernel(q_ref, k_ref, v_ref, o_ref, *, heads, dh, t):
    # One (batch, head-group) tile per grid step.  qkv stays bf16; the
    # 1/sqrt(dh) softmax scale was folded into the q-projection weights.
    gw = heads * dh
    q = q_ref[...].reshape(t, gw)
    k = k_ref[...].reshape(t, gw)
    v = v_ref[...].reshape(t, gw)

    row = jax.lax.broadcasted_iota(jnp.int32, (t, t), 0)
    col = jax.lax.broadcasted_iota(jnp.int32, (t, t), 1)
    causal = col <= row

    # TODO(synk): for very long T switch to a flash-style kv-tile grid with
    # online softmax; the full TxT score block per head is fine at GPT-2 sizes.
    outs = []
    for h in range(heads):
        sl = slice(h * dh, (h + 1) * dh)
        s = jax.lax.dot_general(q[:, sl], k[:, sl], (((1,), (1,)), ((), ())),
                                preferred_element_type=jnp.float32)
        s = jnp.where(causal, s, -1e30)
        m = jnp.max(s, axis=-1, keepdims=True)
        p = jnp.exp(s - m)
        inv = pl.reciprocal(jnp.sum(p, axis=-1, keepdims=True), approx=True)
        outs.append(jnp.dot((p * inv).astype(jnp.bfloat16), v[:, sl],
                            preferred_element_type=jnp.float32))
    o = outs[0] if heads == 1 else jnp.concatenate(outs, axis=-1)
    o_ref[0] = o.astype(o_ref.dtype)


# ----------------------------------------------------------------------------
# pallas_call wrappers
# ----------------------------------------------------------------------------
def fused_linear(x, lin, *, ln=None, residual=None, use_gelu=False,
                 n_out=None, eps=1e-5):
    """y = [residual +] [gelu]( LN(x) @ W + b )    (bf16 activations in HBM)

    x: (M, K) bf16.  lin: {"w": (Kp, Np) bf16 pre-padded, "b": (1, Np) f32}.
    ln: optional (gamma, beta), each (1, K) f32.  residual: optional (M, N) bf16.
    n_out: logical output width (defaults to Np, i.e. no column padding).
    """
    M, K = x.shape
    w, b = lin["w"], lin["b"]
    has_ln = ln is not None

    Kp, tk = _plan_k(K, has_ln)
    N = int(n_out) if n_out is not None else w.shape[1]
    Np, tn = _plan_n(N)
    assert w.shape == (Kp, Np), (w.shape, (Kp, Np))
    Mp, tm = _plan_m(M)

    xp = _pad2(x, Mp, Kp)
    gm, gn, gk = Mp // tm, Np // tn, Kp // tk

    in_arrays = [xp, w, b]
    in_specs = [
        pl.BlockSpec((tm, tk), lambda i, j, k: (i, k)),
        pl.BlockSpec((tk, tn), lambda i, j, k: (k, j)),
        pl.BlockSpec((1, tn), lambda i, j, k: (0, j)),
    ]
    if has_ln:
        g, be = ln
        in_arrays += [g, be]
        in_specs += [pl.BlockSpec((1, tk), lambda i, j, k: (0, k)),
                     pl.BlockSpec((1, tk), lambda i, j, k: (0, k))]
    if residual is not None:
        in_arrays.append(_pad2(residual, Mp, Np))
        in_specs.append(pl.BlockSpec((tm, tn), lambda i, j, k: (i, j)))

    scratch = [pltpu.VMEM((tm, tn), jnp.float32)]
    if has_ln:
        scratch.append(pltpu.VMEM((tm, tk), jnp.bfloat16))

    # The LN cache is keyed on j == 0, so the j axis must stay in-order per
    # core ("arbitrary"); megacore parallelism then comes from the M axis.
    dims = (("parallel", "arbitrary", "arbitrary") if has_ln
            else ("parallel", "parallel", "arbitrary"))

    kern = _make_linear_kernel(has_ln=has_ln, has_res=residual is not None,
                               use_gelu=use_gelu, eps=eps)
    out = pl.pallas_call(
        kern,
        grid=(gm, gn, gk),
        in_specs=in_specs,
        out_specs=pl.BlockSpec((tm, tn), lambda i, j, k: (i, j)),
        out_shape=jax.ShapeDtypeStruct((Mp, Np), jnp.bfloat16),
        scratch_shapes=scratch,
        compiler_params=pltpu.CompilerParams(
            dimension_semantics=dims, vmem_limit_bytes=_VMEM_LIMIT),
    )(*in_arrays)
    if (Mp, Np) != (M, N):
        out = out[:M, :N]
    return out


def fused_embedding(tok_emb, pos_emb, vis_emb):
    # tok_emb: (B, T, D), pos_emb: (T, D), vis_emb: (B, D) -> (B, T, D), bf16.
    B, T, D = tok_emb.shape
    return pl.pallas_call(
        _embed_kernel,
        grid=(B,),
        in_specs=[
            pl.BlockSpec((1, T, D), lambda b: (b, 0, 0)),
            pl.BlockSpec((T, D), lambda b: (0, 0)),
            pl.BlockSpec((1, 1, D), lambda b: (b, 0, 0)),
        ],
        out_specs=pl.BlockSpec((1, T, D), lambda b: (b, 0, 0)),
        out_shape=jax.ShapeDtypeStruct((B, T, D), jnp.bfloat16),
        compiler_params=pltpu.CompilerParams(
            dimension_semantics=("parallel",),
            vmem_limit_bytes=_VMEM_LIMIT),
    )(tok_emb, pos_emb, vis_emb.reshape(B, 1, D))


def causal_attention(qkv, *, n_head):
    # qkv: (B, T, 3D) bf16 -> (B, T, D) bf16.  Grid over (batch, head group);
    # each head-group output block is lane-dense (128 wide for GPT-2 dh=64).
    B, T, threeD = qkv.shape
    D = threeD // 3
    dh = D // n_head
    hpb = _heads_per_block(n_head, dh)
    G = n_head // hpb
    gw = hpb * dh

    out_spec = pl.BlockSpec((1, T, gw), lambda b, g: (b, 0, g))
    if gw % 128 == 0:
        # q/k/v head-group column blocks are lane-aligned inside the fused
        # (B, T, 3D) tensor: address them directly via three BlockSpecs on the
        # same array — no transpose, each byte of qkv is DMA'd exactly once.
        operands = (qkv, qkv, qkv)
        in_specs = [
            pl.BlockSpec((1, T, gw), lambda b, g: (b, 0, g)),
            pl.BlockSpec((1, T, gw), lambda b, g: (b, 0, G + g)),
            pl.BlockSpec((1, T, gw), lambda b, g: (b, 0, 2 * G + g)),
        ]
    else:
        # Small-D fallback: reorder to (B, 3, T, D) so each q/k/v block spans
        # the full (block-legal) last dim.
        qkv4 = jnp.swapaxes(qkv.reshape(B, T, 3, D), 1, 2)
        operands = (qkv4, qkv4, qkv4)
        in_specs = [
            pl.BlockSpec((1, 1, T, gw), lambda b, g: (b, 0, 0, g)),
            pl.BlockSpec((1, 1, T, gw), lambda b, g: (b, 1, 0, g)),
            pl.BlockSpec((1, 1, T, gw), lambda b, g: (b, 2, 0, g)),
        ]

    kern = functools.partial(_attention_kernel, heads=hpb, dh=dh, t=T)
    return pl.pallas_call(
        kern,
        grid=(B, G),
        in_specs=in_specs,
        out_specs=out_spec,
        out_shape=jax.ShapeDtypeStruct((B, T, D), jnp.bfloat16),
        compiler_params=pltpu.CompilerParams(
            dimension_semantics=("parallel", "parallel"),
            vmem_limit_bytes=_VMEM_LIMIT),
    )(*operands)


# ----------------------------------------------------------------------------
# Parameters (deterministic synthetic init — shapes follow the torch module)
# ----------------------------------------------------------------------------
def init_params(key, *, vocab, n_pos, d, n_layer, vision_dim, rank):
    keys = iter(jax.random.split(key, 256))

    def nrm(shape, std=0.02):
        return std * jax.random.normal(next(keys), shape, dtype=jnp.float32)

    def lora_lin(k_in, k_out):
        return {
            "w": nrm((k_in, k_out)),      # pre-transposed: (in, out)
            "b": nrm((k_out,)),           # loralib Linear default bias=True
            "a": nrm((k_in, rank)),       # lora_A^T
            # NOTE: loralib inits lora_B to zeros; nonzero values here so the
            # LoRA contribution is actually exercised numerically.
            "bb": nrm((rank, k_out)),     # lora_B^T
        }

    p = {
        "wte": nrm((vocab, d)),
        "wpe": nrm((n_pos, d)),
        "vp_w": nrm((vision_dim, d)),     # visual_projection (plain Linear)
        "vp_b": nrm((d,)),
        "vte": nrm((1, 1, d)),            # visual_token_embedding
        "layers": [],
        "lm_head": lora_lin(d, vocab),
    }
    for _ in range(n_layer):
        p["layers"].append({
            "ln1_g": jnp.ones((d,), jnp.float32),
            "ln1_b": jnp.zeros((d,), jnp.float32),
            "attn": lora_lin(d, 3 * d),
            "proj": lora_lin(d, d),
            "ln2_g": jnp.ones((d,), jnp.float32),
            "ln2_b": jnp.zeros((d,), jnp.float32),
            "fc": lora_lin(d, 4 * d),
            "mproj": lora_lin(4 * d, d),
        })
    return p


def _prep_linear(w, b, *, has_ln):
    # Pad weight/bias to tile-aligned shapes ONCE (outside jit), cast to bf16.
    K, N = w.shape
    Kp, _ = _plan_k(K, has_ln)
    Np, _ = _plan_n(N)
    return {"w": _pad2(w, Kp, Np).astype(jnp.bfloat16),
            "b": _pad2(b.reshape(1, -1).astype(jnp.float32), 1, Np)}


def merge_lora_params(params, *, rank, alpha, n_head):
    """Eval-time prep (runs once, outside jit):
       * merge LoRA:  W_eff = W + (alpha/r) * A @ B
       * fold the softmax scale 1/sqrt(dh) into the q-projection columns
       * fold the visual token embedding into the visual-projection bias
       * zero-pad weights/biases to tile-aligned shapes, cast to bf16
       * cast the embedding tables to bf16 (activations are bf16 too)."""
    scaling = alpha / rank
    d = params["wte"].shape[1]
    q_scale = 1.0 / math.sqrt(d // n_head)

    def merge(lin, *, has_ln, fold_q_scale=False):
        # TODO(synk): lora_dropout(p=0.05) is training-only; identity in eval.
        w = lin["w"] + scaling * (lin["a"] @ lin["bb"])
        b = lin["b"]
        if fold_q_scale:
            w = w.at[:, :d].multiply(q_scale)
            b = b.at[:d].multiply(q_scale)
        return _prep_linear(w, b, has_ln=has_ln)

    m = {
        "wte": params["wte"].astype(jnp.bfloat16),
        "wpe": params["wpe"].astype(jnp.bfloat16),
        "vp": _prep_linear(params["vp_w"],
                           params["vp_b"] + params["vte"].reshape(-1),
                           has_ln=False),
        "layers": [],
        "lm_head": merge(params["lm_head"], has_ln=False),
    }
    for lyr in params["layers"]:
        m["layers"].append({
            "ln1_g": lyr["ln1_g"].reshape(1, -1).astype(jnp.float32),
            "ln1_b": lyr["ln1_b"].reshape(1, -1).astype(jnp.float32),
            "ln2_g": lyr["ln2_g"].reshape(1, -1).astype(jnp.float32),
            "ln2_b": lyr["ln2_b"].reshape(1, -1).astype(jnp.float32),
            "attn": merge(lyr["attn"], has_ln=True, fold_q_scale=True),
            "proj": merge(lyr["proj"], has_ln=False),
            "fc": merge(lyr["fc"], has_ln=True),
            "mproj": merge(lyr["mproj"], has_ln=False),
        })
    return m


# ----------------------------------------------------------------------------
# Forward pass (glue in plain JAX, hot paths in Pallas kernels)
# ----------------------------------------------------------------------------
def lora_decoder_forward(params, vision_features, text_tokens, *, n_head, vocab):
    B, T = text_tokens.shape
    D = params["wte"].shape[1]

    # --- embeddings ---------------------------------------------------------
    # TODO(synk): the wte gather stays in XLA; a pure-Pallas version would need
    # a scalar-prefetch DMA-gather kernel (PrefetchScalarGridSpec + pl.Element).
    tok_emb = params["wte"][text_tokens]                        # (B, T, D) bf16
    pos_emb = params["wpe"][:T]                                 # (T, D)    bf16
    # visual_projection(vision) + visual_token (folded into the bias)
    vis_emb = fused_linear(vision_features.astype(jnp.bfloat16),
                           params["vp"])                        # (B, D)    bf16
    x = fused_embedding(tok_emb, pos_emb, vis_emb)              # (B, T, D) bf16

    x2 = x.reshape(B * T, D)

    # --- transformer blocks -------------------------------------------------
    for lyr in params["layers"]:
        # qkv = ln1(x) @ W_attn + b   (LayerNorm fused into the matmul prologue)
        qkv = fused_linear(x2, lyr["attn"], ln=(lyr["ln1_g"], lyr["ln1_b"]))
        attn = causal_attention(qkv.reshape(B, T, 3 * D), n_head=n_head)
        # x = x + proj(attn)          (residual add fused into the epilogue)
        x2 = fused_linear(attn.reshape(B * T, D), lyr["proj"], residual=x2)

        # h = gelu(ln2(x) @ W_fc + b) (LN prologue + GELU epilogue fused)
        h = fused_linear(x2, lyr["fc"], ln=(lyr["ln2_g"], lyr["ln2_b"]),
                         use_gelu=True)
        # x = x + mproj(h)
        x2 = fused_linear(h, lyr["mproj"], residual=x2)

    # --- lm head (the torch forward skips the decoder's final ln_f) ----------
    logits = fused_linear(x2, params["lm_head"], n_out=vocab)   # bf16 logits
    return logits.reshape(B, T, vocab)


# ----------------------------------------------------------------------------
if __name__ == "__main__":
    VOCAB, D, HEADS, LAYERS = 64, 32, 4, 2
    RANK, ALPHA = 4, 8
    B, T, VISION_DIM, N_POS = 2, 8, 768, 32

    key = jax.random.PRNGKey(0)
    kp, kv, kt = jax.random.split(key, 3)
    raw_params = init_params(kp, vocab=VOCAB, n_pos=N_POS, d=D,
                             n_layer=LAYERS, vision_dim=VISION_DIM, rank=RANK)
    params = merge_lora_params(raw_params, rank=RANK, alpha=ALPHA, n_head=HEADS)

    vision_features = jax.random.normal(kv, (B, VISION_DIM), dtype=jnp.float32)
    text_tokens = jax.random.randint(kt, (B, T), 0, VOCAB)

    fwd = jax.jit(functools.partial(lora_decoder_forward,
                                    n_head=HEADS, vocab=VOCAB))
    logits = fwd(params, vision_features, text_tokens)
    jax.block_until_ready(logits)

    assert logits.shape == (B, T, VOCAB), logits.shape
    assert bool(jnp.all(jnp.isfinite(logits.astype(jnp.float32))))
    print("KERNEL_OK")
</pallas_src>

<mosaic_0001>
module attributes {stable_mosaic.version = 11 : i64} {
  func.func @kernel(%arg0: i32, %arg1: i32, %arg2: i32, %arg3: memref<2x768xbf16, #tpu.memory_space<vmem>>, %arg4: memref<768x32xbf16, #tpu.memory_space<vmem>>, %arg5: memref<1x32xf32, #tpu.memory_space<vmem>>, %arg6: memref<2x32xbf16, #tpu.memory_space<vmem>>, %arg7: memref<2x32xf32, #tpu.memory_space<vmem>>) attributes {dimension_semantics = [#tpu.dimension_semantics<parallel>, #tpu.dimension_semantics<parallel>, #tpu.dimension_semantics<arbitrary>], iteration_bounds = array<i64: 1, 1, 1>, scalar_prefetch = 0 : i64, scratch_operands = 1 : i64, tpu.core_type = #tpu.core_type<tc>, window_params = [{transform_indices = @transform_0, window_bounds = array<i64: 2, 768>}, {transform_indices = @transform_1, window_bounds = array<i64: 768, 32>}, {transform_indices = @transform_2, window_bounds = array<i64: 1, 32>}, {transform_indices = @transform_3, window_bounds = array<i64: 2, 32>}]} {
    %c0_i32 = arith.constant 0 : i32
    %0 = arith.cmpi eq, %arg2, %c0_i32 : i32
    %1 = arith.extui %0 : i1 to i32
    %c0_i32_0 = arith.constant 0 : i32
    %2 = arith.cmpi ne, %1, %c0_i32_0 : i32
    scf.if %2 {
      %cst_10 = arith.constant 0.000000e+00 : f32
      %12 = vector.broadcast %cst_10 : f32 to vector<2x32xf32>
      %c0_11 = arith.constant 0 : index
      %c0_12 = arith.constant 0 : index
      %13 = vector.load %arg7[%c0_11, %c0_12] : memref<2x32xf32, #tpu.memory_space<vmem>>, vector<2x32xf32>
      tpu.vector_store %arg7[%c0_11, %c0_12], %12 {strides = array<i32>} : memref<2x32xf32, #tpu.memory_space<vmem>>, vector<2x32xf32>,
    } else {
    }
    %c0 = arith.constant 0 : index
    %c0_1 = arith.constant 0 : index
    %3 = vector.load %arg3[%c0, %c0_1] : memref<2x768xbf16, #tpu.memory_space<vmem>>, vector<2x768xbf16>
    %c0_2 = arith.constant 0 : index
    %c0_3 = arith.constant 0 : index
    %4 = vector.load %arg7[%c0_2, %c0_3] : memref<2x32xf32, #tpu.memory_space<vmem>>, vector<2x32xf32>
    %c0_4 = arith.constant 0 : index
    %c0_5 = arith.constant 0 : index
    %5 = vector.load %arg4[%c0_4, %c0_5] : memref<768x32xbf16, #tpu.memory_space<vmem>>, vector<768x32xbf16>
    %cst = arith.constant dense<0.000000e+00> : vector<2x32xf32>
    %6 = tpu.matmul %3, %5, %cst {dimension_numbers = #tpu.dot_dimension_numbers<[1], [0], [0], [1], [0, 0, 1, 1], [], []>} : vector<2x768xbf16>, vector<768x32xbf16>, vector<2x32xf32> -> vector<2x32xf32>
    %7 = arith.addf %4, %6 : vector<2x32xf32>
    %c0_6 = arith.constant 0 : index
    %c0_7 = arith.constant 0 : index
    %8 = vector.load %arg7[%c0_6, %c0_7] : memref<2x32xf32, #tpu.memory_space<vmem>>, vector<2x32xf32>
    tpu.vector_store %arg7[%c0_6, %c0_7], %7 {strides = array<i32>} : memref<2x32xf32, #tpu.memory_space<vmem>>, vector<2x32xf32>,
    %c0_i32_8 = arith.constant 0 : i32
    %9 = arith.cmpi eq, %arg2, %c0_i32_8 : i32
    %10 = arith.extui %9 : i1 to i32
    %c0_i32_9 = arith.constant 0 : i32
    %11 = arith.cmpi ne, %10, %c0_i32_9 : i32
    scf.if %11 {
      %c0_10 = arith.constant 0 : index
      %c0_11 = arith.constant 0 : index
      %12 = vector.load %arg7[%c0_10, %c0_11] : memref<2x32xf32, #tpu.memory_space<vmem>>, vector<2x32xf32>
      %c0_12 = arith.constant 0 : index
      %c0_13 = arith.constant 0 : index
      %13 = vector.load %arg5[%c0_12, %c0_13] : memref<1x32xf32, #tpu.memory_space<vmem>>, vector<1x32xf32>
      %14 = vector.broadcast %13 : vector<1x32xf32> to vector<2x32xf32>
      %15 = arith.addf %12, %14 : vector<2x32xf32>
      %16 = arith.truncf %15 : vector<2x32xf32> to vector<2x32xbf16>
      %c0_14 = arith.constant 0 : index
      %c0_15 = arith.constant 0 : index
      %17 = vector.load %arg6[%c0_14, %c0_15] : memref<2x32xbf16, #tpu.memory_space<vmem>>, vector<2x32xbf16>
      tpu.vector_store %arg6[%c0_14, %c0_15], %16 {strides = array<i32>} : memref<2x32xbf16, #tpu.memory_space<vmem>>, vector<2x32xbf16>,
    } else {
    }
    return
  }
  func.func @transform_0(%arg0: i32, %arg1: i32, %arg2: i32) -> (i32, i32) {
    %c0_i32 = arith.constant 0 : i32
    return %arg0, %arg2 : i32, i32
  }
  func.func @transform_1(%arg0: i32, %arg1: i32, %arg2: i32) -> (i32, i32) {
    %c0_i32 = arith.constant 0 : i32
    return %arg2, %arg1 : i32, i32
  }
  func.func @transform_2(%arg0: i32, %arg1: i32, %arg2: i32) -> (i32, i32) {
    %c0_i32 = arith.constant 0 : i32
    %c0_i32_0 = arith.constant 0 : i32
    return %c0_i32, %arg1 : i32, i32
  }
  func.func @transform_3(%arg0: i32, %arg1: i32, %arg2: i32) -> (i32, i32) {
    %c0_i32 = arith.constant 0 : i32
    return %arg0, %arg1 : i32, i32
  }
}

module attributes {stable_mosaic.version = 11 : i64} {
  func.func @kernel(%arg0: i32, %arg1: i32, %arg2: i32, %arg3: memref<16x32xbf16, #tpu.memory_space<vmem>>, %arg4: memref<32x96xbf16, #tpu.memory_space<vmem>>, %arg5: memref<1x96xf32, #tpu.memory_space<vmem>>, %arg6: memref<1x32xf32, #tpu.memory_space<vmem>>, %arg7: memref<1x32xf32, #tpu.memory_space<vmem>>, %arg8: memref<16x96xbf16, #tpu.memory_space<vmem>>, %arg9: memref<16x96xf32, #tpu.memory_space<vmem>>, %arg10: memref<16x32xbf16, #tpu.memory_space<vmem>>) attributes {dimension_semantics = [#tpu.dimension_semantics<parallel>, #tpu.dimension_semantics<arbitrary>, #tpu.dimension_semantics<arbitrary>], iteration_bounds = array<i64: 1, 1, 1>, scalar_prefetch = 0 : i64, scratch_operands = 2 : i64, tpu.core_type = #tpu.core_type<tc>, window_params = [{transform_indices = @transform_0, window_bounds = array<i64: 16, 32>}, {transform_indices = @transform_1, window_bounds = array<i64: 32, 96>}, {transform_indices = @transform_2, window_bounds = array<i64: 1, 96>}, {transform_indices = @transform_3, window_bounds = array<i64: 1, 32>}, {transform_indices = @transform_4, window_bounds = array<i64: 1, 32>}, {transform_indices = @transform_5, window_bounds = array<i64: 16, 96>}]} {
    %c0_i32 = arith.constant 0 : i32
    %0 = arith.cmpi eq, %arg2, %c0_i32 : i32
    %1 = arith.extui %0 : i1 to i32
    %c0_i32_0 = arith.constant 0 : i32
    %2 = arith.cmpi ne, %1, %c0_i32_0 : i32
    scf.if %2 {
      %cst_12 = arith.constant 0.000000e+00 : f32
      %15 = vector.broadcast %cst_12 : f32 to vector<16x96xf32>
      %c0_13 = arith.constant 0 : index
      %c0_14 = arith.constant 0 : index
      %16 = vector.load %arg9[%c0_13, %c0_14] : memref<16x96xf32, #tpu.memory_space<vmem>>, vector<16x96xf32>
      tpu.vector_store %arg9[%c0_13, %c0_14], %15 {strides = array<i32>} : memref<16x96xf32, #tpu.memory_space<vmem>>, vector<16x96xf32>,
    } else {
    }
    %c0_i32_1 = arith.constant 0 : i32
    %3 = arith.cmpi eq, %arg1, %c0_i32_1 : i32
    %4 = arith.extui %3 : i1 to i32
    %c0_i32_2 = arith.constant 0 : i32
    %5 = arith.cmpi ne, %4, %c0_i32_2 : i32
    scf.if %5 {
      %c0_12 = arith.constant 0 : index
      %c0_13 = arith.constant 0 : index
      %15 = vector.load %arg3[%c0_12, %c0_13] : memref<16x32xbf16, #tpu.memory_space<vmem>>, vector<16x32xbf16>
      %16 = arith.extf %15 : vector<16x32xbf16> to vector<16x32xf32>
      %cst_14 = arith.constant dense<0.000000e+00> : vector<16xf32>
      %17 = vector.multi_reduction <add>, %16, %cst_14 [1] : vector<16x32xf32> to vector<16xf32>
      %18 = vector.shape_cast %17 : vector<16xf32> to vector<16x1xf32>
      %cst_15 = arith.constant 3.200000e+01 : f32
      %19 = vector.broadcast %cst_15 : f32 to vector<16x1xf32>
      %20 = arith.divf %18, %19 : vector<16x1xf32>
      %21 = vector.broadcast %20 : vector<16x1xf32> to vector<16x32xf32>
      %22 = arith.subf %16, %21 : vector<16x32xf32>
      %23 = arith.mulf %22, %22 : vector<16x32xf32>
      %cst_16 = arith.constant dense<0.000000e+00> : vector<16xf32>
      %24 = vector.multi_reduction <add>, %23, %cst_16 [1] : vector<16x32xf32> to vector<16xf32>
      %25 = vector.shape_cast %24 : vector<16xf32> to vector<16x1xf32>
      %cst_17 = arith.constant 3.200000e+01 : f32
      %26 = vector.broadcast %cst_17 : f32 to vector<16x1xf32>
      %27 = arith.divf %25, %26 : vector<16x1xf32>
      %cst_18 = arith.constant 9.99999974E-6 : f32
      %28 = vector.broadcast %cst_18 : f32 to vector<16x1xf32>
      %29 = arith.addf %27, %28 : vector<16x1xf32>
      %30 = math.rsqrt %29 : vector<16x1xf32>
      %31 = vector.broadcast %30 : vector<16x1xf32> to vector<16x32xf32>
      %32 = arith.mulf %22, %31 : vector<16x32xf32>
      %c0_19 = arith.constant 0 : index
      %c0_20 = arith.constant 0 : index
      %33 = vector.load %arg6[%c0_19, %c0_20] : memref<1x32xf32, #tpu.memory_space<vmem>>, vector<1x32xf32>
      %34 = vector.broadcast %33 : vector<1x32xf32> to vector<16x32xf32>
      %35 = arith.mulf %32, %34 : vector<16x32xf32>
      %c0_21 = arith.constant 0 : index
      %c0_22 = arith.constant 0 : index
      %36 = vector.load %arg7[%c0_21, %c0_22] : memref<1x32xf32, #tpu.memory_space<vmem>>, vector<1x32xf32>
      %37 = vector.broadcast %36 : vector<1x32xf32> to vector<16x32xf32>
      %38 = arith.addf %35, %37 : vector<16x32xf32>
      %39 = arith.truncf %38 : vector<16x32xf32> to vector<16x32xbf16>
      %c0_23 = arith.constant 0 : index
      %c0_24 = arith.constant 0 : index
      %40 = vector.load %arg10[%c0_23, %c0_24] : memref<16x32xbf16, #tpu.memory_space<vmem>>, vector<16x32xbf16>
      tpu.vector_store %arg10[%c0_23, %c0_24], %39 {strides = array<i32>} : memref<16x32xbf16, #tpu.memory_space<vmem>>, vector<16x32xbf16>,
    } else {
    }
    %c0 = arith.constant 0 : index
    %c0_3 = arith.constant 0 : index
    %6 = vector.load %arg10[%c0, %c0_3] : memref<16x32xbf16, #tpu.memory_space<vmem>>, vector<16x32xbf16>
    %c0_4 = arith.constant 0 : index
    %c0_5 = arith.constant 0 : index
    %7 = vector.load %arg9[%c0_4, %c0_5] : memref<16x96xf32, #tpu.memory_space<vmem>>, vector<16x96xf32>
    %c0_6 = arith.constant 0 : index
    %c0_7 = arith.constant 0 : index
    %8 = vector.load %arg4[%c0_6, %c0_7] : memref<32x96xbf16, #tpu.memory_space<vmem>>, vector<32x96xbf16>
    %cst = arith.constant dense<0.000000e+00> : vector<16x96xf32>
    %9 = tpu.matmul %6, %8, %cst {dimension_numbers = #tpu.dot_dimension_numbers<[1], [0], [0], [1], [0, 0, 1, 1], [], []>} : vector<16x32xbf16>, vector<32x96xbf16>, vector<16x96xf32> -> vector<16x96xf32>
    %10 = arith.addf %7, %9 : vector<16x96xf32>
    %c0_8 = arith.constant 0 : index
    %c0_9 = arith.constant 0 : index
    %11 = vector.load %arg9[%c0_8, %c0_9] : memref<16x96xf32, #tpu.memory_space<vmem>>, vector<16x96xf32>
    tpu.vector_store %arg9[%c0_8, %c0_9], %10 {strides = array<i32>} : memref<16x96xf32, #tpu.memory_space<vmem>>, vector<16x96xf32>,
    %c0_i32_10 = arith.constant 0 : i32
    %12 = arith.cmpi eq, %arg2, %c0_i32_10 : i32
    %13 = arith.extui %12 : i1 to i32
    %c0_i32_11 = arith.constant 0 : i32
    %14 = arith.cmpi ne, %13, %c0_i32_11 : i32
    scf.if %14 {
      %c0_12 = arith.constant 0 : index
      %c0_13 = arith.constant 0 : index
      %15 = vector.load %arg9[%c0_12, %c0_13] : memref<16x96xf32, #tpu.memory_space<vmem>>, vector<16x96xf32>
      %c0_14 = arith.constant 0 : index
      %c0_15 = arith.constant 0 : index
      %16 = vector.load %arg5[%c0_14, %c0_15] : memref<1x96xf32, #tpu.memory_space<vmem>>, vector<1x96xf32>
      %17 = vector.broadcast %16 : vector<1x96xf32> to vector<16x96xf32>
      %18 = arith.addf %15, %17 : vector<16x96xf32>
      %19 = arith.truncf %18 : vector<16x96xf32> to vector<16x96xbf16>
      %c0_16 = arith.constant 0 : index
      %c0_17 = arith.constant 0 : index
      %20 = vector.load %arg8[%c0_16, %c0_17] : memref<16x96xbf16, #tpu.memory_space<vmem>>, vector<16x96xbf16>
      tpu.vector_store %arg8[%c0_16, %c0_17], %19 {strides = array<i32>} : memref<16x96xbf16, #tpu.memory_space<vmem>>, vector<16x96xbf16>,
    } else {
    }
    return
  }
  func.func @transform_0(%arg0: i32, %arg1: i32, %arg2: i32) -> (i32, i32) {
    %c0_i32 = arith.constant 0 : i32
    return %arg0, %arg2 : i32, i32
  }
  func.func @transform_1(%arg0: i32, %arg1: i32, %arg2: i32) -> (i32, i32) {
    %c0_i32 = arith.constant 0 : i32
    return %arg2, %arg1 : i32, i32
  }
  func.func @transform_2(%arg0: i32, %arg1: i32, %arg2: i32) -> (i32, i32) {
    %c0_i32 = arith.constant 0 : i32
    %c0_i32_0 = arith.constant 0 : i32
    return %c0_i32, %arg1 : i32, i32
  }
  func.func @transform_3(%arg0: i32, %arg1: i32, %arg2: i32) -> (i32, i32) {
    %c0_i32 = arith.constant 0 : i32
    %c0_i32_0 = arith.constant 0 : i32
    return %c0_i32, %arg2 : i32, i32
  }
  func.func @transform_4(%arg0: i32, %arg1: i32, %arg2: i32) -> (i32, i32) {
    %c0_i32 = arith.constant 0 : i32
    %c0_i32_0 = arith.constant 0 : i32
    return %c0_i32, %arg2 : i32, i32
  }
  func.func @transform_5(%arg0: i32, %arg1: i32, %arg2: i32) -> (i32, i32) {
    %c0_i32 = arith.constant 0 : i32
    return %arg0, %arg1 : i32, i32
  }
}

module attributes {stable_mosaic.version = 11 : i64} {
  func.func @_embed_kernel(%arg0: i32, %arg1: memref<1x8x32xbf16, #tpu.memory_space<vmem>>, %arg2: memref<8x32xbf16, #tpu.memory_space<vmem>>, %arg3: memref<1x1x32xbf16, #tpu.memory_space<vmem>>, %arg4: memref<1x8x32xbf16, #tpu.memory_space<vmem>>) attributes {dimension_semantics = [#tpu.dimension_semantics<parallel>], iteration_bounds = array<i64: 2>, scalar_prefetch = 0 : i64, scratch_operands = 0 : i64, tpu.core_type = #tpu.core_type<tc>, window_params = [{transform_indices = @transform_0, window_bounds = array<i64: 1, 8, 32>}, {pipeline_mode = #tpu.pipeline_mode<synchronous>, transform_indices = @transform_1, window_bounds = array<i64: 8, 32>}, {transform_indices = @transform_2, window_bounds = array<i64: 1, 1, 32>}, {transform_indices = @transform_3, window_bounds = array<i64: 1, 8, 32>}]} {
    %c0 = arith.constant 0 : index
    %c0_0 = arith.constant 0 : index
    %c0_1 = arith.constant 0 : index
    %0 = vector.load %arg1[%c0, %c0_0, %c0_1] : memref<1x8x32xbf16, #tpu.memory_space<vmem>>, vector<1x8x32xbf16>
    %1 = vector.shape_cast %0 : vector<1x8x32xbf16> to vector<8x32xbf16>
    %c0_2 = arith.constant 0 : index
    %c0_3 = arith.constant 0 : index
    %2 = vector.load %arg2[%c0_2, %c0_3] : memref<8x32xbf16, #tpu.memory_space<vmem>>, vector<8x32xbf16>
    %3 = arith.addf %1, %2 : vector<8x32xbf16>
    %c0_4 = arith.constant 0 : index
    %c0_5 = arith.constant 0 : index
    %c0_6 = arith.constant 0 : index
    %4 = vector.load %arg3[%c0_4, %c0_5, %c0_6] : memref<1x1x32xbf16, #tpu.memory_space<vmem>>, vector<1x1x32xbf16>
    %5 = vector.shape_cast %4 : vector<1x1x32xbf16> to vector<1x32xbf16>
    %6 = vector.broadcast %5 : vector<1x32xbf16> to vector<8x32xbf16>
    %7 = arith.addf %3, %6 : vector<8x32xbf16>
    %c0_7 = arith.constant 0 : index
    %c0_8 = arith.constant 0 : index
    %c0_9 = arith.constant 0 : index
    %8 = vector.load %arg4[%c0_7, %c0_8, %c0_9] : memref<1x8x32xbf16, #tpu.memory_space<vmem>>, vector<1x8x32xbf16>
    %9 = vector.shape_cast %8 : vector<1x8x32xbf16> to vector<8x32xbf16>
    %10 = vector.shape_cast %7 : vector<8x32xbf16> to vector<1x8x32xbf16>
    tpu.vector_store %arg4[%c0_7, %c0_8, %c0_9], %10 {strides = array<i32>} : memref<1x8x32xbf16, #tpu.memory_space<vmem>>, vector<1x8x32xbf16>,
    return
  }
  func.func @transform_0(%arg0: i32) -> (i32, i32, i32) {
    %c0_i32 = arith.constant 0 : i32
    %c0_i32_0 = arith.constant 0 : i32
    %c0_i32_1 = arith.constant 0 : i32
    return %arg0, %c0_i32, %c0_i32_0 : i32, i32, i32
  }
  func.func @transform_1(%arg0: i32) -> (i32, i32) {
    %c0_i32 = arith.constant 0 : i32
    %c0_i32_0 = arith.constant 0 : i32
    %c0_i32_1 = arith.constant 0 : i32
    return %c0_i32, %c0_i32_0 : i32, i32
  }
  func.func @transform_2(%arg0: i32) -> (i32, i32, i32) {
    %c0_i32 = arith.constant 0 : i32
    %c0_i32_0 = arith.constant 0 : i32
    %c0_i32_1 = arith.constant 0 : i32
    return %arg0, %c0_i32, %c0_i32_0 : i32, i32, i32
  }
  func.func @transform_3(%arg0: i32) -> (i32, i32, i32) {
    %c0_i32 = arith.constant 0 : i32
    %c0_i32_0 = arith.constant 0 : i32
    %c0_i32_1 = arith.constant 0 : i32
    return %arg0, %c0_i32, %c0_i32_0 : i32, i32, i32
  }
}

module attributes {stable_mosaic.version = 11 : i64} {
  func.func @_attention_kernel(%arg0: i32, %arg1: i32, %arg2: memref<1x1x8x32xbf16, #tpu.memory_space<vmem>>, %arg3: memref<1x1x8x32xbf16, #tpu.memory_space<vmem>>, %arg4: memref<1x1x8x32xbf16, #tpu.memory_space<vmem>>, %arg5: memref<1x8x32xbf16, #tpu.memory_space<vmem>>) attributes {dimension_semantics = [#tpu.dimension_semantics<parallel>, #tpu.dimension_semantics<parallel>], iteration_bounds = array<i64: 2, 1>, scalar_prefetch = 0 : i64, scratch_operands = 0 : i64, tpu.core_type = #tpu.core_type<tc>, window_params = [{transform_indices = @transform_0, window_bounds = array<i64: 1, 1, 8, 32>}, {transform_indices = @transform_1, window_bounds = array<i64: 1, 1, 8, 32>}, {transform_indices = @transform_2, window_bounds = array<i64: 1, 1, 8, 32>}, {transform_indices = @transform_3, window_bounds = array<i64: 1, 8, 32>}]} {
    %c0 = arith.constant 0 : index
    %c0_0 = arith.constant 0 : index
    %c0_1 = arith.constant 0 : index
    %c0_2 = arith.constant 0 : index
    %0 = vector.load %arg2[%c0, %c0_0, %c0_1, %c0_2] : memref<1x1x8x32xbf16, #tpu.memory_space<vmem>>, vector<1x1x8x32xbf16>
    %1 = vector.shape_cast %0 : vector<1x1x8x32xbf16> to vector<8x32xbf16>
    %c0_3 = arith.constant 0 : index
    %c0_4 = arith.constant 0 : index
    %c0_5 = arith.constant 0 : index
    %c0_6 = arith.constant 0 : index
    %2 = vector.load %arg3[%c0_3, %c0_4, %c0_5, %c0_6] : memref<1x1x8x32xbf16, #tpu.memory_space<vmem>>, vector<1x1x8x32xbf16>
    %3 = vector.shape_cast %2 : vector<1x1x8x32xbf16> to vector<8x32xbf16>
    %c0_7 = arith.constant 0 : index
    %c0_8 = arith.constant 0 : index
    %c0_9 = arith.constant 0 : index
    %c0_10 = arith.constant 0 : index
    %4 = vector.load %arg4[%c0_7, %c0_8, %c0_9, %c0_10] : memref<1x1x8x32xbf16, #tpu.memory_space<vmem>>, vector<1x1x8x32xbf16>
    %5 = vector.shape_cast %4 : vector<1x1x8x32xbf16> to vector<8x32xbf16>
    %6 = tpu.iota {dimensions = array<i32: 0>} : vector<8x8xi32>
    %7 = tpu.iota {dimensions = array<i32: 1>} : vector<8x8xi32>
    %8 = arith.cmpi sle, %7, %6 : vector<8x8xi32>
    %9 = vector.extract_strided_slice %1 {offsets = [0, 0], sizes = [8, 8], strides = [1, 1]} : vector<8x32xbf16> to vector<8x8xbf16>
    %10 = vector.extract_strided_slice %3 {offsets = [0, 0], sizes = [8, 8], strides = [1, 1]} : vector<8x32xbf16> to vector<8x8xbf16>
    %cst = arith.constant dense<0.000000e+00> : vector<8x8xf32>
    %11 = tpu.matmul %9, %10, %cst {dimension_numbers = #tpu.dot_dimension_numbers<[1], [1], [0], [0], [0, 0, 1, 0], [], []>} : vector<8x8xbf16>, vector<8x8xbf16>, vector<8x8xf32> -> vector<8x8xf32>
    %cst_11 = arith.constant -1.000000e+30 : f32
    %12 = vector.broadcast %cst_11 : f32 to vector<8x8xf32>
    %13 = arith.select %8, %11, %12 : vector<8x8xi1>, vector<8x8xf32>
    %cst_12 = arith.constant dense<0xFF800000> : vector<8xf32>
    %14 = vector.multi_reduction <maximumf>, %13, %cst_12 [1] : vector<8x8xf32> to vector<8xf32>
    %15 = vector.shape_cast %14 : vector<8xf32> to vector<8x1xf32>
    %16 = vector.broadcast %15 : vector<8x1xf32> to vector<8x8xf32>
    %17 = arith.subf %13, %16 : vector<8x8xf32>
    %18 = math.exp %17 : vector<8x8xf32>
    %cst_13 = arith.constant dense<0.000000e+00> : vector<8xf32>
    %19 = vector.multi_reduction <add>, %18, %cst_13 [1] : vector<8x8xf32> to vector<8xf32>
    %20 = vector.shape_cast %19 : vector<8xf32> to vector<8x1xf32>
    %21 = tpu.reciprocal %20 {approx = true} : vector<8x1xf32> -> vector<8x1xf32>
    %22 = vector.broadcast %21 : vector<8x1xf32> to vector<8x8xf32>
    %23 = arith.mulf %18, %22 : vector<8x8xf32>
    %24 = arith.truncf %23 : vector<8x8xf32> to vector<8x8xbf16>
    %25 = vector.extract_strided_slice %5 {offsets = [0, 0], sizes = [8, 8], strides = [1, 1]} : vector<8x32xbf16> to vector<8x8xbf16>
    %cst_14 = arith.constant dense<0.000000e+00> : vector<8x8xf32>
    %26 = tpu.matmul %24, %25, %cst_14 {dimension_numbers = #tpu.dot_dimension_numbers<[1], [0], [0], [1], [0, 0, 1, 1], [], []>} : vector<8x8xbf16>, vector<8x8xbf16>, vector<8x8xf32> -> vector<8x8xf32>
    %27 = vector.extract_strided_slice %1 {offsets = [0, 8], sizes = [8, 8], strides = [1, 1]} : vector<8x32xbf16> to vector<8x8xbf16>
    %28 = vector.extract_strided_slice %3 {offsets = [0, 8], sizes = [8, 8], strides = [1, 1]} : vector<8x32xbf16> to vector<8x8xbf16>
    %cst_15 = arith.constant dense<0.000000e+00> : vector<8x8xf32>
    %29 = tpu.matmul %27, %28, %cst_15 {dimension_numbers = #tpu.dot_dimension_numbers<[1], [1], [0], [0], [0, 0, 1, 0], [], []>} : vector<8x8xbf16>, vector<8x8xbf16>, vector<8x8xf32> -> vector<8x8xf32>
    %cst_16 = arith.constant -1.000000e+30 : f32
    %30 = vector.broadcast %cst_16 : f32 to vector<8x8xf32>
    %31 = arith.select %8, %29, %30 : vector<8x8xi1>, vector<8x8xf32>
    %cst_17 = arith.constant dense<0xFF800000> : vector<8xf32>
    %32 = vector.multi_reduction <maximumf>, %31, %cst_17 [1] : vector<8x8xf32> to vector<8xf32>
    %33 = vector.shape_cast %32 : vector<8xf32> to vector<8x1xf32>
    %34 = vector.broadcast %33 : vector<8x1xf32> to vector<8x8xf32>
    %35 = arith.subf %31, %34 : vector<8x8xf32>
    %36 = math.exp %35 : vector<8x8xf32>
    %cst_18 = arith.constant dense<0.000000e+00> : vector<8xf32>
    %37 = vector.multi_reduction <add>, %36, %cst_18 [1] : vector<8x8xf32> to vector<8xf32>
    %38 = vector.shape_cast %37 : vector<8xf32> to vector<8x1xf32>
    %39 = tpu.reciprocal %38 {approx = true} : vector<8x1xf32> -> vector<8x1xf32>
    %40 = vector.broadcast %39 : vector<8x1xf32> to vector<8x8xf32>
    %41 = arith.mulf %36, %40 : vector<8x8xf32>
    %42 = arith.truncf %41 : vector<8x8xf32> to vector<8x8xbf16>
    %43 = vector.extract_strided_slice %5 {offsets = [0, 8], sizes = [8, 8], strides = [1, 1]} : vector<8x32xbf16> to vector<8x8xbf16>
    %cst_19 = arith.constant dense<0.000000e+00> : vector<8x8xf32>
    %44 = tpu.matmul %42, %43, %cst_19 {dimension_numbers = #tpu.dot_dimension_numbers<[1], [0], [0], [1], [0, 0, 1, 1], [], []>} : vector<8x8xbf16>, vector<8x8xbf16>, vector<8x8xf32> -> vector<8x8xf32>
    %45 = vector.extract_strided_slice %1 {offsets = [0, 16], sizes = [8, 8], strides = [1, 1]} : vector<8x32xbf16> to vector<8x8xbf16>
    %46 = vector.extract_strided_slice %3 {offsets = [0, 16], sizes = [8, 8], strides = [1, 1]} : vector<8x32xbf16> to vector<8x8xbf16>
    %cst_20 = arith.constant dense<0.000000e+00> : vector<8x8xf32>
    %47 = tpu.matmul %45, %46, %cst_20 {dimension_numbers = #tpu.dot_dimension_numbers<[1], [1], [0], [0], [0, 0, 1, 0], [], []>} : vector<8x8xbf16>, vector<8x8xbf16>, vector<8x8xf32> -> vector<8x8xf32>
    %cst_21 = arith.constant -1.000000e+30 : f32
    %48 = vector.broadcast %cst_21 : f32 to vector<8x8xf32>
    %49 = arith.select %8, %47, %48 : vector<8x8xi1>, vector<8x8xf32>
    %cst_22 = arith.constant dense<0xFF800000> : vector<8xf32>
    %50 = vector.multi_reduction <maximumf>, %49, %cst_22 [1] : vector<8x8xf32> to vector<8xf32>
    %51 = vector.shape_cast %50 : vector<8xf32> to vector<8x1xf32>
    %52 = vector.broadcast %51 : vector<8x1xf32> to vector<8x8xf32>
    %53 = arith.subf %49, %52 : vector<8x8xf32>
    %54 = math.exp %53 : vector<8x8xf32>
    %cst_23 = arith.constant dense<0.000000e+00> : vector<8xf32>
    %55 = vector.multi_reduction <add>, %54, %cst_23 [1] : vector<8x8xf32> to vector<8xf32>
    %56 = vector.shape_cast %55 : vector<8xf32> to vector<8x1xf32>
    %57 = tpu.reciprocal %56 {approx = true} : vector<8x1xf32> -> vector<8x1xf32>
    %58 = vector.broadcast %57 : vector<8x1xf32> to vector<8x8xf32>
    %59 = arith.mulf %54, %58 : vector<8x8xf32>
    %60 = arith.truncf %59 : vector<8x8xf32> to vector<8x8xbf16>
    %61 = vector.extract_strided_slice %5 {offsets = [0, 16], sizes = [8, 8], strides = [1, 1]} : vector<8x32xbf16> to vector<8x8xbf16>
    %cst_24 = arith.constant dense<0.000000e+00> : vector<8x8xf32>
    %62 = tpu.matmul %60, %61, %cst_24 {dimension_numbers = #tpu.dot_dimension_numbers<[1], [0], [0], [1], [0, 0, 1, 1], [], []>} : vector<8x8xbf16>, vector<8x8xbf16>, vector<8x8xf32> -> vector<8x8xf32>
    %63 = vector.extract_strided_slice %1 {offsets = [0, 24], sizes = [8, 8], strides = [1, 1]} : vector<8x32xbf16> to vector<8x8xbf16>
    %64 = vector.extract_strided_slice %3 {offsets = [0, 24], sizes = [8, 8], strides = [1, 1]} : vector<8x32xbf16> to vector<8x8xbf16>
    %cst_25 = arith.constant dense<0.000000e+00> : vector<8x8xf32>
    %65 = tpu.matmul %63, %64, %cst_25 {dimension_numbers = #tpu.dot_dimension_numbers<[1], [1], [0], [0], [0, 0, 1, 0], [], []>} : vector<8x8xbf16>, vector<8x8xbf16>, vector<8x8xf32> -> vector<8x8xf32>
    %cst_26 = arith.constant -1.000000e+30 : f32
    %66 = vector.broadcast %cst_26 : f32 to vector<8x8xf32>
    %67 = arith.select %8, %65, %66 : vector<8x8xi1>, vector<8x8xf32>
    %cst_27 = arith.constant dense<0xFF800000> : vector<8xf32>
    %68 = vector.multi_reduction <maximumf>, %67, %cst_27 [1] : vector<8x8xf32> to vector<8xf32>
    %69 = vector.shape_cast %68 : vector<8xf32> to vector<8x1xf32>
    %70 = vector.broadcast %69 : vector<8x1xf32> to vector<8x8xf32>
    %71 = arith.subf %67, %70 : vector<8x8xf32>
    %72 = math.exp %71 : vector<8x8xf32>
    %cst_28 = arith.constant dense<0.000000e+00> : vector<8xf32>
    %73 = vector.multi_reduction <add>, %72, %cst_28 [1] : vector<8x8xf32> to vector<8xf32>
    %74 = vector.shape_cast %73 : vector<8xf32> to vector<8x1xf32>
    %75 = tpu.reciprocal %74 {approx = true} : vector<8x1xf32> -> vector<8x1xf32>
    %76 = vector.broadcast %75 : vector<8x1xf32> to vector<8x8xf32>
    %77 = arith.mulf %72, %76 : vector<8x8xf32>
    %78 = arith.truncf %77 : vector<8x8xf32> to vector<8x8xbf16>
    %79 = vector.extract_strided_slice %5 {offsets = [0, 24], sizes = [8, 8], strides = [1, 1]} : vector<8x32xbf16> to vector<8x8xbf16>
    %cst_29 = arith.constant dense<0.000000e+00> : vector<8x8xf32>
    %80 = tpu.matmul %78, %79, %cst_29 {dimension_numbers = #tpu.dot_dimension_numbers<[1], [0], [0], [1], [0, 0, 1, 1], [], []>} : vector<8x8xbf16>, vector<8x8xbf16>, vector<8x8xf32> -> vector<8x8xf32>
    %81 = tpu.concatenate %26, %44, %62, %80 in 1 : vector<8x8xf32>, vector<8x8xf32>, vector<8x8xf32>, vector<8x8xf32> -> vector<8x32xf32>
    %82 = arith.truncf %81 : vector<8x32xf32> to vector<8x32xbf16>
    %c0_30 = arith.constant 0 : index
    %c0_31 = arith.constant 0 : index
    %c0_32 = arith.constant 0 : index
    %83 = vector.load %arg5[%c0_30, %c0_31, %c0_32] : memref<1x8x32xbf16, #tpu.memory_space<vmem>>, vector<1x8x32xbf16>
    %84 = vector.shape_cast %83 : vector<1x8x32xbf16> to vector<8x32xbf16>
    %85 = vector.shape_cast %82 : vector<8x32xbf16> to vector<1x8x32xbf16>
    tpu.vector_store %arg5[%c0_30, %c0_31, %c0_32], %85 {strides = array<i32>} : memref<1x8x32xbf16, #tpu.memory_space<vmem>>, vector<1x8x32xbf16>,
    return
  }
  func.func @transform_0(%arg0: i32, %arg1: i32) -> (i32, i32, i32, i32) {
    %c0_i32 = arith.constant 0 : i32
    %c0_i32_0 = arith.constant 0 : i32
    %c0_i32_1 = arith.constant 0 : i32
    return %arg0, %c0_i32, %c0_i32_0, %arg1 : i32, i32, i32, i32
  }
  func.func @transform_1(%arg0: i32, %arg1: i32) -> (i32, i32, i32, i32) {
    %c1_i32 = arith.constant 1 : i32
    %c0_i32 = arith.constant 0 : i32
    %c0_i32_0 = arith.constant 0 : i32
    return %arg0, %c1_i32, %c0_i32, %arg1 : i32, i32, i32, i32
  }
  func.func @transform_2(%arg0: i32, %arg1: i32) -> (i32, i32, i32, i32) {
    %c2_i32 = arith.constant 2 : i32
    %c0_i32 = arith.constant 0 : i32
    %c0_i32_0 = arith.constant 0 : i32
    return %arg0, %c2_i32, %c0_i32, %arg1 : i32, i32, i32, i32
  }
  func.func @transform_3(%arg0: i32, %arg1: i32) -> (i32, i32, i32) {
    %c0_i32 = arith.constant 0 : i32
    %c0_i32_0 = arith.constant 0 : i32
    return %arg0, %c0_i32, %arg1 : i32, i32, i32
  }
}

module attributes {stable_mosaic.version = 11 : i64} {
  func.func @kernel(%arg0: i32, %arg1: i32, %arg2: i32, %arg3: memref<16x32xbf16, #tpu.memory_space<vmem>>, %arg4: memref<32x32xbf16, #tpu.memory_space<vmem>>, %arg5: memref<1x32xf32, #tpu.memory_space<vmem>>, %arg6: memref<16x32xbf16, #tpu.memory_space<vmem>>, %arg7: memref<16x32xbf16, #tpu.memory_space<vmem>>, %arg8: memref<16x32xf32, #tpu.memory_space<vmem>>) attributes {dimension_semantics = [#tpu.dimension_semantics<parallel>, #tpu.dimension_semantics<parallel>, #tpu.dimension_semantics<arbitrary>], iteration_bounds = array<i64: 1, 1, 1>, scalar_prefetch = 0 : i64, scratch_operands = 1 : i64, tpu.core_type = #tpu.core_type<tc>, window_params = [{transform_indices = @transform_0, window_bounds = array<i64: 16, 32>}, {transform_indices = @transform_1, window_bounds = array<i64: 32, 32>}, {transform_indices = @transform_2, window_bounds = array<i64: 1, 32>}, {transform_indices = @transform_3, window_bounds = array<i64: 16, 32>}, {transform_indices = @transform_4, window_bounds = array<i64: 16, 32>}]} {
    %c0_i32 = arith.constant 0 : i32
    %0 = arith.cmpi eq, %arg2, %c0_i32 : i32
    %1 = arith.extui %0 : i1 to i32
    %c0_i32_0 = arith.constant 0 : i32
    %2 = arith.cmpi ne, %1, %c0_i32_0 : i32
    scf.if %2 {
      %cst_10 = arith.constant 0.000000e+00 : f32
      %12 = vector.broadcast %cst_10 : f32 to vector<16x32xf32>
      %c0_11 = arith.constant 0 : index
      %c0_12 = arith.constant 0 : index
      %13 = vector.load %arg8[%c0_11, %c0_12] : memref<16x32xf32, #tpu.memory_space<vmem>>, vector<16x32xf32>
      tpu.vector_store %arg8[%c0_11, %c0_12], %12 {strides = array<i32>} : memref<16x32xf32, #tpu.memory_space<vmem>>, vector<16x32xf32>,
    } else {
    }
    %c0 = arith.constant 0 : index
    %c0_1 = arith.constant 0 : index
    %3 = vector.load %arg3[%c0, %c0_1] : memref<16x32xbf16, #tpu.memory_space<vmem>>, vector<16x32xbf16>
    %c0_2 = arith.constant 0 : index
    %c0_3 = arith.constant 0 : index
    %4 = vector.load %arg8[%c0_2, %c0_3] : memref<16x32xf32, #tpu.memory_space<vmem>>, vector<16x32xf32>
    %c0_4 = arith.constant 0 : index
    %c0_5 = arith.constant 0 : index
    %5 = vector.load %arg4[%c0_4, %c0_5] : memref<32x32xbf16, #tpu.memory_space<vmem>>, vector<32x32xbf16>
    %cst = arith.constant dense<0.000000e+00> : vector<16x32xf32>
    %6 = tpu.matmul %3, %5, %cst {dimension_numbers = #tpu.dot_dimension_numbers<[1], [0], [0], [1], [0, 0, 1, 1], [], []>} : vector<16x32xbf16>, vector<32x32xbf16>, vector<16x32xf32> -> vector<16x32xf32>
    %7 = arith.addf %4, %6 : vector<16x32xf32>
    %c0_6 = arith.constant 0 : index
    %c0_7 = arith.constant 0 : index
    %8 = vector.load %arg8[%c0_6, %c0_7] : memref<16x32xf32, #tpu.memory_space<vmem>>, vector<16x32xf32>
    tpu.vector_store %arg8[%c0_6, %c0_7], %7 {strides = array<i32>} : memref<16x32xf32, #tpu.memory_space<vmem>>, vector<16x32xf32>,
    %c0_i32_8 = arith.constant 0 : i32
    %9 = arith.cmpi eq, %arg2, %c0_i32_8 : i32
    %10 = arith.extui %9 : i1 to i32
    %c0_i32_9 = arith.constant 0 : i32
    %11 = arith.cmpi ne, %10, %c0_i32_9 : i32
    scf.if %11 {
      %c0_10 = arith.constant 0 : index
      %c0_11 = arith.constant 0 : index
      %12 = vector.load %arg8[%c0_10, %c0_11] : memref<16x32xf32, #tpu.memory_space<vmem>>, vector<16x32xf32>
      %c0_12 = arith.constant 0 : index
      %c0_13 = arith.constant 0 : index
      %13 = vector.load %arg5[%c0_12, %c0_13] : memref<1x32xf32, #tpu.memory_space<vmem>>, vector<1x32xf32>
      %14 = vector.broadcast %13 : vector<1x32xf32> to vector<16x32xf32>
      %15 = arith.addf %12, %14 : vector<16x32xf32>
      %c0_14 = arith.constant 0 : index
      %c0_15 = arith.constant 0 : index
      %16 = vector.load %arg6[%c0_14, %c0_15] : memref<16x32xbf16, #tpu.memory_space<vmem>>, vector<16x32xbf16>
      %17 = arith.extf %16 : vector<16x32xbf16> to vector<16x32xf32>
      %18 = arith.addf %15, %17 : vector<16x32xf32>
      %19 = arith.truncf %18 : vector<16x32xf32> to vector<16x32xbf16>
      %c0_16 = arith.constant 0 : index
      %c0_17 = arith.constant 0 : index
      %20 = vector.load %arg7[%c0_16, %c0_17] : memref<16x32xbf16, #tpu.memory_space<vmem>>, vector<16x32xbf16>
      tpu.vector_store %arg7[%c0_16, %c0_17], %19 {strides = array<i32>} : memref<16x32xbf16, #tpu.memory_space<vmem>>, vector<16x32xbf16>,
    } else {
    }
    return
  }
  func.func @transform_0(%arg0: i32, %arg1: i32, %arg2: i32) -> (i32, i32) {
    %c0_i32 = arith.constant 0 : i32
    return %arg0, %arg2 : i32, i32
  }
  func.func @transform_1(%arg0: i32, %arg1: i32, %arg2: i32) -> (i32, i32) {
    %c0_i32 = arith.constant 0 : i32
    return %arg2, %arg1 : i32, i32
  }
  func.func @transform_2(%arg0: i32, %arg1: i32, %arg2: i32) -> (i32, i32) {
    %c0_i32 = arith.constant 0 : i32
    %c0_i32_0 = arith.constant 0 : i32
    return %c0_i32, %arg1 : i32, i32
  }
  func.func @transform_3(%arg0: i32, %arg1: i32, %arg2: i32) -> (i32, i32) {
    %c0_i32 = arith.constant 0 : i32
    return %arg0, %arg1 : i32, i32
  }
  func.func @transform_4(%arg0: i32, %arg1: i32, %arg2: i32) -> (i32, i32) {
    %c0_i32 = arith.constant 0 : i32
    return %arg0, %arg1 : i32, i32
  }
}

module attributes {stable_mosaic.version = 11 : i64} {
  func.func @kernel(%arg0: i32, %arg1: i32, %arg2: i32, %arg3: memref<16x32xbf16, #tpu.memory_space<vmem>>, %arg4: memref<32x128xbf16, #tpu.memory_space<vmem>>, %arg5: memref<1x128xf32, #tpu.memory_space<vmem>>, %arg6: memref<1x32xf32, #tpu.memory_space<vmem>>, %arg7: memref<1x32xf32, #tpu.memory_space<vmem>>, %arg8: memref<16x128xbf16, #tpu.memory_space<vmem>>, %arg9: memref<16x128xf32, #tpu.memory_space<vmem>>, %arg10: memref<16x32xbf16, #tpu.memory_space<vmem>>) attributes {dimension_semantics = [#tpu.dimension_semantics<parallel>, #tpu.dimension_semantics<arbitrary>, #tpu.dimension_semantics<arbitrary>], iteration_bounds = array<i64: 1, 1, 1>, scalar_prefetch = 0 : i64, scratch_operands = 2 : i64, tpu.core_type = #tpu.core_type<tc>, window_params = [{transform_indices = @transform_0, window_bounds = array<i64: 16, 32>}, {transform_indices = @transform_1, window_bounds = array<i64: 32, 128>}, {transform_indices = @transform_2, window_bounds = array<i64: 1, 128>}, {transform_indices = @transform_3, window_bounds = array<i64: 1, 32>}, {transform_indices = @transform_4, window_bounds = array<i64: 1, 32>}, {transform_indices = @transform_5, window_bounds = array<i64: 16, 128>}]} {
    %c0_i32 = arith.constant 0 : i32
    %0 = arith.cmpi eq, %arg2, %c0_i32 : i32
    %1 = arith.extui %0 : i1 to i32
    %c0_i32_0 = arith.constant 0 : i32
    %2 = arith.cmpi ne, %1, %c0_i32_0 : i32
    scf.if %2 {
      %cst_12 = arith.constant 0.000000e+00 : f32
      %15 = vector.broadcast %cst_12 : f32 to vector<16x128xf32>
      %c0_13 = arith.constant 0 : index
      %c0_14 = arith.constant 0 : index
      %16 = vector.load %arg9[%c0_13, %c0_14] : memref<16x128xf32, #tpu.memory_space<vmem>>, vector<16x128xf32>
      tpu.vector_store %arg9[%c0_13, %c0_14], %15 {strides = array<i32>} : memref<16x128xf32, #tpu.memory_space<vmem>>, vector<16x128xf32>,
    } else {
    }
    %c0_i32_1 = arith.constant 0 : i32
    %3 = arith.cmpi eq, %arg1, %c0_i32_1 : i32
    %4 = arith.extui %3 : i1 to i32
    %c0_i32_2 = arith.constant 0 : i32
    %5 = arith.cmpi ne, %4, %c0_i32_2 : i32
    scf.if %5 {
      %c0_12 = arith.constant 0 : index
      %c0_13 = arith.constant 0 : index
      %15 = vector.load %arg3[%c0_12, %c0_13] : memref<16x32xbf16, #tpu.memory_space<vmem>>, vector<16x32xbf16>
      %16 = arith.extf %15 : vector<16x32xbf16> to vector<16x32xf32>
      %cst_14 = arith.constant dense<0.000000e+00> : vector<16xf32>
      %17 = vector.multi_reduction <add>, %16, %cst_14 [1] : vector<16x32xf32> to vector<16xf32>
      %18 = vector.shape_cast %17 : vector<16xf32> to vector<16x1xf32>
      %cst_15 = arith.constant 3.200000e+01 : f32
      %19 = vector.broadcast %cst_15 : f32 to vector<16x1xf32>
      %20 = arith.divf %18, %19 : vector<16x1xf32>
      %21 = vector.broadcast %20 : vector<16x1xf32> to vector<16x32xf32>
      %22 = arith.subf %16, %21 : vector<16x32xf32>
      %23 = arith.mulf %22, %22 : vector<16x32xf32>
      %cst_16 = arith.constant dense<0.000000e+00> : vector<16xf32>
      %24 = vector.multi_reduction <add>, %23, %cst_16 [1] : vector<16x32xf32> to vector<16xf32>
      %25 = vector.shape_cast %24 : vector<16xf32> to vector<16x1xf32>
      %cst_17 = arith.constant 3.200000e+01 : f32
      %26 = vector.broadcast %cst_17 : f32 to vector<16x1xf32>
      %27 = arith.divf %25, %26 : vector<16x1xf32>
      %cst_18 = arith.constant 9.99999974E-6 : f32
      %28 = vector.broadcast %cst_18 : f32 to vector<16x1xf32>
      %29 = arith.addf %27, %28 : vector<16x1xf32>
      %30 = math.rsqrt %29 : vector<16x1xf32>
      %31 = vector.broadcast %30 : vector<16x1xf32> to vector<16x32xf32>
      %32 = arith.mulf %22, %31 : vector<16x32xf32>
      %c0_19 = arith.constant 0 : index
      %c0_20 = arith.constant 0 : index
      %33 = vector.load %arg6[%c0_19, %c0_20] : memref<1x32xf32, #tpu.memory_space<vmem>>, vector<1x32xf32>
      %34 = vector.broadcast %33 : vector<1x32xf32> to vector<16x32xf32>
      %35 = arith.mulf %32, %34 : vector<16x32xf32>
      %c0_21 = arith.constant 0 : index
      %c0_22 = arith.constant 0 : index
      %36 = vector.load %arg7[%c0_21, %c0_22] : memref<1x32xf32, #tpu.memory_space<vmem>>, vector<1x32xf32>
      %37 = vector.broadcast %36 : vector<1x32xf32> to vector<16x32xf32>
      %38 = arith.addf %35, %37 : vector<16x32xf32>
      %39 = arith.truncf %38 : vector<16x32xf32> to vector<16x32xbf16>
      %c0_23 = arith.constant 0 : index
      %c0_24 = arith.constant 0 : index
      %40 = vector.load %arg10[%c0_23, %c0_24] : memref<16x32xbf16, #tpu.memory_space<vmem>>, vector<16x32xbf16>
      tpu.vector_store %arg10[%c0_23, %c0_24], %39 {strides = array<i32>} : memref<16x32xbf16, #tpu.memory_space<vmem>>, vector<16x32xbf16>,
    } else {
    }
    %c0 = arith.constant 0 : index
    %c0_3 = arith.constant 0 : index
    %6 = vector.load %arg10[%c0, %c0_3] : memref<16x32xbf16, #tpu.memory_space<vmem>>, vector<16x32xbf16>
    %c0_4 = arith.constant 0 : index
    %c0_5 = arith.constant 0 : index
    %7 = vector.load %arg9[%c0_4, %c0_5] : memref<16x128xf32, #tpu.memory_space<vmem>>, vector<16x128xf32>
    %c0_6 = arith.constant 0 : index
    %c0_7 = arith.constant 0 : index
    %8 = vector.load %arg4[%c0_6, %c0_7] : memref<32x128xbf16, #tpu.memory_space<vmem>>, vector<32x128xbf16>
    %cst = arith.constant dense<0.000000e+00> : vector<16x128xf32>
    %9 = tpu.matmul %6, %8, %cst {dimension_numbers = #tpu.dot_dimension_numbers<[1], [0], [0], [1], [0, 0, 1, 1], [], []>} : vector<16x32xbf16>, vector<32x128xbf16>, vector<16x128xf32> -> vector<16x128xf32>
    %10 = arith.addf %7, %9 : vector<16x128xf32>
    %c0_8 = arith.constant 0 : index
    %c0_9 = arith.constant 0 : index
    %11 = vector.load %arg9[%c0_8, %c0_9] : memref<16x128xf32, #tpu.memory_space<vmem>>, vector<16x128xf32>
    tpu.vector_store %arg9[%c0_8, %c0_9], %10 {strides = array<i32>} : memref<16x128xf32, #tpu.memory_space<vmem>>, vector<16x128xf32>,
    %c0_i32_10 = arith.constant 0 : i32
    %12 = arith.cmpi eq, %arg2, %c0_i32_10 : i32
    %13 = arith.extui %12 : i1 to i32
    %c0_i32_11 = arith.constant 0 : i32
    %14 = arith.cmpi ne, %13, %c0_i32_11 : i32
    scf.if %14 {
      %c0_12 = arith.constant 0 : index
      %c0_13 = arith.constant 0 : index
      %15 = vector.load %arg9[%c0_12, %c0_13] : memref<16x128xf32, #tpu.memory_space<vmem>>, vector<16x128xf32>
      %c0_14 = arith.constant 0 : index
      %c0_15 = arith.constant 0 : index
      %16 = vector.load %arg5[%c0_14, %c0_15] : memref<1x128xf32, #tpu.memory_space<vmem>>, vector<1x128xf32>
      %17 = vector.broadcast %16 : vector<1x128xf32> to vector<16x128xf32>
      %18 = arith.addf %15, %17 : vector<16x128xf32>
      %cst_16 = arith.constant 5.000000e-01 : f32
      %19 = vector.broadcast %cst_16 : f32 to vector<16x128xf32>
      %20 = arith.mulf %19, %18 : vector<16x128xf32>
      %cst_17 = arith.constant 4.471500e-02 : f32
      %21 = vector.broadcast %cst_17 : f32 to vector<16x128xf32>
      %22 = arith.mulf %21, %18 : vector<16x128xf32>
      %23 = arith.mulf %22, %18 : vector<16x128xf32>
      %24 = arith.mulf %23, %18 : vector<16x128xf32>
      %25 = arith.addf %18, %24 : vector<16x128xf32>
      %cst_18 = arith.constant 0.797884583 : f32
      %26 = vector.broadcast %cst_18 : f32 to vector<16x128xf32>
      %27 = arith.mulf %26, %25 : vector<16x128xf32>
      %28 = math.tanh %27 : vector<16x128xf32>
      %cst_19 = arith.constant 1.000000e+00 : f32
      %29 = vector.broadcast %cst_19 : f32 to vector<16x128xf32>
      %30 = arith.addf %29, %28 : vector<16x128xf32>
      %31 = arith.mulf %20, %30 : vector<16x128xf32>
      %32 = arith.truncf %31 : vector<16x128xf32> to vector<16x128xbf16>
      %c0_20 = arith.constant 0 : index
      %c0_21 = arith.constant 0 : index
      %33 = vector.load %arg8[%c0_20, %c0_21] : memref<16x128xbf16, #tpu.memory_space<vmem>>, vector<16x128xbf16>
      tpu.vector_store %arg8[%c0_20, %c0_21], %32 {strides = array<i32>} : memref<16x128xbf16, #tpu.memory_space<vmem>>, vector<16x128xbf16>,
    } else {
    }
    return
  }
  func.func @transform_0(%arg0: i32, %arg1: i32, %arg2: i32) -> (i32, i32) {
    %c0_i32 = arith.constant 0 : i32
    return %arg0, %arg2 : i32, i32
  }
  func.func @transform_1(%arg0: i32, %arg1: i32, %arg2: i32) -> (i32, i32) {
    %c0_i32 = arith.constant 0 : i32
    return %arg2, %arg1 : i32, i32
  }
  func.func @transform_2(%arg0: i32, %arg1: i32, %arg2: i32) -> (i32, i32) {
    %c0_i32 = arith.constant 0 : i32
    %c0_i32_0 = arith.constant 0 : i32
    return %c0_i32, %arg1 : i32, i32
  }
  func.func @transform_3(%arg0: i32, %arg1: i32, %arg2: i32) -> (i32, i32) {
    %c0_i32 = arith.constant 0 : i32
    %c0_i32_0 = arith.constant 0 : i32
    return %c0_i32, %arg2 : i32, i32
  }
  func.func @transform_4(%arg0: i32, %arg1: i32, %arg2: i32) -> (i32, i32) {
    %c0_i32 = arith.constant 0 : i32
    %c0_i32_0 = arith.constant 0 : i32
    return %c0_i32, %arg2 : i32, i32
  }
  func.func @transform_5(%arg0: i32, %arg1: i32, %arg2: i32) -> (i32, i32) {
    %c0_i32 = arith.constant 0 : i32
    return %arg0, %arg1 : i32, i32
  }
}

module attributes {stable_mosaic.version = 11 : i64} {
  func.func @kernel(%arg0: i32, %arg1: i32, %arg2: i32, %arg3: memref<16x128xbf16, #tpu.memory_space<vmem>>, %arg4: memref<128x32xbf16, #tpu.memory_space<vmem>>, %arg5: memref<1x32xf32, #tpu.memory_space<vmem>>, %arg6: memref<16x32xbf16, #tpu.memory_space<vmem>>, %arg7: memref<16x32xbf16, #tpu.memory_space<vmem>>, %arg8: memref<16x32xf32, #tpu.memory_space<vmem>>) attributes {dimension_semantics = [#tpu.dimension_semantics<parallel>, #tpu.dimension_semantics<parallel>, #tpu.dimension_semantics<arbitrary>], iteration_bounds = array<i64: 1, 1, 1>, scalar_prefetch = 0 : i64, scratch_operands = 1 : i64, tpu.core_type = #tpu.core_type<tc>, window_params = [{transform_indices = @transform_0, window_bounds = array<i64: 16, 128>}, {transform_indices = @transform_1, window_bounds = array<i64: 128, 32>}, {transform_indices = @transform_2, window_bounds = array<i64: 1, 32>}, {transform_indices = @transform_3, window_bounds = array<i64: 16, 32>}, {transform_indices = @transform_4, window_bounds = array<i64: 16, 32>}]} {
    %c0_i32 = arith.constant 0 : i32
    %0 = arith.cmpi eq, %arg2, %c0_i32 : i32
    %1 = arith.extui %0 : i1 to i32
    %c0_i32_0 = arith.constant 0 : i32
    %2 = arith.cmpi ne, %1, %c0_i32_0 : i32
    scf.if %2 {
      %cst_10 = arith.constant 0.000000e+00 : f32
      %12 = vector.broadcast %cst_10 : f32 to vector<16x32xf32>
      %c0_11 = arith.constant 0 : index
      %c0_12 = arith.constant 0 : index
      %13 = vector.load %arg8[%c0_11, %c0_12] : memref<16x32xf32, #tpu.memory_space<vmem>>, vector<16x32xf32>
      tpu.vector_store %arg8[%c0_11, %c0_12], %12 {strides = array<i32>} : memref<16x32xf32, #tpu.memory_space<vmem>>, vector<16x32xf32>,
    } else {
    }
    %c0 = arith.constant 0 : index
    %c0_1 = arith.constant 0 : index
    %3 = vector.load %arg3[%c0, %c0_1] : memref<16x128xbf16, #tpu.memory_space<vmem>>, vector<16x128xbf16>
    %c0_2 = arith.constant 0 : index
    %c0_3 = arith.constant 0 : index
    %4 = vector.load %arg8[%c0_2, %c0_3] : memref<16x32xf32, #tpu.memory_space<vmem>>, vector<16x32xf32>
    %c0_4 = arith.constant 0 : index
    %c0_5 = arith.constant 0 : index
    %5 = vector.load %arg4[%c0_4, %c0_5] : memref<128x32xbf16, #tpu.memory_space<vmem>>, vector<128x32xbf16>
    %cst = arith.constant dense<0.000000e+00> : vector<16x32xf32>
    %6 = tpu.matmul %3, %5, %cst {dimension_numbers = #tpu.dot_dimension_numbers<[1], [0], [0], [1], [0, 0, 1, 1], [], []>} : vector<16x128xbf16>, vector<128x32xbf16>, vector<16x32xf32> -> vector<16x32xf32>
    %7 = arith.addf %4, %6 : vector<16x32xf32>
    %c0_6 = arith.constant 0 : index
    %c0_7 = arith.constant 0 : index
    %8 = vector.load %arg8[%c0_6, %c0_7] : memref<16x32xf32, #tpu.memory_space<vmem>>, vector<16x32xf32>
    tpu.vector_store %arg8[%c0_6, %c0_7], %7 {strides = array<i32>} : memref<16x32xf32, #tpu.memory_space<vmem>>, vector<16x32xf32>,
    %c0_i32_8 = arith.constant 0 : i32
    %9 = arith.cmpi eq, %arg2, %c0_i32_8 : i32
    %10 = arith.extui %9 : i1 to i32
    %c0_i32_9 = arith.constant 0 : i32
    %11 = arith.cmpi ne, %10, %c0_i32_9 : i32
    scf.if %11 {
      %c0_10 = arith.constant 0 : index
      %c0_11 = arith.constant 0 : index
      %12 = vector.load %arg8[%c0_10, %c0_11] : memref<16x32xf32, #tpu.memory_space<vmem>>, vector<16x32xf32>
      %c0_12 = arith.constant 0 : index
      %c0_13 = arith.constant 0 : index
      %13 = vector.load %arg5[%c0_12, %c0_13] : memref<1x32xf32, #tpu.memory_space<vmem>>, vector<1x32xf32>
      %14 = vector.broadcast %13 : vector<1x32xf32> to vector<16x32xf32>
      %15 = arith.addf %12, %14 : vector<16x32xf32>
      %c0_14 = arith.constant 0 : index
      %c0_15 = arith.constant 0 : index
      %16 = vector.load %arg6[%c0_14, %c0_15] : memref<16x32xbf16, #tpu.memory_space<vmem>>, vector<16x32xbf16>
      %17 = arith.extf %16 : vector<16x32xbf16> to vector<16x32xf32>
      %18 = arith.addf %15, %17 : vector<16x32xf32>
      %19 = arith.truncf %18 : vector<16x32xf32> to vector<16x32xbf16>
      %c0_16 = arith.constant 0 : index
      %c0_17 = arith.constant 0 : index
      %20 = vector.load %arg7[%c0_16, %c0_17] : memref<16x32xbf16, #tpu.memory_space<vmem>>, vector<16x32xbf16>
      tpu.vector_store %arg7[%c0_16, %c0_17], %19 {strides = array<i32>} : memref<16x32xbf16, #tpu.memory_space<vmem>>, vector<16x32xbf16>,
    } else {
    }
    return
  }
  func.func @transform_0(%arg0: i32, %arg1: i32, %arg2: i32) -> (i32, i32) {
    %c0_i32 = arith.constant 0 : i32
    return %arg0, %arg2 : i32, i32
  }
  func.func @transform_1(%arg0: i32, %arg1: i32, %arg2: i32) -> (i32, i32) {
    %c0_i32 = arith.constant 0 : i32
    return %arg2, %arg1 : i32, i32
  }
  func.func @transform_2(%arg0: i32, %arg1: i32, %arg2: i32) -> (i32, i32) {
    %c0_i32 = arith.constant 0 : i32
    %c0_i32_0 = arith.constant 0 : i32
    return %c0_i32, %arg1 : i32, i32
  }
  func.func @transform_3(%arg0: i32, %arg1: i32, %arg2: i32) -> (i32, i32) {
    %c0_i32 = arith.constant 0 : i32
    return %arg0, %arg1 : i32, i32
  }
  func.func @transform_4(%arg0: i32, %arg1: i32, %arg2: i32) -> (i32, i32) {
    %c0_i32 = arith.constant 0 : i32
    return %arg0, %arg1 : i32, i32
  }
}

module attributes {stable_mosaic.version = 11 : i64} {
  func.func @kernel(%arg0: i32, %arg1: i32, %arg2: i32, %arg3: memref<16x32xbf16, #tpu.memory_space<vmem>>, %arg4: memref<32x64xbf16, #tpu.memory_space<vmem>>, %arg5: memref<1x64xf32, #tpu.memory_space<vmem>>, %arg6: memref<16x64xbf16, #tpu.memory_space<vmem>>, %arg7: memref<16x64xf32, #tpu.memory_space<vmem>>) attributes {dimension_semantics = [#tpu.dimension_semantics<parallel>, #tpu.dimension_semantics<parallel>, #tpu.dimension_semantics<arbitrary>], iteration_bounds = array<i64: 1, 1, 1>, scalar_prefetch = 0 : i64, scratch_operands = 1 : i64, tpu.core_type = #tpu.core_type<tc>, window_params = [{transform_indices = @transform_0, window_bounds = array<i64: 16, 32>}, {transform_indices = @transform_1, window_bounds = array<i64: 32, 64>}, {transform_indices = @transform_2, window_bounds = array<i64: 1, 64>}, {transform_indices = @transform_3, window_bounds = array<i64: 16, 64>}]} {
    %c0_i32 = arith.constant 0 : i32
    %0 = arith.cmpi eq, %arg2, %c0_i32 : i32
    %1 = arith.extui %0 : i1 to i32
    %c0_i32_0 = arith.constant 0 : i32
    %2 = arith.cmpi ne, %1, %c0_i32_0 : i32
    scf.if %2 {
      %cst_10 = arith.constant 0.000000e+00 : f32
      %12 = vector.broadcast %cst_10 : f32 to vector<16x64xf32>
      %c0_11 = arith.constant 0 : index
      %c0_12 = arith.constant 0 : index
      %13 = vector.load %arg7[%c0_11, %c0_12] : memref<16x64xf32, #tpu.memory_space<vmem>>, vector<16x64xf32>
      tpu.vector_store %arg7[%c0_11, %c0_12], %12 {strides = array<i32>} : memref<16x64xf32, #tpu.memory_space<vmem>>, vector<16x64xf32>,
    } else {
    }
    %c0 = arith.constant 0 : index
    %c0_1 = arith.constant 0 : index
    %3 = vector.load %arg3[%c0, %c0_1] : memref<16x32xbf16, #tpu.memory_space<vmem>>, vector<16x32xbf16>
    %c0_2 = arith.constant 0 : index
    %c0_3 = arith.constant 0 : index
    %4 = vector.load %arg7[%c0_2, %c0_3] : memref<16x64xf32, #tpu.memory_space<vmem>>, vector<16x64xf32>
    %c0_4 = arith.constant 0 : index
    %c0_5 = arith.constant 0 : index
    %5 = vector.load %arg4[%c0_4, %c0_5] : memref<32x64xbf16, #tpu.memory_space<vmem>>, vector<32x64xbf16>
    %cst = arith.constant dense<0.000000e+00> : vector<16x64xf32>
    %6 = tpu.matmul %3, %5, %cst {dimension_numbers = #tpu.dot_dimension_numbers<[1], [0], [0], [1], [0, 0, 1, 1], [], []>} : vector<16x32xbf16>, vector<32x64xbf16>, vector<16x64xf32> -> vector<16x64xf32>
    %7 = arith.addf %4, %6 : vector<16x64xf32>
    %c0_6 = arith.constant 0 : index
    %c0_7 = arith.constant 0 : index
    %8 = vector.load %arg7[%c0_6, %c0_7] : memref<16x64xf32, #tpu.memory_space<vmem>>, vector<16x64xf32>
    tpu.vector_store %arg7[%c0_6, %c0_7], %7 {strides = array<i32>} : memref<16x64xf32, #tpu.memory_space<vmem>>, vector<16x64xf32>,
    %c0_i32_8 = arith.constant 0 : i32
    %9 = arith.cmpi eq, %arg2, %c0_i32_8 : i32
    %10 = arith.extui %9 : i1 to i32
    %c0_i32_9 = arith.constant 0 : i32
    %11 = arith.cmpi ne, %10, %c0_i32_9 : i32
    scf.if %11 {
      %c0_10 = arith.constant 0 : index
      %c0_11 = arith.constant 0 : index
      %12 = vector.load %arg7[%c0_10, %c0_11] : memref<16x64xf32, #tpu.memory_space<vmem>>, vector<16x64xf32>
      %c0_12 = arith.constant 0 : index
      %c0_13 = arith.constant 0 : index
      %13 = vector.load %arg5[%c0_12, %c0_13] : memref<1x64xf32, #tpu.memory_space<vmem>>, vector<1x64xf32>
      %14 = vector.broadcast %13 : vector<1x64xf32> to vector<16x64xf32>
      %15 = arith.addf %12, %14 : vector<16x64xf32>
      %16 = arith.truncf %15 : vector<16x64xf32> to vector<16x64xbf16>
      %c0_14 = arith.constant 0 : index
      %c0_15 = arith.constant 0 : index
      %17 = vector.load %arg6[%c0_14, %c0_15] : memref<16x64xbf16, #tpu.memory_space<vmem>>, vector<16x64xbf16>
      tpu.vector_store %arg6[%c0_14, %c0_15], %16 {strides = array<i32>} : memref<16x64xbf16, #tpu.memory_space<vmem>>, vector<16x64xbf16>,
    } else {
    }
    return
  }
  func.func @transform_0(%arg0: i32, %arg1: i32, %arg2: i32) -> (i32, i32) {
    %c0_i32 = arith.constant 0 : i32
    return %arg0, %arg2 : i32, i32
  }
  func.func @transform_1(%arg0: i32, %arg1: i32, %arg2: i32) -> (i32, i32) {
    %c0_i32 = arith.constant 0 : i32
    return %arg2, %arg1 : i32, i32
  }
  func.func @transform_2(%arg0: i32, %arg1: i32, %arg2: i32) -> (i32, i32) {
    %c0_i32 = arith.constant 0 : i32
    %c0_i32_0 = arith.constant 0 : i32
    return %c0_i32, %arg1 : i32, i32
  }
  func.func @transform_3(%arg0: i32, %arg1: i32, %arg2: i32) -> (i32, i32) {
    %c0_i32 = arith.constant 0 : i32
    return %arg0, %arg1 : i32, i32
  }
}

</mosaic_0001>

<bundles_post_ra>
// kernel: lora_decoder_forward.14
= control target key start
LH: loop header
LB: loop body
LE: loop exit
PB: predicated region body
PF: predicated region fallthrough
CT: control target
= control target key end

     0   :  { %8 = vsyncpa [#allocation3], 0  ;;  %s859_s0 = inlined_call_operand.hbm [shape: bf16[2,8,32], index: 0, kind: input, shape index: {}]   ;;  %s860_s1 = inlined_call_operand.hbm [shape: bf16[8,32], index: 1, kind: input, shape index: {}]   ;;  %s861_s2 = inlined_call_operand.hbm [shape: bf16[2,1,32], index: 2, kind: input, shape index: {}]   ;;  %s862_s3 = inlined_call_operand.hbm [shape: bf16[2,8,32], index: 3, kind: output, shape index: {}]  }
   0x1   :  { %10 = vsyncpa [#allocation3 + $0x1], 0 }
   0x2   :  { %11 = vsyncpa [#allocation6], 0 }
   0x3   :  { %12 = vsyncpa [#allocation4], 0 }
   0x4   :  { %14 = vsyncpa [#allocation4 + $0x1], 0  ;;  %s620_s12 = smov 0   ;;  %s622_s13 = smov 0  }
   0x5   :  { %s624_s14 = smov 0   ;;  %s626_s15 = smov 0  }
   0x6 LB: > { %s641_s16 = sadd.s32 1, %s594_s15   ;;  %s27_s17 = sadd.s32 1, %s590_s14  ;;  %s594_s15 = sphi %s626_s15, %s885_s15   ;;  %s590_s14 = sphi %s624_s14, %s884_s14   ;;  %s586_s13 = sphi %s622_s13, %s883_s13   ;;  %s582_s12 = sphi %s620_s12, %s882_s12  }
   0x7   : > { %s24_s18 = ssub.s32 %s594_s15, %s641_s16  ;;  %p34_p0 = scmp.ne.s32.totalorder %s590_s14, %s586_s13 }
   0x8   : > { %p25_p1 = scmp.eq.s32.totalorder %s24_s18, 0  ;;  %p35_p2 = scmp.eq.s32.totalorder %s594_s15, 0 }
   0x9   : > { %p396_p4 = scmp.lt.s32.totalorder %s594_s15, 2  ;;  %s148_s20 = sand.u32 1, %s594_s15  }
   0xa   : > { %s652_s19 = scalar_select %p25_p1, %s590_s14, %s27_s17  }
   0xb   : > { %p36_p5 = por %p35_p2, %p34_p0  ;;  %s150_s21 = sand.u32 1, %s590_s14  }
   0xc   : > { %s359_s22 = sshll.u32 %s150_s21, 2  ;;  %s360_s23 = sshll.u32 %s594_s15, 6 }
   0xd   : > { %s665_s26 = scalar_lea.hbm %s859_s0, %s360_s23  ;;  %s152_s27 = scalar_lea.vmem [#allocation2], %s359_s22 }
   0xe   : > { %s159_s28 = sshll.u32 %s152_s27, 4  ;;  %p667_p6 = pnand %p396_p4, %p36_p5  ;;  %s671_s28 = int_to_ptr.vmem [resolvable:$true] %s159_s28 }
   0xf   : > { %s673_s30 = scalar_lea.sflag [#allocation3], %s148_s20  ;;  %s432_s4 = scalar_lea.hbm %s665_s26, 64 }
  0x10   : > { %p433_p7 = scmp.ne.s32.totalorder %s665_s26, %s432_s4  ;;  %p434_p8 = pneg %p667_p6 }
  0x11   : > { %s437_s7 = scalar_lea.hbm %s859_s0, 128  ;;  %p438_p11 = scmp.lt.u32.totalorder %s665_s26, %s859_s0 }
  0x12   : > { %p435_p9 = pnand %p434_p8, %p433_p7  ;;  %p439_p12 = scmp.lt.u32.totalorder %s437_s7, %s432_s4 }
  0x13   : > { %p441_p1 = scmp.lt.u32.totalorder %s432_s4, %s665_s26 }
  0x14   : > { %p436_p10 = pneg %p435_p9  ;;  %p440_p13 = por %p439_p12, %p438_p11 }
  0x16   : > { %p442_p2 = por %p441_p1, %p440_p13 }
  0x18   : > { %p443_p4 = pnand %p442_p2, %p436_p10 }
  0x1a   : > { %446 = shalt.err (!%p443_p4)
}
  0x1b   : > { %s447_s10 = scalar_lea.vmem %s671_s28, 64  ;;  %s596_s11 = smov [#allocation2]  }
  0x1c   : > { %p448_p5 = scmp.ne.s32.totalorder %s671_s28, %s447_s10  ;;  %s452_s17 = sshll.u32 %s596_s11, 4  ;;  %s453_s17 = int_to_ptr.vmem [resolvable:$false] %s452_s17 }
  0x1d   : > { %s454_s18 = scalar_lea.vmem %s453_s17, 128  ;;  %p455_p3 = scmp.lt.s32.totalorder %s671_s28, %s453_s17 }
  0x1e   : > { %p450_p7 = pnand %p448_p5, %p434_p8  ;;  %p456_p11 = scmp.lt.s32.totalorder %s454_s18, %s447_s10 }
  0x20   : > { %p451_p9 = pneg %p450_p7  ;;  %p457_p12 = por %p456_p11, %p455_p3 }
  0x22   : > { %p458_p13 = pnand %p457_p12, %p451_p9 }
  0x24   : > { %461 = shalt.err (!%p458_p13)
}
  0x25   : > { %387 = dma.hbm_to_vmem [thread:$0]  (!%p667_p6), %s665_s26, 64, %s671_s28, %s673_s30  }
  0x26   : > { %s702_s20 = sadd.s32 4294967295, %s594_s15   ;;  %s355_s22 = sadd.s32 4294967294, %s594_s15  }
  0x27   : > { %p40_p3 = scmp.ne.s32.totalorder %s586_s13, %s582_s12  ;;  %p863_p10 = scmp.eq.s32.totalorder %s702_s20, 0 }
  0x28   : > { %p111_p1 = scmp.eq.s32.totalorder %s702_s20, 1  ;;  %p117_p2 = scmp.eq.s32.totalorder %s355_s22, 1 }
  0x29   : > { %p711_p4 = por %p863_p10, %p40_p3  ;;  %p356_p5 = scmp.ge.s32.totalorder %s594_s15, 1 }
  0x2a   : > { %p719_p7 = por %p111_p1, %p34_p0  ;;  %p723_p9 = por %p117_p2, %p40_p3 }
  0x2b   : > { %s869_s23 = scalar_select %p711_p4, 1, 0 }
  0x2c   : > { %s870_s24 = scalar_select %p719_p7, 1, 0 }
  0x2d   : > { %s871_s25 = scalar_select %p723_p9, 1, 0 }
  0x2e   : > { %p124_p11 = scmp.lt.s32.totalorder %s594_s15, 3  ;;  %s597_s27 = smov [#allocation5]  }
  0x2f   : > { %s137_s28 = sshll.u32 %s597_s27, 4  ;;  %s361_s4 = sshll.u32 %s594_s15, 4  ;;  %s740_s28 = int_to_ptr.vmem [resolvable:$true] %s137_s28 }
  0x30   : > { %p728_p12 = pnand %p356_p5, %p124_p11  ;;  %s738_s7 = scalar_lea.hbm %s861_s2, %s361_s4 }
  0x31   : > { %s169_s8 = scalar_lea.vmem [#allocation7], %s150_s21  ;;  %s462_s11 = scalar_lea.hbm %s738_s7, 16 }
  0x32   : > { %s872_s26 = scalar_select %p728_p12, 1, 0 }
  0x33   : > { %p380_p13 = pneg %p728_p12  ;;  %s176_s9 = sshll.u32 %s169_s8, 4  ;;  %s177_s9 = int_to_ptr.vmem [resolvable:$true] %s176_s9 }
  0x34   : > { %p463_p3 = scmp.ne.s32.totalorder %s738_s7, %s462_s11  ;;  %s467_s22 = scalar_lea.hbm %s861_s2, 32 }
  0x35   : > { %p746_p0 = pnand %p380_p13, %p863_p10  ;;  %p468_p5 = scmp.lt.u32.totalorder %s738_s7, %s861_s2 }
  0x36   : > { %p465_p1 = pnand %p463_p3, %p434_p8  ;;  %p469_p11 = scmp.lt.u32.totalorder %s467_s22, %s462_s11 }
  0x37   : > { %s873_s10 = scalar_select %p746_p0, 1, 0 }
  0x38   : > { %p466_p2 = pneg %p465_p1  ;;  %p470_p13 = por %p469_p11, %p468_p5 }
  0x39   : > { %p471_p10 = scmp.lt.u32.totalorder %s462_s11, %s738_s7 }
  0x3b   : > { %p472_p9 = por %p471_p10, %p470_p13 }
  0x3d   : > { %p473_p7 = pnand %p472_p9, %p466_p2 }
  0x3f   : > { %476 = shalt.err (!%p473_p7)
}
  0x40   : > { %s477_s21 = scalar_lea.vmem %s177_s9, 16  ;;  %s598_s5 = smov [#allocation7]  }
  0x41   : > { %p478_p4 = scmp.ne.s32.totalorder %s177_s9, %s477_s21  ;;  %s482_s6 = sshll.u32 %s598_s5, 4  ;;  %s483_s6 = int_to_ptr.vmem [resolvable:$false] %s482_s6 }
  0x42   : > { %s484_s8 = scalar_lea.vmem %s483_s6, 32  ;;  %p485_p12 = scmp.lt.s32.totalorder %s177_s9, %s483_s6 }
  0x43   : > { %p480_p3 = pnand %p478_p4, %p434_p8  ;;  %p486_p0 = scmp.lt.s32.totalorder %s484_s8, %s477_s21 }
  0x45   : > { %p481_p1 = pneg %p480_p3  ;;  %p487_p5 = por %p486_p0, %p485_p12 }
  0x47   : > { %p488_p11 = pnand %p487_p5, %p481_p1 }
  0x49   : > { %491 = shalt.err (!%p488_p11)
}
  0x4a   : > { %390 = dma.hbm_to_vmem [thread:$0]  (!%p667_p6), %s738_s7, 16, %s177_s9, %s673_s30  }
  0x4b   : > { %s492_s18 = scalar_lea.hbm %s860_s1, 64  ;;  %p874_p10 = scmp.ne.s32.totalorder %s873_s10, 0 }
  0x4c   : > { %p493_p8 = scmp.ne.s32.totalorder %s860_s1, %s492_s18  ;;  %p499_p12 = scmp.lt.u32.totalorder %s492_s18, %s860_s1 }
  0x4d   : > { %p494_p4 = pneg %p874_p10 }
  0x4f   : > { %p495_p7 = pnand %p494_p4, %p493_p8 }
  0x51   : > { %p496_p9 = pneg %p495_p7 }
  0x53   : > { %p501_p0 = pnand %p499_p12, %p496_p9 }
  0x55   : > { %504 = shalt.err (!%p501_p0)
}
  0x56   : > { %s505_s29 = scalar_lea.vmem %s740_s28, 64  ;;  %p513_p3 = scmp.lt.s32.totalorder %s740_s28, %s740_s28 }
  0x57   : > { %p506_p6 = scmp.ne.s32.totalorder %s740_s28, %s505_s29  ;;  %p514_p1 = scmp.lt.s32.totalorder %s505_s29, %s505_s29 }
  0x59   : > { %p508_p2 = pnand %p506_p6, %p494_p4  ;;  %p515_p5 = por %p514_p1, %p513_p3 }
  0x5b   : > { %p509_p13 = pneg %p508_p2 }
  0x5d   : > { %p516_p11 = pnand %p515_p5, %p509_p13 }
  0x5f   : > { %519 = shalt.err (!%p516_p11)
}
  0x60   : > { %383 = dma.hbm_to_vmem [thread:$0]  (!%p874_p10), %s860_s1, 64, %s740_s28, [#allocation6]  }
  0x61   : > { %p875_p8 = scmp.ne.s32.totalorder %s872_s26, 0 }
  0x62   : > { %s187_s9 = sand.u32 (!%p875_p8), 1, %s702_s20   ;;  %s795_s5 = sand.u32 (!%p875_p8), 1, %s586_s13  }
  0x63   : > { %185 = sbr.rel (%p875_p8) target bundleno = 139 (0x8b), region = 32  ;;  %s363_s6 = sshll.u32 (!%p875_p8), %s795_s5, 2 }
  0x64   : > { %s188_s8 = scalar_lea.sflag (!%p875_p8), [#allocation3], %s187_s9  ;;  %s191_s11 = scalar_lea.vmem (!%p875_p8), [#allocation2], %s363_s6 }
  0x65   : > { %p876_p4 = scmp.ne.s32.totalorder (!%p875_p8), %s869_s23, 0 }
  0x6a   : > { %565 = dma.done.wait (%p876_p4), %s188_s8, 64  }
  0x6b   : > { %567 = vsyncadd (%p876_p4), %s188_s8, 4294967232  ;;  %p877_p10 = scmp.eq.s32.totalorder %s702_s20, 0 }
  0x6d   : > { %569 = dma.done.wait (%p877_p10), [#allocation6], 64   ;;  %p878_p7 = pmov %p877_p10 }
  0x6e   : > { %s203_s26 = scalar_lea.vmem [#allocation7], %s795_s5 }
  0x6f   : > { %571 = vsyncadd (%p878_p7), [#allocation6], 4294967232 }
  0x70   : > { %573 = dma.done.wait (%p876_p4), %s188_s8, 16  }
  0x71   : > { %575 = vsyncadd (%p876_p4), %s188_s8, 4294967280  ;;  %v237_v0 = vlaneseq  ;;  %v230_v3 = vld [vmem:[%s191_s11] sm:$0xf]  ;;  %v231_v4 = vld [vmem:[#allocation5] sm:$0xf]  ;;  %s229_s28 = scalar_lea.vmem [#allocation8], %s363_s6 }
  0x72   : > { %v233_v5 = vld [vmem:[%s203_s26] sm:$0x1]  ;;  %v232_v6 = vadd.bf16 %v231_v4, %v230_v3  ;;  %s258_s10 = sshll.u32 %s229_s28, 4  ;;  %s367_s17 = sshll.u32 %s702_s20, 6  ;;  %vm242_vm0 = vcmask 257024   ;;  %s812_s10 = int_to_ptr.vmem [resolvable:$true] %s258_s10 }
  0x73   : > { %v238_v1 = vshrl.u32 %v237_v0, 7  ;;  %v235_v7 = vpack.i.b16 %v233_v5, %v233_v5  ;;  %s817_s22 = scalar_lea.hbm %s862_s3, %s367_s17  ;;  %s245_s27 = scalar_lea.sflag [#allocation4], %s795_s5 }
  0x74   : > { %s520_s4 = scalar_lea.vmem %s812_s10, 64  ;;  %p879_p12 = scmp.ne.s32.totalorder %s870_s24, 0 }
  0x75   : > { %v239_v2 = vsub.s32 0, %v238_v1  ;;  %p521_p9 = scmp.ne.s32.totalorder %s812_s10, %s520_s4  ;;  %s599_s20 = smov [#allocation8]  }
  0x76   : > { %s524_s21 = sshll.u32 %s599_s20, 4  ;;  %s525_s21 = int_to_ptr.vmem [resolvable:$false] %s524_s21 }
  0x77   : > { %v240_v8 = vrot.slane %v235_v7, %v239_v2  ;;  %p522_p0 = pnand %p521_p9, %p879_p12  ;;  %s526_s29 = scalar_lea.vmem %s525_s21, 128 }
  0x78   : > { %p527_p2 = scmp.lt.s32.totalorder %s812_s10, %s525_s21  ;;  %p528_p13 = scmp.lt.s32.totalorder %s526_s29, %s520_s4 }
  0x79   : > { %v241_v9 = vadd.bf16 %v240_v8, %v232_v6  ;;  %p523_p6 = pneg %p522_p0 }
  0x7a   : > { %p529_p3 = por %p528_p13, %p527_p2 }
  0x7b   : > { %243 = vst.msk [vmem:[%s229_s28] sm:$0xf] %vm242_vm0, %v241_v9 }
  0x7c   : > { %p530_p1 = pnand %p529_p3, %p523_p6 }
  0x7e   : > { %533 = shalt.err (!%p530_p1)
}
  0x7f   : > { %s534_s30 = scalar_lea.hbm %s817_s22, 64  ;;  %s538_s5 = scalar_lea.hbm %s862_s3, 128 }
  0x80   : > { %p535_p5 = scmp.ne.s32.totalorder %s817_s22, %s534_s30  ;;  %p539_p4 = scmp.lt.u32.totalorder %s817_s22, %s862_s3 }
  0x81   : > { %p540_p10 = scmp.lt.u32.totalorder %s538_s5, %s534_s30  ;;  %p542_p9 = scmp.lt.u32.totalorder %s534_s30, %s817_s22 }
  0x82   : > { %p536_p11 = pnand %p535_p5, %p879_p12 }
  0x83   : > { %p541_p7 = por %p540_p10, %p539_p4 }
  0x84   : > { %p537_p8 = pneg %p536_p11 }
  0x85   : > { %p543_p0 = por %p542_p9, %p541_p7 }
  0x87   : > { %p544_p6 = pnand %p543_p0, %p537_p8 }
  0x89   : > { %547 = shalt.err (!%p544_p6)
}
  0x8a   : > { %378 = dma.vmem_to_hbm [thread:$0]  (%p879_p12), %s812_s10, 64, %s817_s22, %s245_s27  }
  0x8b PF: > { %s270_s11 = sand.u32 1, %s582_s12   ;;  %p880_p2 = scmp.ne.s32.totalorder %s871_s25, 0 }
  0x8c   : > { %p881_p13 = scmp.ge.s32.totalorder %s594_s15, 2  ;;  %s271_s26 = scalar_lea.sflag [#allocation4], %s270_s11 }
  0x8e   : > { %p392_p3 = pnand %p881_p13, %p880_p2 }
  0x90   : > { %577 = dma.done.wait (!%p392_p3), %s271_s26, 64  }
  0x91   : > { %579 = vsyncadd (!%p392_p3), %s271_s26, 4294967232  ;;  %p17_p1 = scmp.ge.s32.totalorder %s641_s16, 4   ;;  %s882_s12 = smov %s586_s13 }
  0x92   : > { %s883_s13 = smov %s590_s14  ;;  %s884_s14 = smov %s652_s19 }
  0x93   : > { %s885_s15 = smov %s641_s16  ;;  %19 = sbr.rel (!%p17_p1) target bundleno = 6 (0x6), region = 92 }
  0x9a   :  { %276 = vsyncpa [#allocation3], 1 }
  0x9b   :  { %278 = vsyncpa [#allocation3 + $0x1], 1 }
  0x9c   :  { %279 = vsyncpa [#allocation6], 1 }
  0x9d   :  { %280 = vsyncpa [#allocation4], 1 }
  0x9e   :  { %282 = vsyncpa [#allocation4 + $0x1], 1 }

// kernel: lora_decoder_forward.15
= control target key start
LH: loop header
LB: loop body
LE: loop exit
PB: predicated region body
PF: predicated region fallthrough
CT: control target
= control target key end

     0   :  { %10 = vsyncpa [#allocation5], 0  ;;  %s580_s0 = inlined_call_operand.hbm [shape: bf16[16,32], index: 0, kind: input, shape index: {}]   ;;  %s581_s1 = inlined_call_operand.hbm [shape: bf16[32,96], index: 1, kind: input, shape index: {}]   ;;  %s582_s2 = inlined_call_operand.hbm [shape: f32[1,96], index: 2, kind: input, shape index: {}]   ;;  %s583_s3 = inlined_call_operand.hbm [shape: f32[1,32], index: 3, kind: input, shape index: {}]   ;;  %s584_s4 = inlined_call_operand.hbm [shape: f32[1,32], index: 4, kind: input, shape index: {}]   ;;  %s585_s5 = inlined_call_operand.hbm [shape: bf16[16,96], index: 5, kind: output, shape index: {}]  }
   0x1   :  { %11 = vsyncpa [#allocation8], 0 }
   0x2   :  { %12 = vsyncpa [#allocation11], 0 }
   0x3   :  { %13 = vsyncpa [#allocation6], 0  ;;  %s441_s18 = smov [#allocation7]   ;;  %s442_s20 = smov [#allocation10]  }
   0x4   :  { %s31_s19 = sshll.u32 %s441_s18, 4  ;;  %s54_s21 = sshll.u32 %s442_s20, 4  ;;  %s32_s19 = int_to_ptr.vmem [resolvable:$true] %s31_s19  ;;  %s481_s21 = int_to_ptr.vmem [resolvable:$true] %s54_s21 }
   0x5   :  { %s301_s24 = scalar_lea.hbm %s581_s1, 256 }
   0x6   :  { %p302_p0 = scmp.ne.s32.totalorder %s581_s1, %s301_s24  ;;  %p305_p1 = scmp.lt.u32.totalorder %s301_s24, %s581_s1 }
   0x8   :  { %p307_p2 = pnand %p305_p1, %p302_p0 }
   0xa   :  { %310 = shalt.err (!%p307_p2)
}
   0xb   :  { %s311_s29 = scalar_lea.vmem %s32_s19, 256  ;;  %p316_p4 = scmp.lt.s32.totalorder %s32_s19, %s32_s19 }
   0xc   :  { %p312_p3 = scmp.ne.s32.totalorder %s32_s19, %s311_s29  ;;  %p317_p5 = scmp.lt.s32.totalorder %s311_s29, %s311_s29 }
   0xe   :  { %p318_p6 = por %p317_p5, %p316_p4 }
  0x10   :  { %p319_p7 = pnand %p318_p6, %p312_p3 }
  0x12   :  { %322 = shalt.err (!%p319_p7)
}
  0x13   :  { %s443_s30 = smov 64   ;;  %s444_s6 = smov 4  }
  0x14   :  { %37 = dma.hbm_to_vmem [thread:$0]  %s581_s1, 256, %s32_s19, [#allocation8], %s443_s30, %s443_s30, %s444_s6  }
  0x15   :  { %s323_s11 = scalar_lea.hbm %s583_s3, 16 }
  0x16   :  { %p324_p8 = scmp.ne.s32.totalorder %s583_s3, %s323_s11  ;;  %p327_p9 = scmp.lt.u32.totalorder %s323_s11, %s583_s3 }
  0x18   :  { %p329_p10 = pnand %p327_p9, %p324_p8 }
  0x1a   :  { %332 = shalt.err (!%p329_p10)
}
  0x1b   :  { %s333_s16 = scalar_lea.vmem %s481_s21, 16  ;;  %s337_s1 = scalar_lea.vmem %s481_s21, 32 }
  0x1c   :  { %p334_p11 = scmp.ne.s32.totalorder %s481_s21, %s333_s16  ;;  %p338_p12 = scmp.lt.s32.totalorder %s481_s21, %s481_s21 }
  0x1d   :  { %p339_p13 = scmp.lt.s32.totalorder %s337_s1, %s333_s16 }
  0x1f   :  { %p340_p0 = por %p339_p13, %p338_p12 }
  0x21   :  { %p341_p1 = pnand %p340_p0, %p334_p11 }
  0x23   :  { %344 = shalt.err (!%p341_p1)
}
  0x24   :  { %57 = dma.hbm_to_vmem [thread:$0]  %s583_s3, 16, %s481_s21, [#allocation11]  }
  0x25   :  { %s445_s19 = smov [#allocation4]   ;;  %s446_s22 = smov [#allocation9]  }
  0x26   :  { %s19_s20 = sshll.u32 %s445_s19, 4  ;;  %s44_s23 = sshll.u32 %s446_s22, 4  ;;  %s20_s20 = int_to_ptr.vmem [resolvable:$true] %s19_s20  ;;  %s45_s23 = int_to_ptr.vmem [resolvable:$true] %s44_s23 }
  0x27   :  { %s345_s26 = scalar_lea.hbm %s580_s0, 128 }
  0x28   :  { %p346_p2 = scmp.ne.s32.totalorder %s580_s0, %s345_s26  ;;  %p349_p3 = scmp.lt.u32.totalorder %s345_s26, %s580_s0 }
  0x2a   :  { %p351_p4 = pnand %p349_p3, %p346_p2 }
  0x2c   :  { %354 = shalt.err (!%p351_p4)
}
  0x2d   :  { %s355_s3 = scalar_lea.vmem %s20_s20, 128  ;;  %p360_p6 = scmp.lt.s32.totalorder %s20_s20, %s20_s20 }
  0x2e   :  { %p356_p5 = scmp.ne.s32.totalorder %s20_s20, %s355_s3  ;;  %p361_p7 = scmp.lt.s32.totalorder %s355_s3, %s355_s3 }
  0x30   :  { %p362_p8 = por %p361_p7, %p360_p6 }
  0x32   :  { %p363_p9 = pnand %p362_p8, %p356_p5 }
  0x34   :  { %366 = shalt.err (!%p363_p9)
}
  0x35   :  { %25 = dma.hbm_to_vmem [thread:$0]  %s580_s0, 128, %s20_s20, [#allocation5], %s443_s30, %s443_s30, %s444_s6  }
  0x36   :  { %s367_s11 = scalar_lea.hbm %s582_s2, 16 }
  0x37   :  { %p368_p10 = scmp.ne.s32.totalorder %s582_s2, %s367_s11  ;;  %p371_p11 = scmp.lt.u32.totalorder %s367_s11, %s582_s2 }
  0x39   :  { %p373_p12 = pnand %p371_p11, %p368_p10 }
  0x3b   :  { %376 = shalt.err (!%p373_p12)
}
  0x3c   :  { %s377_s16 = scalar_lea.vmem %s45_s23, 16  ;;  %s381_s1 = scalar_lea.vmem %s45_s23, 32 }
  0x3d   :  { %p378_p13 = scmp.ne.s32.totalorder %s45_s23, %s377_s16  ;;  %p382_p0 = scmp.lt.s32.totalorder %s45_s23, %s45_s23 }
  0x3e   :  { %p383_p1 = scmp.lt.s32.totalorder %s381_s1, %s377_s16 }
  0x40   :  { %p384_p2 = por %p383_p1, %p382_p0 }
  0x42   :  { %p385_p3 = pnand %p384_p2, %p378_p13 }
  0x44   :  { %388 = shalt.err (!%p385_p3)
}
  0x45   :  { %47 = dma.hbm_to_vmem [thread:$0]  %s582_s2, 16, %s45_s23, [#allocation8]  }
  0x46   :  { %s447_s18 = smov [#allocation12]   ;;  %s389_s24 = scalar_lea.hbm %s584_s4, 16 }
  0x47   :  { %s64_s19 = sshll.u32 %s447_s18, 4  ;;  %p390_p4 = scmp.ne.s32.totalorder %s584_s4, %s389_s24  ;;  %s65_s19 = int_to_ptr.vmem [resolvable:$true] %s64_s19 }
  0x48   :  { %p393_p5 = scmp.lt.u32.totalorder %s389_s24, %s584_s4 }
  0x4a   :  { %p395_p6 = pnand %p393_p5, %p390_p4 }
  0x4c   :  { %398 = shalt.err (!%p395_p6)
}
  0x4d   :  { %s399_s29 = scalar_lea.vmem %s65_s19, 16  ;;  %s403_s2 = scalar_lea.vmem %s65_s19, 32 }
  0x4e   :  { %p400_p7 = scmp.ne.s32.totalorder %s65_s19, %s399_s29  ;;  %p404_p8 = scmp.lt.s32.totalorder %s65_s19, %s65_s19 }
  0x4f   :  { %p405_p9 = scmp.lt.s32.totalorder %s403_s2, %s399_s29 }
  0x51   :  { %p406_p10 = por %p405_p9, %p404_p8 }
  0x53   :  { %p407_p11 = pnand %p406_p10, %p400_p7 }
  0x55   :  { %410 = shalt.err (!%p407_p11)
}
  0x56   :  { %67 = dma.hbm_to_vmem [thread:$0]  %s584_s4, 16, %s65_s19, [#allocation11]  }
  0x57   :  { %433 = dma.done.wait [#allocation5], 128  }
  0x58   :  { %434 = vsyncadd [#allocation5], 4294967168 }
  0x59   :  { %435 = dma.done.wait [#allocation8], 272  }
  0x5a   :  { %436 = vsyncadd [#allocation8], 4294967024 }
  0x5b   :  { %437 = dma.done.wait [#allocation11], 32  }
  0x5c   :  { %438 = vsyncadd [#allocation11], 4294967264  ;;  %v271_v0 = vld [vmem:[#allocation4] sm:$0xff]   ;;  %vm99_vm0 = vcmask 261120   ;;  %v295_v15 = vld [vmem:[#allocation7] sm:$0xff]   ;;  %vm88_vm1 = vcmask 785408  }
  0x5d   :  { %v272_v1 = vunpack.c.l.bf16 %v271_v0  ;;  %v273_v2 = vunpack.c.h.bf16 %v271_v0  ;;  %v448_v16 = vmov 0.0   ;;  %v296_v17 = vld [vmem:[#allocation7 + $0x8] sm:$0xff]   ;;  %vm449_vm2 = vmmov 0   ;;  %v260_v26 = vld [vmem:[#allocation10] ss:$0 sm:$0xff]  ;;  %s450_s4 = smov [#allocation13]  }
  0x5e   :  { %277 = vmatprep.subr.bf16.mxu0 %v448_v16  ;;  %89 = vst.msk [vmem:[#allocation2] sm:$0xff] %vm88_vm1, %v448_v16  ;;  %90 = vst.msk [vmem:[#allocation2 + $0x8] sm:$0xff] %vm88_vm1, %v448_v16  ;;  %281 = vmatprep.mubr.msk.bf16.mxu0 %vm449_vm2, %v448_v16  ;;  %v261_v30 = vld [vmem:[#allocation12] ss:$0 sm:$0xff]  ;;  %v265_v44 = vld [vmem:[#allocation9] ss:$0 sm:$0xff] }
  0x5f   :  { %v100_v3 = vsel %vm99_vm0, %v272_v1, 0.0  ;;  %v103_v4 = vsel %vm99_vm0, %v273_v2, 0.0  ;;  %278 = vmatpush3.bf16.msra.mxu0 %v295_v15  ;;  %vm238_vm3 = vcmask 781312   ;;  %s246_s3 = sshll.u32 %s450_s4, 4  ;;  %s247_s3 = int_to_ptr.vmem [resolvable:$true] %s246_s3 }
  0x60   :  { %101 = vadd.xlane.f32.xlu0 %v100_v3  ;;  %279 = vmatprep.subr.bf16.mxu0 %v448_v16  ;;  %s411_s21 = scalar_lea.vmem %s247_s3, 128  ;;  %p416_p13 = scmp.lt.s32.totalorder %s247_s3, %s247_s3 }
  0x61   :  { %p412_p12 = scmp.ne.s32.totalorder %s247_s3, %s411_s21  ;;  %p417_p0 = scmp.lt.s32.totalorder %s411_s21, %s411_s21 }
  0x63   :  { %280 = vmatpush3.bf16.msra.mxu0 %v296_v17  ;;  %p418_p1 = por %p417_p0, %p416_p13 }
  0x64   :  { %104 = vadd.xlane.f32.xlu0 %v103_v4 }
  0x65   :  { %v148_v36 = vld [vmem:[#allocation2] sm:$0xff]  ;;  %v149_v38 = vld [vmem:[#allocation2 + $0x8] sm:$0xff]  ;;  %p419_p2 = pnand %p418_p1, %p412_p12 }
  0xed   :  { %v102_v5 = vpop.xlane.xlu0 %101 }
  0xee   :  { %v107_v6 = vmul.f32 0.03125, %v102_v5 }
  0xf0   :  { %v109_v7 = vsub.f32 %v272_v1, %v107_v6 }
  0xf1   :  { %v105_v8 = vpop.xlane.xlu0 %104 }
  0xf2   :  { %v108_v9 = vmul.f32 0.03125, %v105_v8  ;;  %v111_v10 = vmul.f32 %v109_v7, %v109_v7 }
  0xf4   :  { %v110_v11 = vsub.f32 %v273_v2, %v108_v9  ;;  %v113_v12 = vsel %vm99_vm0, %v111_v10, 0.0 }
  0xf5   :  { %114 = vadd.xlane.f32.xlu1 %v113_v12 }
  0xf6   :  { %v112_v13 = vmul.f32 %v110_v11, %v110_v11 }
  0xf8   :  { %v116_v14 = vsel %vm99_vm0, %v112_v13, 0.0 }
  0xf9   :  { %117 = vadd.xlane.f32.xlu1 %v116_v14 }
 0x182   :  { %v115_v18 = vpop.xlane.xlu1 %114 }
 0x183   :  { %v119_v19 = vmul.f32 0.03125, %v115_v18 }
 0x185   :  { %v121_v20 = vadd.f32 1e-05, %v119_v19 }
 0x186   :  { %v118_v21 = vpop.xlane.xlu1 %117 }
 0x187   :  { %297 = vrsqrt.f32 %v121_v20  ;;  %v120_v22 = vmul.f32 0.03125, %v118_v21 }
 0x189   :  { %v122_v23 = vadd.f32 1e-05, %v120_v22 }
 0x18b   :  { %299 = vrsqrt.f32 %v122_v23 }
 0x191   :  { %v298_v24 = vpop.eup %297 }
 0x192   :  { %v125_v25 = vmul.f32 %v298_v24, %v109_v7 }
 0x194   :  { %v134_v28 = vmul.f32 %v260_v26, %v125_v25 }
 0x195   :  { %v300_v27 = vpop.eup %299 }
 0x196   :  { %v126_v29 = vmul.f32 %v300_v27, %v110_v11  ;;  %v143_v32 = vadd.f32 %v261_v30, %v134_v28 }
 0x198   :  { %v135_v31 = vmul.f32 %v260_v26, %v126_v29 }
 0x19a   :  { %v144_v33 = vadd.f32 %v261_v30, %v135_v31 }
 0x19c   :  { %v145_v34 = vpack.c.bf16 %v144_v33, %v143_v32 }
 0x19e   :  { %146 = vst.msk [vmem:[#allocation3] sm:$0xff] %vm99_vm0, %v145_v34 }
 0x1a5   :  { %v147_v35 = vld [vmem:[#allocation3] sm:$0xff] }
 0x1a6   :  { %282 = vmatmul.mubr.msk.bf16.vlgmr.msra.gmra.mrb[0].mxu0 %vm99_vm0, %v147_v35 }
 0x279   :  { %v204_v37 = vpop.f32.mrb[0].mxu0 }
 0x27a   :  { %v211_v39 = vadd.f32 %v204_v37, %v148_v36  ;;  %v283_v40 = vpop.f32.mrb[1].mxu0 }
 0x27b   :  { %v207_v41 = vpop.f32.mrb[2].mxu0 }
 0x27c   :  { %214 = vst.msk [vmem:[#allocation2] sm:$0xff] %vm88_vm1, %v211_v39  ;;  %v212_v42 = vadd.f32 %v207_v41, %v149_v38  ;;  %v284_v43 = vpop.f32.mrb[3].mxu0 }
 0x27e   :  { %215 = vst.msk [vmem:[#allocation2 + $0x8] sm:$0xff] %vm88_vm1, %v212_v42 }
 0x283   :  { %v219_v45 = vld [vmem:[#allocation2] sm:$0xff] }
 0x284   :  { %v228_v46 = vadd.f32 %v265_v44, %v219_v45 }
 0x285   :  { %v220_v47 = vld [vmem:[#allocation2 + $0x8] sm:$0xff] }
 0x286   :  { %v229_v48 = vadd.f32 %v265_v44, %v220_v47  ;;  %v268_v49 = vpack.c.bf16 %v228_v46, %v228_v46 }
 0x288   :  { %v269_v50 = vpack.c.bf16 %v229_v48, %v229_v48  ;;  %239 = vst.msk [vmem:[#allocation13] sm:$0xf] %vm238_vm3, %v268_v49 }
 0x28a   :  { %240 = vst.msk [vmem:[#allocation13 + $0x4] sm:$0xf] %vm238_vm3, %v269_v50 }
 0x28b   :  { %422 = shalt.err (!%p419_p2)
}
 0x28c   :  { %s423_s10 = scalar_lea.hbm %s585_s5, 128 }
 0x28d   :  { %p424_p3 = scmp.ne.s32.totalorder %s585_s5, %s423_s10  ;;  %p427_p4 = scmp.lt.u32.totalorder %s423_s10, %s585_s5 }
 0x28f   :  { %p429_p5 = pnand %p427_p4, %p424_p3 }
 0x291   :  { %432 = shalt.err (!%p429_p5)
}
 0x292   :  { %252 = dma.vmem_to_hbm [thread:$0]  %s247_s3, 128, %s585_s5, [#allocation6], %s443_s30, %s443_s30, %s444_s6  }
 0x293   :  { %439 = dma.done.wait [#allocation6], 128  }
 0x294   :  { %440 = vsyncadd [#allocation6], 4294967168 }
 0x295   :  { %256 = vsyncpa [#allocation5], 1 }
 0x296   :  { %257 = vsyncpa [#allocation8], 1 }
 0x297   :  { %258 = vsyncpa [#allocation11], 1 }
 0x298   :  { %259 = vsyncpa [#allocation6], 1 }

// kernel: lora_decoder_forward.13
= control target key start
LH: loop header
LB: loop body
LE: loop exit
PB: predicated region body
PF: predicated region fallthrough
CT: control target
= control target key end

     0   :  { %8 = vsyncpa [#allocation4], 0  ;;  %s997_s0 = inlined_call_operand.hbm [shape: bf16[2,768], index: 0, kind: input, shape index: {}]   ;;  %s998_s1 = inlined_call_operand.hbm [shape: bf16[768,32], index: 1, kind: input, shape index: {}]   ;;  %s999_s2 = inlined_call_operand.hbm [shape: f32[1,32], index: 2, kind: input, shape index: {}]   ;;  %s1000_s3 = inlined_call_operand.hbm [shape: bf16[2,32], index: 3, kind: output, shape index: {}]  }
   0x1   :  { %9 = vsyncpa [#allocation7], 0 }
   0x2   :  { %10 = vsyncpa [#allocation5], 0  ;;  %s919_s12 = smov [#allocation6]   ;;  %s825_s16 = scalar_lea.hbm %s998_s1, 6144 }
   0x3   :  { %s26_s13 = sshll.u32 %s919_s12, 4  ;;  %p826_p0 = scmp.ne.s32.totalorder %s998_s1, %s825_s16  ;;  %s27_s13 = int_to_ptr.vmem [resolvable:$true] %s26_s13 }
   0x4   :  { %p829_p1 = scmp.lt.u32.totalorder %s825_s16, %s998_s1 }
   0x6   :  { %p831_p2 = pnand %p829_p1, %p826_p0 }
   0x8   :  { %834 = shalt.err (!%p831_p2)
}
   0x9   :  { %s835_s21 = scalar_lea.vmem %s27_s13, 6144  ;;  %p840_p4 = scmp.lt.s32.totalorder %s27_s13, %s27_s13 }
   0xa   :  { %p836_p3 = scmp.ne.s32.totalorder %s27_s13, %s835_s21  ;;  %p841_p5 = scmp.lt.s32.totalorder %s835_s21, %s835_s21 }
   0xc   :  { %p842_p6 = por %p841_p5, %p840_p4 }
   0xe   :  { %p843_p7 = pnand %p842_p6, %p836_p3 }
  0x10   :  { %846 = shalt.err (!%p843_p7)
}
  0x11   :  { %s920_s22 = smov 64   ;;  %s921_s23 = smov 4  }
  0x12   :  { %32 = dma.hbm_to_vmem [thread:$0]  %s998_s1, 6144, %s27_s13, [#allocation7], %s920_s22, %s920_s22, %s921_s23  }
  0x13   :  { %s922_s26 = smov [#allocation3]   ;;  %s923_s28 = smov [#allocation8]  }
  0x14   :  { %s17_s27 = sshll.u32 %s922_s26, 4  ;;  %s39_s29 = sshll.u32 %s923_s28, 4  ;;  %s18_s27 = int_to_ptr.vmem [resolvable:$true] %s17_s27  ;;  %s40_s29 = int_to_ptr.vmem [resolvable:$true] %s39_s29 }
  0x15   :  { %s847_s5 = scalar_lea.hbm %s997_s0, 96 }
  0x16   :  { %p848_p8 = scmp.ne.s32.totalorder %s997_s0, %s847_s5  ;;  %p851_p9 = scmp.lt.u32.totalorder %s847_s5, %s997_s0 }
  0x18   :  { %p853_p10 = pnand %p851_p9, %p848_p8 }
  0x1a   :  { %856 = shalt.err (!%p853_p10)
}
  0x1b   :  { %s857_s1 = scalar_lea.vmem %s18_s27, 96  ;;  %p862_p12 = scmp.lt.s32.totalorder %s18_s27, %s18_s27 }
  0x1c   :  { %p858_p11 = scmp.ne.s32.totalorder %s18_s27, %s857_s1  ;;  %p863_p13 = scmp.lt.s32.totalorder %s857_s1, %s857_s1 }
  0x1e   :  { %p864_p0 = por %p863_p13, %p862_p12 }
  0x20   :  { %p865_p1 = pnand %p864_p0, %p858_p11 }
  0x22   :  { %868 = shalt.err (!%p865_p1)
}
  0x23   :  { %20 = dma.hbm_to_vmem [thread:$0]  %s997_s0, 96, %s18_s27, [#allocation4]  }
  0x24   :  { %s869_s14 = scalar_lea.hbm %s999_s2, 16 }
  0x25   :  { %p870_p2 = scmp.ne.s32.totalorder %s999_s2, %s869_s14  ;;  %p873_p3 = scmp.lt.u32.totalorder %s869_s14, %s999_s2 }
  0x27   :  { %p875_p4 = pnand %p873_p3, %p870_p2 }
  0x29   :  { %878 = shalt.err (!%p875_p4)
}
  0x2a   :  { %s879_s19 = scalar_lea.vmem %s40_s29, 16  ;;  %s883_s20 = scalar_lea.vmem %s40_s29, 32 }
  0x2b   :  { %p880_p5 = scmp.ne.s32.totalorder %s40_s29, %s879_s19  ;;  %p884_p6 = scmp.lt.s32.totalorder %s40_s29, %s40_s29 }
  0x2c   :  { %p885_p7 = scmp.lt.s32.totalorder %s883_s20, %s879_s19 }
  0x2e   :  { %p886_p8 = por %p885_p7, %p884_p6 }
  0x30   :  { %p887_p9 = pnand %p886_p8, %p880_p5 }
  0x32   :  { %890 = shalt.err (!%p887_p9)
}
  0x33   :  { %42 = dma.hbm_to_vmem [thread:$0]  %s999_s2, 16, %s40_s29, [#allocation7]  }
  0x34   :  { %913 = dma.done.wait [#allocation4], 96  }
  0x35   :  { %914 = vsyncadd [#allocation4], 4294967200 }
  0x36   :  { %915 = dma.done.wait [#allocation7], 6160  }
  0x37   :  { %916 = vsyncadd [#allocation7], 4294961136  ;;  %v776_v0 = vld [vmem:[#allocation6 + $0x40] sm:$0xff]   ;;  %v780_v4 = vld [vmem:[#allocation6 + $0x48] sm:$0xff]   ;;  %v924_v22 = vmov 1966171168   ;;  %v162_v24 = vlaneseq }
  0x38   :  { %v777_v1 = vld [vmem:[#allocation6 + $0xc0] sm:$0xff]   ;;  %702 = vmatprep.subr.bf16.mxu0 %v776_v0  ;;  %v781_v5 = vld [vmem:[#allocation6 + $0xc8] sm:$0xff]   ;;  %v784_v8 = vld [vmem:[#allocation6 + $0x50] sm:$0xff]   ;;  %v160_v23 = vunpack.c.l.s4 %v924_v22  ;;  %vm57_vm0 = vcmask 254976   ;;  %s926_s2 = smov [#allocation9]   ;;  %vm635_vm1 = vcmask 253952  }
  0x39   :  { %v778_v2 = vld [vmem:[#allocation6] sm:$0xff]   ;;  %724 = vmatprep.subr.bf16.mxu1 %v777_v1  ;;  %v782_v6 = vld [vmem:[#allocation6 + $0x8] sm:$0xff]   ;;  %v785_v9 = vld [vmem:[#allocation6 + $0xd0] sm:$0xff]   ;;  %v163_v30 = vshrl.u32 %v162_v24, 7  ;;  %s643_s22 = sshll.u32 %s926_s2, 4  ;;  %s644_s22 = int_to_ptr.vmem [resolvable:$true] %s643_s22 }
  0x3a   :  { %v779_v3 = vld [vmem:[#allocation6 + $0x80] sm:$0xff]   ;;  %703 = vmatpush3.bf16.msra.mxu0 %v778_v2  ;;  %v783_v7 = vld [vmem:[#allocation6 + $0x88] sm:$0xff]   ;;  %v786_v10 = vld [vmem:[#allocation6 + $0x10] sm:$0xff]   ;;  %v161_v29 = vunpack.c.0.s8 %v160_v23  ;;  %v925_v2 = vmov 0.0   ;;  %s891_s23 = scalar_lea.vmem %s644_s22, 16  ;;  %s895_s24 = scalar_lea.vmem %s644_s22, 32 }
  0x3b   :  { %725 = vmatpush3.bf16.msra.mxu1 %v779_v3  ;;  %704 = vmatprep.subr.bf16.mxu0 %v780_v4  ;;  %v787_v11 = vld [vmem:[#allocation6 + $0x90] sm:$0xff]   ;;  %v788_v12 = vld [vmem:[#allocation6 + $0x58] sm:$0xff]   ;;  %v792_v16 = vld [vmem:[#allocation6 + $0x60] sm:$0xff]   ;;  %58 = vst.msk [vmem:[#allocation2] sm:$0x3] %vm57_vm0, %v925_v2  ;;  %p892_p10 = scmp.ne.s32.totalorder %s644_s22, %s891_s23  ;;  %p896_p11 = scmp.lt.s32.totalorder %s644_s22, %s644_s22 }
  0x3c   :  { %726 = vmatprep.subr.bf16.mxu1 %v781_v5  ;;  %v789_v13 = vld [vmem:[#allocation6 + $0xd8] sm:$0xff]   ;;  %v793_v17 = vld [vmem:[#allocation6 + $0xe0] sm:$0xff]   ;;  %v796_v20 = vld [vmem:[#allocation6 + $0x68] sm:$0xff]   ;;  %v164_v35 = vsub.s32 %v161_v29, %v163_v30  ;;  %p897_p12 = scmp.lt.s32.totalorder %s895_s24, %s891_s23 }
  0x3d   :  { %v790_v14 = vld [vmem:[#allocation6 + $0x18] sm:$0xff]   ;;  %v794_v18 = vld [vmem:[#allocation6 + $0x20] sm:$0xff]   ;;  %v797_v21 = vld [vmem:[#allocation6 + $0xe8] sm:$0xff]  }
  0x3e   :  { %705 = vmatpush3.bf16.msra.mxu0 %v782_v6  ;;  %v791_v15 = vld [vmem:[#allocation6 + $0x98] sm:$0xff]   ;;  %v795_v19 = vld [vmem:[#allocation6 + $0xa0] sm:$0xff]   ;;  %v798_v25 = vld [vmem:[#allocation6 + $0x28] sm:$0xff]   ;;  %p898_p13 = por %p897_p12, %p896_p11 }
  0x3f   :  { %727 = vmatpush3.bf16.msra.mxu1 %v783_v7  ;;  %706 = vmatprep.subr.bf16.mxu0 %v784_v8  ;;  %v799_v26 = vld [vmem:[#allocation6 + $0xa8] sm:$0xff]   ;;  %v800_v27 = vld [vmem:[#allocation6 + $0x70] sm:$0xff]   ;;  %v804_v33 = vld [vmem:[#allocation6 + $0x78] sm:$0xff]  }
  0x40   :  { %728 = vmatprep.subr.bf16.mxu1 %v785_v9  ;;  %v801_v28 = vld [vmem:[#allocation6 + $0xf0] sm:$0xff]   ;;  %v805_v34 = vld [vmem:[#allocation6 + $0xf8] sm:$0xff]   ;;  %v809_v41 = vld [vmem:[#allocation6 + $0x140] sm:$0xff]   ;;  %p899_p0 = pnand %p898_p13, %p892_p10 }
  0x41   :  { %v802_v31 = vld [vmem:[#allocation6 + $0x30] sm:$0xff]   ;;  %v806_v36 = vld [vmem:[#allocation6 + $0x38] sm:$0xff]   ;;  %v810_v46 = vld [vmem:[#allocation6 + $0x100] sm:$0xff]  }
  0x42   :  { %707 = vmatpush3.bf16.msra.mxu0 %v786_v10  ;;  %v803_v32 = vld [vmem:[#allocation6 + $0xb0] sm:$0xff]   ;;  %v807_v37 = vld [vmem:[#allocation6 + $0xb8] sm:$0xff]   ;;  %v811_v49 = vld [vmem:[#allocation6 + $0x148] sm:$0xff]  }
  0x43   :  { %729 = vmatpush3.bf16.msra.mxu1 %v787_v11  ;;  %708 = vmatprep.subr.bf16.mxu0 %v788_v12  ;;  %v59_v38 = vld [vmem:[#allocation3] sm:$0x3f]  ;;  %v812_v52 = vld [vmem:[#allocation6 + $0x108] sm:$0xff]   ;;  %v813_v53 = vld [vmem:[#allocation6 + $0x150] sm:$0xff]  }
  0x44   :  { %730 = vmatprep.subr.bf16.mxu1 %v789_v13  ;;  %v158_v39 = vcombine.high %v59_v38, %v59_v38  ;;  %v165_v40 = vrot.slane %v59_v38, %v164_v35  ;;  %v814_v54 = vld [vmem:[#allocation6 + $0x110] sm:$0xff]   ;;  %v815_v55 = vld [vmem:[#allocation6 + $0x158] sm:$0xff]   ;;  %v817_v57 = vld [vmem:[#allocation6 + $0x160] sm:$0xff]  }
  0x45   :  { %v816_v56 = vld [vmem:[#allocation6 + $0x118] sm:$0xff]   ;;  %v818_v58 = vld [vmem:[#allocation6 + $0x120] sm:$0xff]   ;;  %v819_v59 = vld [vmem:[#allocation6 + $0x168] sm:$0xff]  }
  0x46   :  { %709 = vmatpush3.bf16.msra.mxu0 %v790_v14  ;;  %v173_v42 = vcombine.high %v165_v40, %v165_v40  ;;  %v181_v43 = vrot.slane %v165_v40, %v164_v35  ;;  %v172_v44 = vrot.slane %v158_v39, %v164_v35  ;;  %v820_v60 = vld [vmem:[#allocation6 + $0x128] sm:$0xff]   ;;  %v821_v61 = vld [vmem:[#allocation6 + $0x170] sm:$0xff]   ;;  %v823_v63 = vld [vmem:[#allocation6 + $0x178] sm:$0xff]  }
  0x47   :  { %731 = vmatpush3.bf16.msra.mxu1 %v791_v15  ;;  %710 = vmatprep.subr.bf16.mxu0 %v792_v16  ;;  %v822_v62 = vld [vmem:[#allocation6 + $0x130] sm:$0xff]   ;;  %v824_v0 = vld [vmem:[#allocation6 + $0x138] sm:$0xff]   ;;  %v701_v22 = vld [vmem:[#allocation8] ss:$0 sm:$0xff] }
  0x48   :  { %732 = vmatprep.subr.bf16.mxu1 %v793_v17  ;;  %v195_v45 = vrot.slane %v173_v42, %v164_v35  ;;  %v174_v47 = vcombine.high %v172_v44, %v172_v44  ;;  %v203_v48 = vcombine.high %v181_v43, %v181_v43  ;;  %v188_v1 = vrot.slane %v172_v44, %v164_v35 }
  0x4a   :  { %711 = vmatpush3.bf16.msra.mxu0 %v794_v18  ;;  %531 = vmatprep.mubr.bf16.mxu0 %v195_v45  ;;  %v204_v50 = vcombine.high %v195_v45, %v195_v45  ;;  %v202_v51 = vrot.slane %v174_v47, %v164_v35  ;;  %v60_v18 = vld [vmem:[#allocation2] sm:$0x3] }
  0x4b   :  { %733 = vmatpush3.bf16.msra.mxu1 %v795_v19  ;;  %712 = vmatprep.subr.bf16.mxu0 %v796_v20 }
  0x4c   :  { %734 = vmatprep.subr.bf16.mxu1 %v797_v21  ;;  %571 = vmatprep.mubr.bf16.mxu1 %v204_v50 }
  0x4e   :  { %713 = vmatpush3.bf16.msra.mxu0 %v798_v25 }
  0x4f   :  { %735 = vmatpush3.bf16.msra.mxu1 %v799_v26  ;;  %714 = vmatprep.subr.bf16.mxu0 %v800_v27 }
  0x50   :  { %736 = vmatprep.subr.bf16.mxu1 %v801_v28 }
  0x52   :  { %715 = vmatpush3.bf16.msra.mxu0 %v802_v31 }
  0x53   :  { %737 = vmatpush3.bf16.msra.mxu1 %v803_v32  ;;  %716 = vmatprep.subr.bf16.mxu0 %v804_v33 }
  0x54   :  { %738 = vmatprep.subr.bf16.mxu1 %v805_v34 }
  0x56   :  { %717 = vmatpush3.bf16.msra.mxu0 %v806_v36 }
  0x57   :  { %739 = vmatpush3.bf16.msra.mxu1 %v807_v37  ;;  %746 = vmatprep.subr.bf16.mxu0 %v809_v41 }
  0x59   :  { %532 = vmatmul.mubr.bf16.vlgmr.msra.gmra.mrb[0].mxu0 %v181_v43 }
  0x5a   :  { %747 = vmatpush3.bf16.msra.mxu0 %v810_v46  ;;  %572 = vmatmul.mubr.bf16.vlgmr.msra.gmra.mrb[0].mxu1 %v203_v48 }
  0x5b   :  { %748 = vmatprep.subr.bf16.mxu0 %v811_v49  ;;  %611 = vmatprep.mubr.bf16.mxu0 %v202_v51 }
  0x5e   :  { %749 = vmatpush3.bf16.msra.mxu0 %v812_v52 }
  0x5f   :  { %750 = vmatprep.subr.bf16.mxu0 %v813_v53 }
  0x62   :  { %751 = vmatpush3.bf16.msra.mxu0 %v814_v54 }
  0x63   :  { %752 = vmatprep.subr.bf16.mxu0 %v815_v55 }
  0x66   :  { %753 = vmatpush3.bf16.msra.mxu0 %v816_v56 }
  0x67   :  { %754 = vmatprep.subr.bf16.mxu0 %v817_v57 }
  0x6a   :  { %755 = vmatpush3.bf16.msra.mxu0 %v818_v58 }
  0x6b   :  { %756 = vmatprep.subr.bf16.mxu0 %v819_v59 }
  0x6e   :  { %757 = vmatpush3.bf16.msra.mxu0 %v820_v60 }
  0x6f   :  { %758 = vmatprep.subr.bf16.mxu0 %v821_v61 }
  0x72   :  { %759 = vmatpush3.bf16.msra.mxu0 %v822_v62 }
  0x73   :  { %760 = vmatprep.subr.bf16.mxu0 %v823_v63 }
  0x76   :  { %761 = vmatpush3.bf16.msra.mxu0 %v824_v0 }
  0x79   :  { %612 = vmatmul.mubr.bf16.vlgmr.msra.gmra.mrb[4].mxu0 %v188_v1 }
 0x12c   :  { %v718_v3 = vpop.f32.mrb[0].mxu0 }
 0x12d   :  { %v719_v4 = vpop.f32.mrb[1].mxu0  ;;  %v740_v5 = vpop.f32.mrb[0].mxu1 }
 0x12e   :  { %v720_v6 = vadd.f32 %v719_v4, %v718_v3  ;;  %v721_v7 = vpop.f32.mrb[2].mxu0  ;;  %v741_v8 = vpop.f32.mrb[1].mxu1 }
 0x12f   :  { %v722_v9 = vpop.f32.mrb[3].mxu0  ;;  %v742_v10 = vadd.f32 %v741_v8, %v740_v5  ;;  %v743_v11 = vpop.f32.mrb[2].mxu1 }
 0x130   :  { %v744_v12 = vpop.f32.mrb[3].mxu1 }
 0x131   :  { %v574_v13 = vadd.f32 %v742_v10, %v720_v6 }
 0x14c   :  { %v762_v14 = vpop.f32.mrb[4].mxu0 }
 0x14d   :  { %v763_v15 = vpop.f32.mrb[5].mxu0 }
 0x14e   :  { %v764_v16 = vadd.f32 %v763_v15, %v762_v14  ;;  %v765_v17 = vpop.f32.mrb[6].mxu0 }
 0x14f   :  { %v766_v19 = vpop.f32.mrb[7].mxu0 }
 0x150   :  { %v614_v20 = vadd.f32 %v764_v16, %v574_v13 }
 0x152   :  { %v619_v21 = vadd.f32 %v614_v20, %v60_v18 }
 0x154   :  { %621 = vst.msk [vmem:[#allocation2] sm:$0x3] %vm57_vm0, %v619_v21 }
 0x15b   :  { %v625_v23 = vld [vmem:[#allocation2] sm:$0x3] }
 0x15c   :  { %v633_v24 = vadd.f32 %v701_v22, %v625_v23 }
 0x15e   :  { %v634_v25 = vpack.c.bf16 %v633_v24, %v633_v24 }
 0x160   :  { %636 = vst.msk [vmem:[#allocation9] sm:$0x1] %vm635_vm1, %v634_v25 }
 0x161   :  { %902 = shalt.err (!%p899_p0)
}
 0x162   :  { %s903_s27 = scalar_lea.hbm %s1000_s3, 16 }
 0x163   :  { %p904_p1 = scmp.ne.s32.totalorder %s1000_s3, %s903_s27  ;;  %p907_p2 = scmp.lt.u32.totalorder %s903_s27, %s1000_s3 }
 0x165   :  { %p909_p3 = pnand %p907_p2, %p904_p1 }
 0x167   :  { %912 = shalt.err (!%p909_p3)
}
 0x168   :  { %646 = dma.vmem_to_hbm [thread:$0]  %s644_s22, 16, %s1000_s3, [#allocation5]  }
 0x169   :  { %917 = dma.done.wait [#allocation5], 16  }
 0x16a   :  { %918 = vsyncadd [#allocation5], 4294967280 }
 0x16b   :  { %650 = vsyncpa [#allocation4], 1 }
 0x16c   :  { %651 = vsyncpa [#allocation7], 1 }
 0x16d   :  { %652 = vsyncpa [#allocation5], 1 }

// kernel: lora_decoder_forward.16
= control target key start
LH: loop header
LB: loop body
LE: loop exit
PB: predicated region body
PF: predicated region fallthrough
CT: control target
= control target key end

     0   :  { %s1646_s0 = inlined_call_operand.hbm [shape: bf16[2,3,8,32], index: 0, kind: input, shape index: {}, may-alias: {0,1,2}]   ;;  %s1647_s1 = inlined_call_operand.hbm [shape: bf16[2,3,8,32], index: 1, kind: input, shape index: {}, may-alias: {0,1,2}]   ;;  %s1648_s2 = inlined_call_operand.hbm [shape: bf16[2,3,8,32], index: 2, kind: input, shape index: {}, may-alias: {0,1,2}]   ;;  %s1649_s3 = inlined_call_operand.hbm [shape: bf16[2,8,32], index: 3, kind: output, shape index: {}]  }
   0x1   :  { %1658 = sst [smem:[#allocation16_spill]] %s1646_s0 }
   0x2   :  { %1659 = sst [smem:[#allocation17_spill]] %s1647_s1 }
   0x3   :  { %8 = vsyncpa [#allocation3], 0 }
   0x4   :  { %10 = vsyncpa [#allocation3 + $0x1], 0 }
   0x5   :  { %11 = vsyncpa [#allocation6], 0 }
   0x6   :  { %13 = vsyncpa [#allocation6 + $0x1], 0 }
   0x7   :  { %14 = vsyncpa [#allocation4], 0 }
   0x8   :  { %16 = vsyncpa [#allocation4 + $0x1], 0  ;;  %s1314_s12 = smov 0   ;;  %s1316_s13 = smov 0  }
   0x9   :  { %s1318_s14 = smov 0   ;;  %s1320_s15 = smov 0  }
   0xa   :  { %s1322_s16 = smov 0   ;;  %s1324_s17 = smov 0  }
   0xb LB: > { %1660 = sst [smem:[#allocation12_spill]] %s1268_s14  ;;  %s1345_s18 = sadd.s32 4294967295, %s1280_s17   ;;  %s1280_s17 = sphi %s1324_s17, %s22_s17   ;;  %s1276_s16 = sphi %s1322_s16, %s1685_s16   ;;  %s1272_s15 = sphi %s1320_s15, %s1684_s15   ;;  %s1268_s14 = sphi %s1318_s14, %s1683_s14   ;;  %s1264_s13 = sphi %s1316_s13, %s1687_s13   ;;  %s1260_s12 = sphi %s1314_s12, %s1686_s12  }
   0xc   : > { %1661 = sst [smem:[#allocation13_spill]] %s1276_s16  ;;  %s909_s19 = sadd.s32 4294967294, %s1280_s17  }
   0xd   : > { %s34_s20 = sadd.s32 1, %s1276_s16  ;;  %s43_s21 = sadd.s32 1, %s1268_s14 }
   0xe   : > { %p36_p0 = scmp.ge.s32.totalorder %s34_s20, 2  ;;  %p50_p1 = scmp.ne.s32.totalorder %s1268_s14, %s1264_s13 }
   0xf   : > { %p51_p2 = scmp.eq.s32.totalorder %s1280_s17, 0  ;;  %p56_p3 = scmp.ne.s32.totalorder %s1264_s13, %s1260_s12 }
  0x10   : > { %s1689_s20 = smov (%p36_p0, %s34_s20), 0  ;;  %p57_p5 = scmp.eq.s32.totalorder %s1345_s18, 0 }
  0x11   : > { %1662 = sst [smem:[#allocation14_spill]] %s1689_s20  ;;  %p1357_p4 = por %p51_p2, %p50_p1 }
  0x12   : > { %s38_s23 = ssub.s32 %s1276_s16, %s1689_s20  ;;  %p138_p6 = scmp.eq.s32.totalorder %s1345_s18, 1 }
  0x13   : > { %p41_p7 = scmp.eq.s32.totalorder %s38_s23, 0  ;;  %p1365_p8 = por %p57_p5, %p56_p3 }
  0x14   : > { %p1369_p9 = por %p138_p6, %p50_p1  ;;  %p144_p10 = scmp.eq.s32.totalorder %s909_s19, 1 }
  0x15   : > { %s1664_s24 = scalar_select %p1365_p8, 1, 0 }
  0x16   : > { %s1665_s25 = scalar_select %p1369_p9, 1, 0 }
  0x17   : > { %s1374_s26 = scalar_select %p41_p7, %s1268_s14, %s43_s21  }
  0x18   : > { %p1376_p11 = por %p144_p10, %p56_p3  ;;  %p1025_p13 = scmp.lt.s32.totalorder %s1280_s17, 2 }
  0x19   : > { %1666 = sst [smem:[#allocation15_spill]] %s1374_s26  ;;  %s1650_s28 = sand.u32 1, %s1268_s14  }
  0x1a   : > { %s1667_s27 = scalar_select %p1376_p11, 1, 0 }
  0x1b   : > { %s1385_s29 = sshll.u32 %s1650_s28, 2  ;;  %s1388_s30 = smul.u32 192, %s1276_s16 }
  0x1c   : > { %p1392_p0 = pnand %p1025_p13, %p1357_p4  ;;  %s184_s5 = sand.u32 1, %s1280_s17  }
  0x1d   : > { %s1669_s1 = sld [smem:[#allocation17_spill]]  ;;  %s188_s10 = scalar_lea.vmem [#allocation5], %s1385_s29 }
  0x1e   : > { %s1668_s4 = scalar_select %p1392_p0, 1, 0 }
  0x1f   : > { %s198_s11 = sshll.u32 %s188_s10, 4  ;;  %s1407_s19 = scalar_lea.sflag [#allocation6], %s184_s5  ;;  %s1404_s11 = int_to_ptr.vmem [resolvable:$true] %s198_s11 }
  0x20   : > { %p1412_p3 = pneg %p1392_p0 }
  0x23   : > { %s818_s8 = scalar_lea.hbm %s1669_s1, %s1388_s30  ;;  %s1107_s7 = scalar_lea.hbm %s1669_s1, 384 }
  0x24   : > { %s1401_s9 = scalar_lea.hbm %s818_s8, 64  ;;  %s1132_s21 = scalar_lea.hbm %s818_s8, 128 }
  0x25   : > { %p1103_p2 = scmp.ne.s32.totalorder %s1401_s9, %s1132_s21  ;;  %p1108_p6 = scmp.lt.u32.totalorder %s1401_s9, %s1669_s1 }
  0x26   : > { %p1109_p7 = scmp.lt.u32.totalorder %s1107_s7, %s1132_s21  ;;  %p1111_p13 = scmp.lt.u32.totalorder %s1132_s21, %s1401_s9 }
  0x27   : > { %p1105_p4 = pnand %p1412_p3, %p1103_p2 }
  0x28   : > { %p1110_p10 = por %p1109_p7, %p1108_p6 }
  0x29   : > { %p1106_p5 = pneg %p1105_p4 }
  0x2a   : > { %p1112_p12 = por %p1111_p13, %p1110_p10 }
  0x2c   : > { %p1113_p1 = pnand %p1112_p12, %p1106_p5 }
  0x2e   : > { %1116 = shalt.err (!%p1113_p1)
}
  0x2f   : > { %s1117_s5 = scalar_lea.vmem %s1404_s11, 64  ;;  %s1282_s8 = smov [#allocation5]  }
  0x30   : > { %p1118_p2 = scmp.ne.s32.totalorder %s1404_s11, %s1117_s5  ;;  %s1122_s23 = sshll.u32 %s1282_s8, 4  ;;  %s1123_s23 = int_to_ptr.vmem [resolvable:$false] %s1122_s23 }
  0x31   : > { %s1124_s28 = scalar_lea.vmem %s1123_s23, 128  ;;  %p1125_p9 = scmp.lt.s32.totalorder %s1404_s11, %s1123_s23 }
  0x32   : > { %p1120_p4 = pnand %p1118_p2, %p1412_p3  ;;  %p1126_p8 = scmp.lt.s32.totalorder %s1124_s28, %s1117_s5 }
  0x34   : > { %p1121_p11 = pneg %p1120_p4  ;;  %p1127_p6 = por %p1126_p8, %p1125_p9 }
  0x36   : > { %p1128_p7 = pnand %p1127_p6, %p1121_p11 }
  0x38   : > { %1131 = shalt.err (!%p1128_p7)
}
  0x39   : > { %1017 = dma.hbm_to_vmem [thread:$0]  (!%p1392_p0), %s1401_s9, 64, %s1404_s11, %s1407_s19  }
  0x3a   : > { %p224_p12 = scmp.lt.s32.totalorder %s1280_s17, 3  ;;  %p1671_p1 = scmp.ge.s32.totalorder %s1280_s17, 1 }
  0x3b   : > { %s1673_s0 = sld [smem:[#allocation16_spill]]  ;;  %s168_s5 = scalar_lea.vmem [#allocation2], %s1385_s29 }
  0x3c   : > { %p1439_p5 = pnand %p1671_p1, %p224_p12  ;;  %s177_s8 = sshll.u32 %s168_s5, 4  ;;  %s178_s8 = int_to_ptr.vmem [resolvable:$true] %s177_s8 }
  0x3d   : > { %s1674_s23 = sand.u32 1, %s1268_s14  }
  0x3e   : > { %s1672_s21 = scalar_select %p1439_p5, 1, 0 }
  0x3f   : > { %s165_s9 = scalar_lea.sflag [#allocation3], %s1674_s23 }
  0x41   : > { %s1447_s10 = scalar_lea.hbm %s1673_s0, %s1388_s30  ;;  %s1138_s6 = scalar_lea.hbm %s1673_s0, 384 }
  0x42   : > { %s1133_s11 = scalar_lea.hbm %s1447_s10, 64  ;;  %p1139_p10 = scmp.lt.u32.totalorder %s1447_s10, %s1673_s0 }
  0x43   : > { %p1134_p8 = scmp.ne.s32.totalorder %s1447_s10, %s1133_s11  ;;  %p1140_p13 = scmp.lt.u32.totalorder %s1138_s6, %s1133_s11 }
  0x44   : > { %p1142_p4 = scmp.lt.u32.totalorder %s1133_s11, %s1447_s10 }
  0x45   : > { %p1136_p9 = pnand %p1134_p8, %p1412_p3  ;;  %p1141_p2 = por %p1140_p13, %p1139_p10 }
  0x47   : > { %p1137_p11 = pneg %p1136_p9  ;;  %p1143_p6 = por %p1142_p4, %p1141_p2 }
  0x49   : > { %p1144_p7 = pnand %p1143_p6, %p1137_p11 }
  0x4b   : > { %1147 = shalt.err (!%p1144_p7)
}
  0x4c   : > { %s1148_s5 = scalar_lea.vmem %s178_s8, 64  ;;  %s1283_s23 = smov [#allocation2]  }
  0x4d   : > { %p1149_p12 = scmp.ne.s32.totalorder %s178_s8, %s1148_s5  ;;  %s1153_s16 = sshll.u32 %s1283_s23, 4  ;;  %s1154_s16 = int_to_ptr.vmem [resolvable:$false] %s1153_s16 }
  0x4e   : > { %s1155_s1 = scalar_lea.vmem %s1154_s16, 128  ;;  %p1156_p9 = scmp.lt.s32.totalorder %s178_s8, %s1154_s16 }
  0x4f   : > { %p1151_p1 = pnand %p1149_p12, %p1412_p3  ;;  %p1157_p5 = scmp.lt.s32.totalorder %s1155_s1, %s1148_s5 }
  0x51   : > { %p1152_p8 = pneg %p1151_p1  ;;  %p1158_p0 = por %p1157_p5, %p1156_p9 }
  0x53   : > { %p1159_p10 = pnand %p1158_p0, %p1152_p8 }
  0x55   : > { %1162 = shalt.err (!%p1159_p10)
}
  0x56   : > { %p1675_p13 = scmp.ne.s32.totalorder %s1668_s4, 0  ;;  %s826_s28 = scalar_lea.hbm %s1648_s2, %s1388_s30 }
  0x57   : > { %s209_s6 = scalar_lea.vmem [#allocation7], %s1385_s29  ;;  %s827_s23 = scalar_lea.hbm %s826_s28, 128 }
  0x58   : > { %1014 = dma.hbm_to_vmem [thread:$0]  (!%p1675_p13), %s1447_s10, 64, %s178_s8, %s165_s9  }
  0x59   : > { %s219_s7 = sshll.u32 %s209_s6, 4  ;;  %s1193_s16 = scalar_lea.hbm %s826_s28, 192  ;;  %s220_s7 = int_to_ptr.vmem [resolvable:$true] %s219_s7 }
  0x5a   : > { %p1164_p11 = scmp.ne.s32.totalorder %s827_s23, %s1193_s16  ;;  %s1168_s0 = scalar_lea.hbm %s1648_s2, 384 }
  0x5b   : > { %p1169_p2 = scmp.lt.u32.totalorder %s827_s23, %s1648_s2  ;;  %p1170_p4 = scmp.lt.u32.totalorder %s1168_s0, %s1193_s16 }
  0x5c   : > { %p1166_p0 = pnand %p1164_p11, %p1412_p3  ;;  %p1172_p7 = scmp.lt.u32.totalorder %s1193_s16, %s827_s23 }
  0x5d   : > { %p1171_p6 = por %p1170_p4, %p1169_p2 }
  0x5e   : > { %p1167_p5 = pneg %p1166_p0 }
  0x5f   : > { %p1173_p12 = por %p1172_p7, %p1171_p6 }
  0x61   : > { %p1174_p1 = pnand %p1173_p12, %p1167_p5 }
  0x63   : > { %1177 = shalt.err (!%p1174_p1)
}
  0x64   : > { %s1178_s29 = scalar_lea.vmem %s220_s7, 64  ;;  %s1284_s30 = smov [#allocation7]  }
  0x65   : > { %p1179_p8 = scmp.ne.s32.totalorder %s220_s7, %s1178_s29  ;;  %s1183_s10 = sshll.u32 %s1284_s30, 4  ;;  %s1184_s10 = int_to_ptr.vmem [resolvable:$false] %s1183_s10 }
  0x66   : > { %s1185_s8 = scalar_lea.vmem %s1184_s10, 128  ;;  %p1186_p11 = scmp.lt.s32.totalorder %s220_s7, %s1184_s10 }
  0x67   : > { %p1181_p9 = pnand %p1179_p8, %p1412_p3  ;;  %p1187_p0 = scmp.lt.s32.totalorder %s1185_s8, %s1178_s29 }
  0x69   : > { %p1182_p10 = pneg %p1181_p9  ;;  %p1188_p13 = por %p1187_p0, %p1186_p11 }
  0x6b   : > { %p1189_p2 = pnand %p1188_p13, %p1182_p10 }
  0x6d   : > { %1192 = shalt.err (!%p1189_p2)
}
  0x6e   : > { %p1676_p4 = scmp.ne.s32.totalorder %s1668_s4, 0  ;;  %p1677_p5 = scmp.ne.s32.totalorder %s1672_s21, 0 }
  0x6f   : > { %s1490_s0 = sand.u32 (!%p1677_p5), 1, %s1264_s13   ;;  %p1678_p3 = scmp.ne.s32.totalorder (!%p1677_p5), %s1664_s24, 0 }
  0x70   : > { %1020 = dma.hbm_to_vmem [thread:$0]  (!%p1676_p4), %s827_s23, 64, %s220_s7, %s1407_s19  }
  0x71   : > { %228 = sbr.rel (%p1677_p5) target bundleno = 1597 (0x63d), region = 32  ;;  %s1493_s14 = sshll.u32 (!%p1677_p5), %s1490_s0, 2 }
  0x72   : > { %s231_s26 = scalar_lea.sflag (!%p1677_p5), [#allocation3], %s1490_s0  ;;  %s234_s22 = scalar_lea.vmem (!%p1677_p5), [#allocation2], %s1493_s14 }
  0x78   : > { %1247 = dma.done.wait (%p1678_p3), %s231_s26, 64  }
  0x79   : > { %1249 = vsyncadd (%p1678_p3), %s231_s26, 4294967232  ;;  %s239_s4 = sand.u32 1, %s1345_s18   ;;  %s243_s21 = scalar_lea.vmem [#allocation5], %s1493_s14 }
  0x7a   : > { %s240_s19 = scalar_lea.sflag [#allocation6], %s239_s4 }
  0x7b   : > { %1251 = dma.done.wait (%p1678_p3), %s240_s19, 128  }
  0x7c   : > { %1253 = vsyncadd (%p1678_p3), %s240_s19, 4294967168  ;;  %v1285_v0 = vmov 0.0   ;;  %vm1286_vm0 = vmmov 0   ;;  %vm294_vm1 = vcmask 64512   ;;  %v287_v1 = vld [vmem:[%s243_s21] sm:$0xf]  ;;  %v289_v4 = vlaneseq }
  0x7d   : > { %954 = vmatprep.subr.bf16.mxu0 %v1285_v0  ;;  %956 = vmatprep.mubr.msk.bf16.mxu0 %vm1286_vm0, %v1285_v0  ;;  %v299_v2 = vsel %vm294_vm1, %v287_v1, 0  ;;  %v286_v3 = vld [vmem:[%s234_s22] sm:$0xf]  ;;  %v926_v13 = vcombine.low %v287_v1, %v287_v1  ;;  %s1287_s18 = smov 120   ;;  %s1288_s24 = smov 112   ;;  %vm357_vm3 = vcmask 1043456  }
  0x7e   : > { %960 = vmatprep.subr.bf16.mxu1 %v1285_v0  ;;  %962 = vmatprep.mubr.msk.bf16.mxu1 %vm1286_vm0, %v1285_v0  ;;  %v1518_v5 = vshrl.u32 %v289_v4, 7  ;;  %v1520_v6 = vand.u32 127, %v289_v4  ;;  %v925_v14 = vcombine.low %v286_v3, %v286_v3  ;;  %s1289_s9 = smov 104   ;;  %s252_s20 = scalar_lea.vmem [#allocation7], %s1493_s14  ;;  %vm756_vm4 = vcmask 130048  }
  0x7f   : > { %955 = vmatpush3.bf16.xpose.msra.mxu0 %v299_v2  ;;  %409 = vrot.lane.b32.xlu1 %v926_v13, %s1287_s18  ;;  %v1535_v20 = vld [vmem:[%s252_s20] sm:$0xf]  ;;  %s1290_s11 = smov 8   ;;  %s1291_s28 = smov 16   ;;  %vm758_vm5 = vcmask 195584   ;;  %vm761_vm6 = vcmask 257024  }
  0x80   : > { %972 = vmatprep.subr.bf16.mxu0 %v1285_v0  ;;  %vm293_vm2 = vcmp.le.s32.totalorder %v1520_v6, %v1518_v5  ;;  %v359_v21 = vsel %vm357_vm3, %v1535_v20, 0  ;;  %v928_v4 = vcombine.low %v1535_v20, %v1535_v20  ;;  %s1292_s6 = smov 24   ;;  %s935_s7 = sshll.u32 %s1272_s15, 6 }
  0x81   : > { %961 = vmatpush3.bf16.msra.mxu1 %v359_v21  ;;  %s284_s23 = scalar_lea.vmem [#allocation8], %s1493_s14  ;;  %s1597_s29 = scalar_lea.hbm %s1649_s3, %s935_s7 }
  0x82   : > { %966 = vmatprep.subr.bf16.mxu1 %v1285_v0  ;;  %s778_s16 = sshll.u32 %s284_s23, 4  ;;  %s764_s30 = scalar_lea.sflag [#allocation4], %s1490_s0  ;;  %s1599_s16 = int_to_ptr.vmem [resolvable:$true] %s778_s16 }
  0x83   : > { %404 = vrot.lane.b32.xlu1 %v925_v14, %s1287_s18  ;;  %s1194_s15 = scalar_lea.vmem %s1599_s16, 64  ;;  %p1679_p6 = scmp.ne.s32.totalorder %s1665_s25, 0 }
  0x84   : > { %p1195_p13 = scmp.ne.s32.totalorder %s1599_s16, %s1194_s15  ;;  %s1293_s10 = smov [#allocation8]  }
  0x85   : > { %s1198_s8 = sshll.u32 %s1293_s10, 4  ;;  %s1199_s8 = int_to_ptr.vmem [resolvable:$false] %s1198_s8 }
  0x86   : > { %957 = vmatmul.mubr.msk.bf16.vlgmr.msra.gmra.mrb[0].mxu0 %vm294_vm1, %v286_v3  ;;  %p1196_p7 = pnand %p1195_p13, %p1679_p6  ;;  %s1200_s14 = scalar_lea.vmem %s1199_s8, 128 }
  0x87   : > { %974 = vmatprep.mubr.msk.bf16.mxu0 %vm1286_vm0, %v1285_v0  ;;  %521 = vrot.lane.b32.xlu1 %v925_v14, %s1288_s24  ;;  %p1201_p1 = scmp.lt.s32.totalorder %s1599_s16, %s1199_s8  ;;  %p1202_p8 = scmp.lt.s32.totalorder %s1200_s14, %s1194_s15 }
  0x88   : > { %p1197_p12 = pneg %p1196_p7 }
  0x89   : > { %p1203_p9 = por %p1202_p8, %p1201_p1 }
  0x8b   : > { %634 = vrot.lane.b32.xlu1 %v926_v13, %s1289_s9  ;;  %p1204_p10 = pnand %p1203_p9, %p1197_p12 }
  0x8f   : > { %632 = vrot.lane.b32.xlu1 %v925_v14, %s1289_s9 }
  0xf1   : > { %v410_v24 = vpop.permute.xlu1 %409 }
  0xf2   : > { %v415_v26 = vsel %vm294_vm1, %v410_v24, 0 }
  0xf5   : > { %v405_v28 = vpop.permute.xlu1 %404 }
  0xf9   : > { %v522_v30 = vpop.permute.xlu1 %521 }
  0xfd   : > { %v635_v32 = vpop.permute.xlu1 %634 }
  0xfe   : > { %v640_v33 = vsel %vm294_vm1, %v635_v32, 0 }
 0x101   : > { %v633_v34 = vpop.permute.xlu1 %632 }
 0x159   : > { %v335_v7 = vpop.f32.mrb[0].mxu0 }
 0x15a   : > { %v341_v8 = vsel %vm293_vm2, %v335_v7, -1e+30  ;;  %v958_v9 = vpop.f32.mrb[1].mxu0 }
 0x15b   : > { %v338_v10 = vpop.f32.mrb[2].mxu0  ;;  %v342_v11 = vsel %vm294_vm1, %v341_v8, -inf }
 0x15c   : > { %343 = vmax.xlane.f32.xlu0 %v342_v11  ;;  %v959_v12 = vpop.f32.mrb[3].mxu0 }
 0x1e9   : > { %v344_v15 = vpop.xlane.xlu0 %343 }
 0x1ea   : > { %v345_v16 = vsub.f32 %v341_v8, %v344_v15 }
 0x1ec   : > { %v346_v17 = vmul.f32 1.442695, %v345_v16 }
 0x1ee   : > { %1086 = vpow2.f32 %v346_v17 }
 0x1f8   : > { %v1087_v18 = vpop.eup %1086 }
 0x1f9   : > { %v348_v19 = vsel %vm294_vm1, %v1087_v18, 0.0 }
 0x1fa   : > { %349 = vadd.xlane.f32.xlu0 %v348_v19 }
 0x210   : > { %523 = vrot.lane.b32.xlu0 %v926_v13, %s1288_s24 }
 0x287   : > { %v350_v22 = vpop.xlane.xlu0 %349 }
 0x288   : > { %1088 = vrcp.f32 %v350_v22 }
 0x28b   : > { %v524_v29 = vpop.permute.xlu0 %523 }
 0x28c   : > { %v529_v31 = vsel %vm294_vm1, %v524_v29, 0 }
 0x292   : > { %v1089_v23 = vpop.eup %1088 }
 0x293   : > { %v352_v25 = vmul.f32 %v1089_v23, %v1087_v18 }
 0x295   : > { %v353_v27 = vpack.c.bf16 %v352_v25, %v352_v25 }
 0x297   : > { %963 = vmatmul.mubr.msk.bf16.vlgmr.msra.gmra.mrb[0].mxu1 %vm294_vm1, %v353_v27 }
 0x298   : > { %967 = vmatpush3.bf16.xpose.msra.mxu1 %v415_v26  ;;  %968 = vmatprep.mubr.msk.bf16.mxu1 %vm1286_vm0, %v1285_v0 }
 0x299   : > { %978 = vmatprep.subr.bf16.mxu1 %v1285_v0 }
 0x29f   : > { %969 = vmatmul.mubr.msk.bf16.vlgmr.msra.gmra.mrb[4].mxu1 %vm294_vm1, %v405_v28 }
 0x2a0   : > { %979 = vmatpush3.bf16.xpose.msra.mxu1 %v529_v31  ;;  %980 = vmatprep.mubr.msk.bf16.mxu1 %vm1286_vm0, %v1285_v0 }
 0x2a1   : > { %990 = vmatprep.subr.bf16.mxu1 %v1285_v0 }
 0x2a7   : > { %981 = vmatmul.mubr.msk.bf16.vlgmr.msra.gmra.mrb[8].mxu1 %vm294_vm1, %v522_v30 }
 0x2a8   : > { %991 = vmatpush3.bf16.xpose.msra.mxu1 %v640_v33  ;;  %992 = vmatprep.mubr.msk.bf16.mxu1 %vm1286_vm0, %v1285_v0 }
 0x2af   : > { %993 = vmatmul.mubr.msk.bf16.vlgmr.msra.gmra.mrb[12].mxu1 %vm294_vm1, %v633_v34 }
 0x36a   : > { %v1556_v35 = vpop.f32.mrb[0].mxu1 }
 0x36b   : > { %v964_v36 = vpop.f32.mrb[1].mxu1 }
 0x36c   : > { %v398_v37 = vpop.f32.mrb[2].mxu1 }
 0x36d   : > { %v965_v38 = vpop.f32.mrb[3].mxu1 }
 0x372   : > { %v451_v39 = vpop.f32.mrb[4].mxu1 }
 0x373   : > { %v457_v40 = vsel %vm293_vm2, %v451_v39, -1e+30  ;;  %v970_v41 = vpop.f32.mrb[5].mxu1 }
 0x374   : > { %v454_v42 = vpop.f32.mrb[6].mxu1  ;;  %v458_v43 = vsel %vm294_vm1, %v457_v40, -inf }
 0x375   : > { %459 = vmax.xlane.f32.xlu1 %v458_v43  ;;  %v971_v44 = vpop.f32.mrb[7].mxu1 }
 0x37a   : > { %v565_v45 = vpop.f32.mrb[8].mxu1 }
 0x37b   : > { %v571_v46 = vsel %vm293_vm2, %v565_v45, -1e+30  ;;  %v982_v47 = vpop.f32.mrb[9].mxu1 }
 0x37c   : > { %v572_v48 = vsel %vm294_vm1, %v571_v46, -inf  ;;  %v568_v49 = vpop.f32.mrb[10].mxu1 }
 0x37d   : > { %573 = vmax.xlane.f32.xlu0 %v572_v48  ;;  %v983_v50 = vpop.f32.mrb[11].mxu1 }
 0x382   : > { %v676_v51 = vpop.f32.mrb[12].mxu1 }
 0x383   : > { %v682_v52 = vsel %vm293_vm2, %v676_v51, -1e+30  ;;  %v994_v53 = vpop.f32.mrb[13].mxu1 }
 0x384   : > { %v683_v54 = vsel %vm294_vm1, %v682_v52, -inf  ;;  %v679_v55 = vpop.f32.mrb[14].mxu1 }
 0x385   : > { %684 = vmax.xlane.f32.xlu1 %v683_v54  ;;  %v995_v56 = vpop.f32.mrb[15].mxu1 }
 0x402   : > { %v460_v57 = vpop.xlane.xlu1 %459 }
 0x403   : > { %v461_v58 = vsub.f32 %v457_v40, %v460_v57 }
 0x405   : > { %v462_v59 = vmul.f32 1.442695, %v461_v58 }
 0x407   : > { %1090 = vpow2.f32 %v462_v59 }
 0x40a   : > { %v574_v60 = vpop.xlane.xlu0 %573 }
 0x40b   : > { %v575_v61 = vsub.f32 %v571_v46, %v574_v60 }
 0x40d   : > { %v576_v62 = vmul.f32 1.442695, %v575_v61 }
 0x40f   : > { %1092 = vpow2.f32 %v576_v62 }
 0x411   : > { %v1091_v63 = vpop.eup %1090 }
 0x412   : > { %v464_v1 = vsel %vm294_vm1, %v1091_v63, 0.0  ;;  %v685_v5 = vpop.xlane.xlu1 %684 }
 0x413   : > { %465 = vadd.xlane.f32.xlu1 %v464_v1  ;;  %v686_v6 = vsub.f32 %v682_v52, %v685_v5 }
 0x415   : > { %v687_v7 = vmul.f32 1.442695, %v686_v6 }
 0x417   : > { %1094 = vpow2.f32 %v687_v7 }
 0x419   : > { %v1093_v2 = vpop.eup %1092 }
 0x41a   : > { %v578_v3 = vsel %vm294_vm1, %v1093_v2, 0.0 }
 0x41b   : > { %579 = vadd.xlane.f32.xlu0 %v578_v3 }
 0x421   : > { %v1095_v8 = vpop.eup %1094 }
 0x422   : > { %v689_v9 = vsel %vm294_vm1, %v1095_v8, 0.0 }
 0x424   : > { %584 = vrot.lane.b32.xlu1 %v928_v4, %s1288_s24 }
 0x431   : > { %473 = vrot.lane.b32.xlu0 %v928_v4, %s1287_s18 }
 0x448   : > { %690 = vadd.xlane.f32.xlu1 %v689_v9 }
 0x459   : > { %695 = vrot.lane.b32.xlu1 %v928_v4, %s1289_s9 }
 0x4a0   : > { %v466_v10 = vpop.xlane.xlu1 %465 }
 0x4a1   : > { %1096 = vrcp.f32 %v466_v10 }
 0x4a4   : > { %v585_v16 = vpop.permute.xlu1 %584 }
 0x4a5   : > { %v590_v18 = vsel %vm357_vm3, %v585_v16, 0 }
 0x4a8   : > { %v580_v11 = vpop.xlane.xlu0 %579 }
 0x4a9   : > { %1098 = vrcp.f32 %v580_v11 }
 0x4ab   : > { %v1097_v12 = vpop.eup %1096 }
 0x4ac   : > { %v468_v13 = vmul.f32 %v1097_v12, %v1091_v63  ;;  %v474_v14 = vpop.permute.xlu0 %473 }
 0x4ad   : > { %v479_v15 = vsel %vm357_vm3, %v474_v14, 0 }
 0x4ae   : > { %973 = vmatpush3.bf16.msra.mxu0 %v479_v15  ;;  %v469_v17 = vpack.c.bf16 %v468_v13, %v468_v13 }
 0x4af   : > { %984 = vmatprep.subr.bf16.mxu0 %v1285_v0 }
 0x4b1   : > { %975 = vmatmul.mubr.msk.bf16.vlgmr.msra.gmra.mrb[4].mxu0 %vm294_vm1, %v469_v17 }
 0x4b2   : > { %985 = vmatpush3.bf16.msra.mxu0 %v590_v18  ;;  %986 = vmatprep.mubr.msk.bf16.mxu0 %vm1286_vm0, %v1285_v0 }
 0x4b3   : > { %v1099_v19 = vpop.eup %1098  ;;  %996 = vmatprep.subr.bf16.mxu0 %v1285_v0 }
 0x4b4   : > { %v582_v20 = vmul.f32 %v1099_v19, %v1093_v2 }
 0x4b6   : > { %v583_v21 = vpack.c.bf16 %v582_v20, %v582_v20 }
 0x4b9   : > { %987 = vmatmul.mubr.msk.bf16.vlgmr.msra.gmra.mrb[8].mxu0 %vm294_vm1, %v583_v21 }
 0x4ba   : > { %998 = vmatprep.mubr.msk.bf16.mxu0 %vm1286_vm0, %v1285_v0 }
 0x4d5   : > { %v691_v22 = vpop.xlane.xlu1 %690 }
 0x4d6   : > { %1100 = vrcp.f32 %v691_v22 }
 0x4d9   : > { %v696_v23 = vpop.permute.xlu1 %695 }
 0x4da   : > { %v701_v24 = vsel %vm357_vm3, %v696_v23, 0 }
 0x4db   : > { %997 = vmatpush3.bf16.msra.mxu0 %v701_v24 }
 0x4e0   : > { %v1101_v25 = vpop.eup %1100 }
 0x4e1   : > { %v693_v26 = vmul.f32 %v1101_v25, %v1095_v8 }
 0x4e3   : > { %v694_v27 = vpack.c.bf16 %v693_v26, %v693_v26 }
 0x4e5   : > { %999 = vmatmul.mubr.msk.bf16.vlgmr.msra.gmra.mrb[12].mxu0 %vm294_vm1, %v694_v27 }
 0x584   : > { %v515_v28 = vpop.f32.mrb[4].mxu0 }
 0x585   : > { %744 = vrot.lane.b32.xlu0 %v515_v28, %s1290_s11  ;;  %v976_v29 = vpop.f32.mrb[5].mxu0 }
 0x586   : > { %v518_v30 = vpop.f32.mrb[6].mxu0 }
 0x587   : > { %v977_v31 = vpop.f32.mrb[7].mxu0 }
 0x58c   : > { %v626_v32 = vpop.f32.mrb[8].mxu0 }
 0x58d   : > { %748 = vrot.lane.b32.xlu1 %v626_v32, %s1291_s28  ;;  %v988_v0 = vpop.f32.mrb[9].mxu0 }
 0x58e   : > { %v629_v33 = vpop.f32.mrb[10].mxu0 }
 0x58f   : > { %v989_v34 = vpop.f32.mrb[11].mxu0 }
 0x5b8   : > { %v737_v36 = vpop.f32.mrb[12].mxu0 }
 0x5b9   : > { %752 = vrot.lane.b32.xlu0 %v737_v36, %s1292_s6  ;;  %v1000_v37 = vpop.f32.mrb[13].mxu0 }
 0x5ba   : > { %v740_v38 = vpop.f32.mrb[14].mxu0 }
 0x5bb   : > { %v1001_v39 = vpop.f32.mrb[15].mxu0 }
 0x5f7   : > { %v745_v40 = vpop.permute.xlu0 %744 }
 0x5f8   : > { %v755_v42 = vsel %vm294_vm1, %v1556_v35, %v745_v40 }
 0x5ff   : > { %v749_v41 = vpop.permute.xlu1 %748 }
 0x600   : > { %v757_v43 = vsel %vm756_vm4, %v755_v42, %v749_v41 }
 0x62b   : > { %v753_v44 = vpop.permute.xlu0 %752 }
 0x62c   : > { %v759_v45 = vsel %vm758_vm5, %v757_v43, %v753_v44 }
 0x62d   : > { %v760_v46 = vpack.c.bf16 %v759_v45, %v759_v45 }
 0x62f   : > { %762 = vst.msk [vmem:[%s284_s23] sm:$0xf] %vm761_vm6, %v760_v46 }
 0x630   : > { %1207 = shalt.err (!%p1204_p10)
}
 0x631   : > { %s1208_s0 = scalar_lea.hbm %s1597_s29, 64  ;;  %s1212_s4 = scalar_lea.hbm %s1649_s3, 128 }
 0x632   : > { %p1209_p11 = scmp.ne.s32.totalorder %s1597_s29, %s1208_s0  ;;  %p1213_p4 = scmp.lt.u32.totalorder %s1597_s29, %s1649_s3 }
 0x633   : > { %p1214_p5 = scmp.lt.u32.totalorder %s1212_s4, %s1208_s0  ;;  %p1216_p13 = scmp.lt.u32.totalorder %s1208_s0, %s1597_s29 }
 0x634   : > { %p1210_p0 = pnand %p1209_p11, %p1679_p6 }
 0x635   : > { %p1215_p3 = por %p1214_p5, %p1213_p4 }
 0x636   : > { %p1211_p2 = pneg %p1210_p0 }
 0x637   : > { %p1217_p7 = por %p1216_p13, %p1215_p3 }
 0x639   : > { %p1218_p12 = pnand %p1217_p7, %p1211_p2 }
 0x63b   : > { %1221 = shalt.err (!%p1218_p12)
}
 0x63c   : > { %1009 = dma.vmem_to_hbm [thread:$0]  (%p1679_p6), %s1599_s16, 64, %s1597_s29, %s764_s30  }
 0x63d PF: > { %s790_s18 = sand.u32 1, %s1260_s12   ;;  %p1680_p1 = scmp.ne.s32.totalorder %s1667_s27, 0 }
 0x63e   : > { %p1681_p8 = scmp.ge.s32.totalorder %s1280_s17, 2  ;;  %s791_s24 = scalar_lea.sflag [#allocation4], %s790_s18 }
 0x640   : > { %p1022_p9 = pnand %p1681_p8, %p1680_p1 }
 0x642   : > { %1255 = dma.done.wait (!%p1022_p9), %s791_s24, 64  }
 0x643   : > { %1257 = vsyncadd (!%p1022_p9), %s791_s24, 4294967232  ;;  %s22_s17 = sadd.s32 1, %s1280_s17   ;;  %s1682_s9 = sld [smem:[#allocation12_spill]] }
 0x644   : > { %p19_p10 = scmp.ge.s32.totalorder %s22_s17, 4   ;;  %s1683_s14 = sld [smem:[#allocation15_spill]] }
 0x645   : > { %s1684_s15 = sld [smem:[#allocation13_spill]]  ;;  %s1685_s16 = sld [smem:[#allocation14_spill]] }
 0x646   : > { %s1686_s12 = smov %s1264_s13  ;;  %21 = sbr.rel (!%p19_p10) target bundleno = 11 (0xb), region = 101 }
 0x649   : > { %s1687_s13 = smov %s1682_s9 }
 0x64d   :  { %796 = vsyncpa [#allocation3], 1 }
 0x64e   :  { %798 = vsyncpa [#allocation3 + $0x1], 1 }
 0x64f   :  { %799 = vsyncpa [#allocation6], 1 }
 0x650   :  { %801 = vsyncpa [#allocation6 + $0x1], 1 }
 0x651   :  { %802 = vsyncpa [#allocation4], 1 }
 0x652   :  { %804 = vsyncpa [#allocation4 + $0x1], 1 }

// kernel: lora_decoder_forward.17
= control target key start
LH: loop header
LB: loop body
LE: loop exit
PB: predicated region body
PF: predicated region fallthrough
CT: control target
= control target key end

     0   :  { %9 = vsyncpa [#allocation4], 0  ;;  %s482_s0 = inlined_call_operand.hbm [shape: bf16[16,32], index: 0, kind: input, shape index: {}]   ;;  %s483_s1 = inlined_call_operand.hbm [shape: bf16[32,32], index: 1, kind: input, shape index: {}]   ;;  %s484_s2 = inlined_call_operand.hbm [shape: f32[1,32], index: 2, kind: input, shape index: {}]   ;;  %s485_s3 = inlined_call_operand.hbm [shape: bf16[16,32], index: 3, kind: input, shape index: {}]   ;;  %s486_s4 = inlined_call_operand.hbm [shape: bf16[16,32], index: 4, kind: output, shape index: {}]  }
   0x1   :  { %10 = vsyncpa [#allocation7], 0 }
   0x2   :  { %11 = vsyncpa [#allocation10], 0 }
   0x3   :  { %12 = vsyncpa [#allocation5], 0  ;;  %s357_s15 = smov [#allocation6]   ;;  %s358_s17 = smov [#allocation3]  }
   0x4   :  { %s30_s16 = sshll.u32 %s357_s15, 4  ;;  %s18_s18 = sshll.u32 %s358_s17, 4  ;;  %s31_s16 = int_to_ptr.vmem [resolvable:$true] %s30_s16  ;;  %s391_s18 = int_to_ptr.vmem [resolvable:$true] %s18_s18 }
   0x5   :  { %s239_s21 = scalar_lea.hbm %s483_s1, 256 }
   0x6   :  { %p240_p0 = scmp.ne.s32.totalorder %s483_s1, %s239_s21  ;;  %p243_p1 = scmp.lt.u32.totalorder %s239_s21, %s483_s1 }
   0x8   :  { %p245_p2 = pnand %p243_p1, %p240_p0 }
   0xa   :  { %248 = shalt.err (!%p245_p2)
}
   0xb   :  { %s249_s26 = scalar_lea.vmem %s31_s16, 256  ;;  %p254_p4 = scmp.lt.s32.totalorder %s31_s16, %s31_s16 }
   0xc   :  { %p250_p3 = scmp.ne.s32.totalorder %s31_s16, %s249_s26  ;;  %p255_p5 = scmp.lt.s32.totalorder %s249_s26, %s249_s26 }
   0xe   :  { %p256_p6 = por %p255_p5, %p254_p4 }
  0x10   :  { %p257_p7 = pnand %p256_p6, %p250_p3 }
  0x12   :  { %260 = shalt.err (!%p257_p7)
}
  0x13   :  { %s359_s27 = smov 64   ;;  %s360_s28 = smov 4  }
  0x14   :  { %36 = dma.hbm_to_vmem [thread:$0]  %s483_s1, 256, %s31_s16, [#allocation7], %s359_s27, %s359_s27, %s360_s28  }
  0x15   :  { %s261_s7 = scalar_lea.hbm %s482_s0, 128 }
  0x16   :  { %p262_p8 = scmp.ne.s32.totalorder %s482_s0, %s261_s7  ;;  %p265_p9 = scmp.lt.u32.totalorder %s261_s7, %s482_s0 }
  0x18   :  { %p267_p10 = pnand %p265_p9, %p262_p8 }
  0x1a   :  { %270 = shalt.err (!%p267_p10)
}
  0x1b   :  { %s271_s12 = scalar_lea.vmem %s391_s18, 128  ;;  %p276_p12 = scmp.lt.s32.totalorder %s391_s18, %s391_s18 }
  0x1c   :  { %p272_p11 = scmp.ne.s32.totalorder %s391_s18, %s271_s12  ;;  %p277_p13 = scmp.lt.s32.totalorder %s271_s12, %s271_s12 }
  0x1e   :  { %p278_p0 = por %p277_p13, %p276_p12 }
  0x20   :  { %p279_p1 = pnand %p278_p0, %p272_p11 }
  0x22   :  { %282 = shalt.err (!%p279_p1)
}
  0x23   :  { %24 = dma.hbm_to_vmem [thread:$0]  %s482_s0, 128, %s391_s18, [#allocation4], %s359_s27, %s359_s27, %s360_s28  }
  0x24   :  { %s361_s14 = smov [#allocation8]   ;;  %s362_s16 = smov [#allocation9]  }
  0x25   :  { %s43_s15 = sshll.u32 %s361_s14, 4  ;;  %s52_s17 = sshll.u32 %s362_s16, 4  ;;  %s44_s15 = int_to_ptr.vmem [resolvable:$true] %s43_s15  ;;  %s428_s17 = int_to_ptr.vmem [resolvable:$true] %s52_s17 }
  0x26   :  { %s283_s21 = scalar_lea.hbm %s484_s2, 16 }
  0x27   :  { %p284_p2 = scmp.ne.s32.totalorder %s484_s2, %s283_s21  ;;  %p287_p3 = scmp.lt.u32.totalorder %s283_s21, %s484_s2 }
  0x29   :  { %p289_p4 = pnand %p287_p3, %p284_p2 }
  0x2b   :  { %292 = shalt.err (!%p289_p4)
}
  0x2c   :  { %s293_s0 = scalar_lea.vmem %s44_s15, 16  ;;  %s297_s18 = scalar_lea.vmem %s44_s15, 32 }
  0x2d   :  { %p294_p5 = scmp.ne.s32.totalorder %s44_s15, %s293_s0  ;;  %p298_p6 = scmp.lt.s32.totalorder %s44_s15, %s44_s15 }
  0x2e   :  { %p299_p7 = scmp.lt.s32.totalorder %s297_s18, %s293_s0 }
  0x30   :  { %p300_p8 = por %p299_p7, %p298_p6 }
  0x32   :  { %p301_p9 = pnand %p300_p8, %p294_p5 }
  0x34   :  { %304 = shalt.err (!%p301_p9)
}
  0x35   :  { %46 = dma.hbm_to_vmem [thread:$0]  %s484_s2, 16, %s44_s15, [#allocation7]  }
  0x36   :  { %s305_s6 = scalar_lea.hbm %s485_s3, 128 }
  0x37   :  { %p306_p10 = scmp.ne.s32.totalorder %s485_s3, %s305_s6  ;;  %p309_p11 = scmp.lt.u32.totalorder %s305_s6, %s485_s3 }
  0x39   :  { %p311_p12 = pnand %p309_p11, %p306_p10 }
  0x3b   :  { %314 = shalt.err (!%p311_p12)
}
  0x3c   :  { %s315_s11 = scalar_lea.vmem %s428_s17, 128  ;;  %p320_p0 = scmp.lt.s32.totalorder %s428_s17, %s428_s17 }
  0x3d   :  { %p316_p13 = scmp.ne.s32.totalorder %s428_s17, %s315_s11  ;;  %p321_p1 = scmp.lt.s32.totalorder %s315_s11, %s315_s11 }
  0x3f   :  { %p322_p2 = por %p321_p1, %p320_p0 }
  0x41   :  { %p323_p3 = pnand %p322_p2, %p316_p13 }
  0x43   :  { %326 = shalt.err (!%p323_p3)
}
  0x44   :  { %58 = dma.hbm_to_vmem [thread:$0]  %s485_s3, 128, %s428_s17, [#allocation10], %s359_s27, %s359_s27, %s360_s28  }
  0x45   :  { %349 = dma.done.wait [#allocation4], 128  }
  0x46   :  { %350 = vsyncadd [#allocation4], 4294967168 }
  0x47   :  { %351 = dma.done.wait [#allocation7], 272  }
  0x48   :  { %352 = vsyncadd [#allocation7], 4294967024 }
  0x49   :  { %353 = dma.done.wait [#allocation10], 128  }
  0x4a   :  { %354 = vsyncadd [#allocation10], 4294967168  ;;  %vm76_vm0 = vcmask 261120   ;;  %v363_v0 = vmov 0.0   ;;  %vm364_vm1 = vmmov 0   ;;  %v236_v1 = vld [vmem:[#allocation6] sm:$0xff]  }
  0x4b   :  { %219 = vmatprep.subr.bf16.mxu0 %v363_v0  ;;  %223 = vmatprep.mubr.msk.bf16.mxu0 %vm364_vm1, %v363_v0  ;;  %77 = vst.msk [vmem:[#allocation2] sm:$0xff] %vm76_vm0, %v363_v0  ;;  %78 = vst.msk [vmem:[#allocation2 + $0x8] sm:$0xff] %vm76_vm0, %v363_v0  ;;  %v237_v2 = vld [vmem:[#allocation6 + $0x8] sm:$0xff]   ;;  %v238_v3 = vld [vmem:[#allocation3] sm:$0xff]   ;;  %vm181_vm2 = vcmask 257024   ;;  %s365_s3 = smov [#allocation11]  }
  0x4c   :  { %220 = vmatpush3.bf16.msra.mxu0 %v236_v1  ;;  %v213_v12 = vld [vmem:[#allocation9] sm:$0xff]   ;;  %v207_v13 = vld [vmem:[#allocation8] ss:$0 sm:$0xff]  ;;  %s189_s1 = sshll.u32 %s365_s3, 4  ;;  %s190_s1 = int_to_ptr.vmem [resolvable:$true] %s189_s1 }
  0x4d   :  { %221 = vmatprep.subr.bf16.mxu0 %v363_v0  ;;  %v214_v14 = vunpack.c.l.bf16 %v213_v12  ;;  %v215_v17 = vunpack.c.h.bf16 %v213_v12  ;;  %s327_s13 = scalar_lea.vmem %s190_s1, 128  ;;  %p332_p5 = scmp.lt.s32.totalorder %s190_s1, %s190_s1 }
  0x4e   :  { %p328_p4 = scmp.ne.s32.totalorder %s190_s1, %s327_s13  ;;  %p333_p6 = scmp.lt.s32.totalorder %s327_s13, %s327_s13 }
  0x50   :  { %222 = vmatpush3.bf16.msra.mxu0 %v237_v2  ;;  %p334_p7 = por %p333_p6, %p332_p5 }
  0x52   :  { %v81_v4 = vld [vmem:[#allocation2] sm:$0xff]  ;;  %v82_v6 = vld [vmem:[#allocation2 + $0x8] sm:$0xff]  ;;  %p335_p8 = pnand %p334_p7, %p328_p4 }
  0x53   :  { %224 = vmatmul.mubr.msk.bf16.vlgmr.msra.gmra.mrb[0].mxu0 %vm76_vm0, %v238_v3 }
 0x126   :  { %v142_v5 = vpop.f32.mrb[0].mxu0 }
 0x127   :  { %v149_v7 = vadd.f32 %v142_v5, %v81_v4  ;;  %v225_v8 = vpop.f32.mrb[1].mxu0 }
 0x128   :  { %v145_v9 = vpop.f32.mrb[2].mxu0 }
 0x129   :  { %151 = vst.msk [vmem:[#allocation2] sm:$0xff] %vm76_vm0, %v149_v7  ;;  %v150_v10 = vadd.f32 %v145_v9, %v82_v6  ;;  %v226_v11 = vpop.f32.mrb[3].mxu0 }
 0x12b   :  { %152 = vst.msk [vmem:[#allocation2 + $0x8] sm:$0xff] %vm76_vm0, %v150_v10 }
 0x130   :  { %v156_v15 = vld [vmem:[#allocation2] sm:$0xff] }
 0x131   :  { %v165_v16 = vadd.f32 %v207_v13, %v156_v15 }
 0x132   :  { %v157_v18 = vld [vmem:[#allocation2 + $0x8] sm:$0xff] }
 0x133   :  { %v166_v19 = vadd.f32 %v207_v13, %v157_v18  ;;  %v171_v20 = vadd.f32 %v214_v14, %v165_v16 }
 0x135   :  { %v172_v21 = vadd.f32 %v215_v17, %v166_v19  ;;  %v210_v22 = vpack.c.bf16 %v171_v20, %v171_v20 }
 0x137   :  { %v211_v23 = vpack.c.bf16 %v172_v21, %v172_v21  ;;  %182 = vst.msk [vmem:[#allocation11] sm:$0xf] %vm181_vm2, %v210_v22 }
 0x139   :  { %183 = vst.msk [vmem:[#allocation11 + $0x4] sm:$0xf] %vm181_vm2, %v211_v23 }
 0x13a   :  { %338 = shalt.err (!%p335_p8)
}
 0x13b   :  { %s339_s16 = scalar_lea.hbm %s486_s4, 128 }
 0x13c   :  { %p340_p9 = scmp.ne.s32.totalorder %s486_s4, %s339_s16  ;;  %p343_p10 = scmp.lt.u32.totalorder %s339_s16, %s486_s4 }
 0x13e   :  { %p345_p11 = pnand %p343_p10, %p340_p9 }
 0x140   :  { %348 = shalt.err (!%p345_p11)
}
 0x141   :  { %195 = dma.vmem_to_hbm [thread:$0]  %s190_s1, 128, %s486_s4, [#allocation5], %s359_s27, %s359_s27, %s360_s28  }
 0x142   :  { %355 = dma.done.wait [#allocation5], 128  }
 0x143   :  { %356 = vsyncadd [#allocation5], 4294967168 }
 0x144   :  { %199 = vsyncpa [#allocation4], 1 }
 0x145   :  { %200 = vsyncpa [#allocation7], 1 }
 0x146   :  { %201 = vsyncpa [#allocation10], 1 }
 0x147   :  { %202 = vsyncpa [#allocation5], 1 }

// kernel: lora_decoder_forward.18
= control target key start
LH: loop header
LB: loop body
LE: loop exit
PB: predicated region body
PF: predicated region fallthrough
CT: control target
= control target key end

     0   :  { %10 = vsyncpa [#allocation5], 0  ;;  %s600_s0 = inlined_call_operand.hbm [shape: bf16[16,32], index: 0, kind: input, shape index: {}]   ;;  %s601_s1 = inlined_call_operand.hbm [shape: bf16[32,128], index: 1, kind: input, shape index: {}]   ;;  %s602_s2 = inlined_call_operand.hbm [shape: f32[1,128], index: 2, kind: input, shape index: {}]   ;;  %s603_s3 = inlined_call_operand.hbm [shape: f32[1,32], index: 3, kind: input, shape index: {}]   ;;  %s604_s4 = inlined_call_operand.hbm [shape: f32[1,32], index: 4, kind: input, shape index: {}]   ;;  %s605_s5 = inlined_call_operand.hbm [shape: bf16[16,128], index: 5, kind: output, shape index: {}]  }
   0x1   :  { %11 = vsyncpa [#allocation8], 0 }
   0x2   :  { %12 = vsyncpa [#allocation11], 0 }
   0x3   :  { %13 = vsyncpa [#allocation6], 0  ;;  %s465_s18 = smov [#allocation7]   ;;  %s466_s20 = smov [#allocation10]  }
   0x4   :  { %s31_s19 = sshll.u32 %s465_s18, 4  ;;  %s54_s21 = sshll.u32 %s466_s20, 4  ;;  %s32_s19 = int_to_ptr.vmem [resolvable:$true] %s31_s19  ;;  %s505_s21 = int_to_ptr.vmem [resolvable:$true] %s54_s21 }
   0x5   :  { %s325_s24 = scalar_lea.hbm %s601_s1, 256 }
   0x6   :  { %p326_p0 = scmp.ne.s32.totalorder %s601_s1, %s325_s24  ;;  %p329_p1 = scmp.lt.u32.totalorder %s325_s24, %s601_s1 }
   0x8   :  { %p331_p2 = pnand %p329_p1, %p326_p0 }
   0xa   :  { %334 = shalt.err (!%p331_p2)
}
   0xb   :  { %s335_s29 = scalar_lea.vmem %s32_s19, 256  ;;  %p340_p4 = scmp.lt.s32.totalorder %s32_s19, %s32_s19 }
   0xc   :  { %p336_p3 = scmp.ne.s32.totalorder %s32_s19, %s335_s29  ;;  %p341_p5 = scmp.lt.s32.totalorder %s335_s29, %s335_s29 }
   0xe   :  { %p342_p6 = por %p341_p5, %p340_p4 }
  0x10   :  { %p343_p7 = pnand %p342_p6, %p336_p3 }
  0x12   :  { %346 = shalt.err (!%p343_p7)
}
  0x13   :  { %s467_s30 = smov 64   ;;  %s468_s6 = smov 4  }
  0x14   :  { %37 = dma.hbm_to_vmem [thread:$0]  %s601_s1, 256, %s32_s19, [#allocation8], %s467_s30, %s467_s30, %s468_s6  }
  0x15   :  { %s347_s11 = scalar_lea.hbm %s603_s3, 16 }
  0x16   :  { %p348_p8 = scmp.ne.s32.totalorder %s603_s3, %s347_s11  ;;  %p351_p9 = scmp.lt.u32.totalorder %s347_s11, %s603_s3 }
  0x18   :  { %p353_p10 = pnand %p351_p9, %p348_p8 }
  0x1a   :  { %356 = shalt.err (!%p353_p10)
}
  0x1b   :  { %s357_s16 = scalar_lea.vmem %s505_s21, 16  ;;  %s361_s1 = scalar_lea.vmem %s505_s21, 32 }
  0x1c   :  { %p358_p11 = scmp.ne.s32.totalorder %s505_s21, %s357_s16  ;;  %p362_p12 = scmp.lt.s32.totalorder %s505_s21, %s505_s21 }
  0x1d   :  { %p363_p13 = scmp.lt.s32.totalorder %s361_s1, %s357_s16 }
  0x1f   :  { %p364_p0 = por %p363_p13, %p362_p12 }
  0x21   :  { %p365_p1 = pnand %p364_p0, %p358_p11 }
  0x23   :  { %368 = shalt.err (!%p365_p1)
}
  0x24   :  { %57 = dma.hbm_to_vmem [thread:$0]  %s603_s3, 16, %s505_s21, [#allocation11]  }
  0x25   :  { %s469_s19 = smov [#allocation4]   ;;  %s470_s22 = smov [#allocation9]  }
  0x26   :  { %s19_s20 = sshll.u32 %s469_s19, 4  ;;  %s44_s23 = sshll.u32 %s470_s22, 4  ;;  %s20_s20 = int_to_ptr.vmem [resolvable:$true] %s19_s20  ;;  %s45_s23 = int_to_ptr.vmem [resolvable:$true] %s44_s23 }
  0x27   :  { %s369_s26 = scalar_lea.hbm %s600_s0, 128 }
  0x28   :  { %p370_p2 = scmp.ne.s32.totalorder %s600_s0, %s369_s26  ;;  %p373_p3 = scmp.lt.u32.totalorder %s369_s26, %s600_s0 }
  0x2a   :  { %p375_p4 = pnand %p373_p3, %p370_p2 }
  0x2c   :  { %378 = shalt.err (!%p375_p4)
}
  0x2d   :  { %s379_s3 = scalar_lea.vmem %s20_s20, 128  ;;  %p384_p6 = scmp.lt.s32.totalorder %s20_s20, %s20_s20 }
  0x2e   :  { %p380_p5 = scmp.ne.s32.totalorder %s20_s20, %s379_s3  ;;  %p385_p7 = scmp.lt.s32.totalorder %s379_s3, %s379_s3 }
  0x30   :  { %p386_p8 = por %p385_p7, %p384_p6 }
  0x32   :  { %p387_p9 = pnand %p386_p8, %p380_p5 }
  0x34   :  { %390 = shalt.err (!%p387_p9)
}
  0x35   :  { %25 = dma.hbm_to_vmem [thread:$0]  %s600_s0, 128, %s20_s20, [#allocation5], %s467_s30, %s467_s30, %s468_s6  }
  0x36   :  { %s391_s11 = scalar_lea.hbm %s602_s2, 16 }
  0x37   :  { %p392_p10 = scmp.ne.s32.totalorder %s602_s2, %s391_s11  ;;  %p395_p11 = scmp.lt.u32.totalorder %s391_s11, %s602_s2 }
  0x39   :  { %p397_p12 = pnand %p395_p11, %p392_p10 }
  0x3b   :  { %400 = shalt.err (!%p397_p12)
}
  0x3c   :  { %s401_s16 = scalar_lea.vmem %s45_s23, 16  ;;  %s405_s1 = scalar_lea.vmem %s45_s23, 32 }
  0x3d   :  { %p402_p13 = scmp.ne.s32.totalorder %s45_s23, %s401_s16  ;;  %p406_p0 = scmp.lt.s32.totalorder %s45_s23, %s45_s23 }
  0x3e   :  { %p407_p1 = scmp.lt.s32.totalorder %s405_s1, %s401_s16 }
  0x40   :  { %p408_p2 = por %p407_p1, %p406_p0 }
  0x42   :  { %p409_p3 = pnand %p408_p2, %p402_p13 }
  0x44   :  { %412 = shalt.err (!%p409_p3)
}
  0x45   :  { %47 = dma.hbm_to_vmem [thread:$0]  %s602_s2, 16, %s45_s23, [#allocation8]  }
  0x46   :  { %s471_s18 = smov [#allocation12]   ;;  %s413_s24 = scalar_lea.hbm %s604_s4, 16 }
  0x47   :  { %s64_s19 = sshll.u32 %s471_s18, 4  ;;  %p414_p4 = scmp.ne.s32.totalorder %s604_s4, %s413_s24  ;;  %s65_s19 = int_to_ptr.vmem [resolvable:$true] %s64_s19 }
  0x48   :  { %p417_p5 = scmp.lt.u32.totalorder %s413_s24, %s604_s4 }
  0x4a   :  { %p419_p6 = pnand %p417_p5, %p414_p4 }
  0x4c   :  { %422 = shalt.err (!%p419_p6)
}
  0x4d   :  { %s423_s29 = scalar_lea.vmem %s65_s19, 16  ;;  %s427_s2 = scalar_lea.vmem %s65_s19, 32 }
  0x4e   :  { %p424_p7 = scmp.ne.s32.totalorder %s65_s19, %s423_s29  ;;  %p428_p8 = scmp.lt.s32.totalorder %s65_s19, %s65_s19 }
  0x4f   :  { %p429_p9 = scmp.lt.s32.totalorder %s427_s2, %s423_s29 }
  0x51   :  { %p430_p10 = por %p429_p9, %p428_p8 }
  0x53   :  { %p431_p11 = pnand %p430_p10, %p424_p7 }
  0x55   :  { %434 = shalt.err (!%p431_p11)
}
  0x56   :  { %67 = dma.hbm_to_vmem [thread:$0]  %s604_s4, 16, %s65_s19, [#allocation11]  }
  0x57   :  { %457 = dma.done.wait [#allocation5], 128  }
  0x58   :  { %458 = vsyncadd [#allocation5], 4294967168 }
  0x59   :  { %459 = dma.done.wait [#allocation8], 272  }
  0x5a   :  { %460 = vsyncadd [#allocation8], 4294967024 }
  0x5b   :  { %461 = dma.done.wait [#allocation11], 32  }
  0x5c   :  { %462 = vsyncadd [#allocation11], 4294967264  ;;  %v286_v0 = vld [vmem:[#allocation4] sm:$0xff]   ;;  %vm98_vm0 = vcmask 261120   ;;  %v315_v15 = vld [vmem:[#allocation7] sm:$0xff]   ;;  %v472_v16 = vmov 0.0  }
  0x5d   :  { %v287_v1 = vunpack.c.l.bf16 %v286_v0  ;;  %v288_v2 = vunpack.c.h.bf16 %v286_v0  ;;  %297 = vmatprep.subr.bf16.mxu0 %v472_v16  ;;  %v316_v17 = vld [vmem:[#allocation7 + $0x8] sm:$0xff]   ;;  %vm473_vm1 = vmmov 0   ;;  %v275_v26 = vld [vmem:[#allocation10] ss:$0 sm:$0xff]  ;;  %v276_v30 = vld [vmem:[#allocation12] ss:$0 sm:$0xff] }
  0x5e   :  { %298 = vmatpush3.bf16.msra.mxu0 %v315_v15  ;;  %301 = vmatprep.mubr.msk.bf16.mxu0 %vm473_vm1, %v472_v16  ;;  %v280_v36 = vld [vmem:[#allocation9] ss:$0 sm:$0xff]  ;;  %s474_s4 = smov [#allocation13]  }
  0x5f   :  { %v99_v3 = vsel %vm98_vm0, %v287_v1, 0.0  ;;  %v102_v4 = vsel %vm98_vm0, %v288_v2, 0.0  ;;  %299 = vmatprep.subr.bf16.mxu0 %v472_v16  ;;  %s261_s3 = sshll.u32 %s474_s4, 4  ;;  %s262_s3 = int_to_ptr.vmem [resolvable:$true] %s261_s3 }
  0x60   :  { %100 = vadd.xlane.f32.xlu0 %v99_v3  ;;  %s435_s21 = scalar_lea.vmem %s262_s3, 128  ;;  %p440_p13 = scmp.lt.s32.totalorder %s262_s3, %s262_s3 }
  0x61   :  { %p436_p12 = scmp.ne.s32.totalorder %s262_s3, %s435_s21  ;;  %p441_p0 = scmp.lt.s32.totalorder %s435_s21, %s435_s21 }
  0x62   :  { %300 = vmatpush3.bf16.msra.mxu0 %v316_v17 }
  0x63   :  { %p442_p1 = por %p441_p0, %p440_p13 }
  0x64   :  { %103 = vadd.xlane.f32.xlu0 %v102_v4 }
  0x65   :  { %p443_p2 = pnand %p442_p1, %p436_p12 }
  0xed   :  { %v101_v5 = vpop.xlane.xlu0 %100 }
  0xee   :  { %v106_v6 = vmul.f32 0.03125, %v101_v5 }
  0xf0   :  { %v108_v7 = vsub.f32 %v287_v1, %v106_v6 }
  0xf1   :  { %v104_v8 = vpop.xlane.xlu0 %103 }
  0xf2   :  { %v107_v9 = vmul.f32 0.03125, %v104_v8  ;;  %v110_v10 = vmul.f32 %v108_v7, %v108_v7 }
  0xf4   :  { %v109_v11 = vsub.f32 %v288_v2, %v107_v9  ;;  %v112_v12 = vsel %vm98_vm0, %v110_v10, 0.0 }
  0xf5   :  { %113 = vadd.xlane.f32.xlu1 %v112_v12 }
  0xf6   :  { %v111_v13 = vmul.f32 %v109_v11, %v109_v11 }
  0xf8   :  { %v115_v14 = vsel %vm98_vm0, %v111_v13, 0.0 }
  0xf9   :  { %116 = vadd.xlane.f32.xlu1 %v115_v14 }
 0x182   :  { %v114_v18 = vpop.xlane.xlu1 %113 }
 0x183   :  { %v118_v19 = vmul.f32 0.03125, %v114_v18 }
 0x185   :  { %v120_v20 = vadd.f32 1e-05, %v118_v19 }
 0x186   :  { %v117_v21 = vpop.xlane.xlu1 %116 }
 0x187   :  { %317 = vrsqrt.f32 %v120_v20  ;;  %v119_v22 = vmul.f32 0.03125, %v117_v21 }
 0x189   :  { %v121_v23 = vadd.f32 1e-05, %v119_v22 }
 0x18b   :  { %319 = vrsqrt.f32 %v121_v23 }
 0x191   :  { %v318_v24 = vpop.eup %317 }
 0x192   :  { %v124_v25 = vmul.f32 %v318_v24, %v108_v7 }
 0x194   :  { %v133_v28 = vmul.f32 %v275_v26, %v124_v25 }
 0x195   :  { %v320_v27 = vpop.eup %319 }
 0x196   :  { %v125_v29 = vmul.f32 %v320_v27, %v109_v11  ;;  %v142_v32 = vadd.f32 %v276_v30, %v133_v28 }
 0x198   :  { %v134_v31 = vmul.f32 %v275_v26, %v125_v29 }
 0x19a   :  { %v143_v33 = vadd.f32 %v276_v30, %v134_v31 }
 0x19c   :  { %v144_v34 = vpack.c.bf16 %v143_v33, %v142_v32 }
 0x19e   :  { %145 = vst.msk [vmem:[#allocation3] sm:$0xff] %vm98_vm0, %v144_v34 }
 0x1a5   :  { %v146_v35 = vld [vmem:[#allocation3] sm:$0xff] }
 0x1a6   :  { %302 = vmatmul.mubr.msk.bf16.vlgmr.msra.gmra.mrb[0].mxu0 %vm98_vm0, %v146_v35 }
 0x279   :  { %v203_v37 = vpop.f32.mrb[0].mxu0 }
 0x27a   :  { %v226_v38 = vadd.f32 %v280_v36, %v203_v37  ;;  %v303_v39 = vpop.f32.mrb[1].mxu0 }
 0x27b   :  { %v206_v40 = vpop.f32.mrb[2].mxu0 }
 0x27c   :  { %v230_v41 = vmul.f32 0.044715, %v226_v38  ;;  %v227_v42 = vadd.f32 %v280_v36, %v206_v40  ;;  %v304_v43 = vpop.f32.mrb[3].mxu0  ;;  %v228_v56 = vmul.f32 0.5, %v226_v38 }
 0x27e   :  { %v232_v44 = vmul.f32 %v230_v41, %v226_v38  ;;  %v231_v45 = vmul.f32 0.044715, %v227_v42  ;;  %v229_v57 = vmul.f32 0.5, %v227_v42 }
 0x280   :  { %v234_v46 = vmul.f32 %v232_v44, %v226_v38  ;;  %v233_v47 = vmul.f32 %v231_v45, %v227_v42 }
 0x282   :  { %v235_v48 = vmul.f32 %v233_v47, %v227_v42  ;;  %v236_v49 = vadd.f32 %v234_v46, %v226_v38 }
 0x284   :  { %v237_v50 = vadd.f32 %v235_v48, %v227_v42  ;;  %v238_v51 = vmul.f32 0.7978846, %v236_v49 }
 0x286   :  { %v239_v52 = vmul.f32 0.7978846, %v237_v50  ;;  %321 = vtanh.f32 %v238_v51 }
 0x288   :  { %323 = vtanh.f32 %v239_v52 }
 0x290   :  { %v322_v53 = vpop.eup %321 }
 0x291   :  { %v242_v54 = vadd.f32 1.0, %v322_v53 }
 0x292   :  { %v324_v55 = vpop.eup %323 }
 0x293   :  { %v243_v58 = vadd.f32 1.0, %v324_v55  ;;  %v244_v59 = vmul.f32 %v242_v54, %v228_v56 }
 0x295   :  { %v245_v60 = vmul.f32 %v243_v58, %v229_v57 }
 0x297   :  { %v292_v61 = vpack.c.bf16 %v245_v60, %v244_v59 }
 0x299   :  { %293 = vst [vmem:[#allocation13] sm:$0xff] %v292_v61  }
 0x29a   :  { %446 = shalt.err (!%p443_p2)
}
 0x29b   :  { %s447_s10 = scalar_lea.hbm %s605_s5, 128 }
 0x29c   :  { %p448_p3 = scmp.ne.s32.totalorder %s605_s5, %s447_s10  ;;  %p451_p4 = scmp.lt.u32.totalorder %s447_s10, %s605_s5 }
 0x29e   :  { %p453_p5 = pnand %p451_p4, %p448_p3 }
 0x2a0   :  { %456 = shalt.err (!%p453_p5)
}
 0x2a1   :  { %267 = dma.vmem_to_hbm [thread:$0]  %s262_s3, 128, %s605_s5, [#allocation6], %s467_s30, %s467_s30, %s468_s6  }
 0x2a2   :  { %463 = dma.done.wait [#allocation6], 128  }
 0x2a3   :  { %464 = vsyncadd [#allocation6], 4294967168 }
 0x2a4   :  { %271 = vsyncpa [#allocation5], 1 }
 0x2a5   :  { %272 = vsyncpa [#allocation8], 1 }
 0x2a6   :  { %273 = vsyncpa [#allocation11], 1 }
 0x2a7   :  { %274 = vsyncpa [#allocation6], 1 }

// kernel: lora_decoder_forward.19
= control target key start
LH: loop header
LB: loop body
LE: loop exit
PB: predicated region body
PF: predicated region fallthrough
CT: control target
= control target key end

     0   :  { %9 = vsyncpa [#allocation4], 0  ;;  %s556_s0 = inlined_call_operand.hbm [shape: bf16[16,128], index: 0, kind: input, shape index: {}]   ;;  %s557_s1 = inlined_call_operand.hbm [shape: bf16[128,32], index: 1, kind: input, shape index: {}]   ;;  %s558_s2 = inlined_call_operand.hbm [shape: f32[1,32], index: 2, kind: input, shape index: {}]   ;;  %s559_s3 = inlined_call_operand.hbm [shape: bf16[16,32], index: 3, kind: input, shape index: {}]   ;;  %s560_s4 = inlined_call_operand.hbm [shape: bf16[16,32], index: 4, kind: output, shape index: {}]  }
   0x1   :  { %10 = vsyncpa [#allocation7], 0 }
   0x2   :  { %11 = vsyncpa [#allocation10], 0 }
   0x3   :  { %12 = vsyncpa [#allocation5], 0  ;;  %s432_s15 = smov [#allocation6]   ;;  %s433_s17 = smov [#allocation3]  }
   0x4   :  { %s30_s16 = sshll.u32 %s432_s15, 4  ;;  %s18_s18 = sshll.u32 %s433_s17, 4  ;;  %s31_s16 = int_to_ptr.vmem [resolvable:$true] %s30_s16  ;;  %s466_s18 = int_to_ptr.vmem [resolvable:$true] %s18_s18 }
   0x5   :  { %s314_s21 = scalar_lea.hbm %s557_s1, 1024 }
   0x6   :  { %p315_p0 = scmp.ne.s32.totalorder %s557_s1, %s314_s21  ;;  %p318_p1 = scmp.lt.u32.totalorder %s314_s21, %s557_s1 }
   0x8   :  { %p320_p2 = pnand %p318_p1, %p315_p0 }
   0xa   :  { %323 = shalt.err (!%p320_p2)
}
   0xb   :  { %s324_s26 = scalar_lea.vmem %s31_s16, 1024  ;;  %p329_p4 = scmp.lt.s32.totalorder %s31_s16, %s31_s16 }
   0xc   :  { %p325_p3 = scmp.ne.s32.totalorder %s31_s16, %s324_s26  ;;  %p330_p5 = scmp.lt.s32.totalorder %s324_s26, %s324_s26 }
   0xe   :  { %p331_p6 = por %p330_p5, %p329_p4 }
  0x10   :  { %p332_p7 = pnand %p331_p6, %p325_p3 }
  0x12   :  { %335 = shalt.err (!%p332_p7)
}
  0x13   :  { %s434_s27 = smov 64   ;;  %s435_s28 = smov 4  }
  0x14   :  { %36 = dma.hbm_to_vmem [thread:$0]  %s557_s1, 1024, %s31_s16, [#allocation7], %s434_s27, %s434_s27, %s435_s28  }
  0x15   :  { %s336_s7 = scalar_lea.hbm %s556_s0, 128 }
  0x16   :  { %p337_p8 = scmp.ne.s32.totalorder %s556_s0, %s336_s7  ;;  %p340_p9 = scmp.lt.u32.totalorder %s336_s7, %s556_s0 }
  0x18   :  { %p342_p10 = pnand %p340_p9, %p337_p8 }
  0x1a   :  { %345 = shalt.err (!%p342_p10)
}
  0x1b   :  { %s346_s12 = scalar_lea.vmem %s466_s18, 128  ;;  %p351_p12 = scmp.lt.s32.totalorder %s466_s18, %s466_s18 }
  0x1c   :  { %p347_p11 = scmp.ne.s32.totalorder %s466_s18, %s346_s12  ;;  %p352_p13 = scmp.lt.s32.totalorder %s346_s12, %s346_s12 }
  0x1e   :  { %p353_p0 = por %p352_p13, %p351_p12 }
  0x20   :  { %p354_p1 = pnand %p353_p0, %p347_p11 }
  0x22   :  { %357 = shalt.err (!%p354_p1)
}
  0x23   :  { %24 = dma.hbm_to_vmem [thread:$0]  %s556_s0, 128, %s466_s18, [#allocation4], %s434_s27, %s434_s27, %s435_s28  }
  0x24   :  { %s436_s14 = smov [#allocation8]   ;;  %s437_s16 = smov [#allocation9]  }
  0x25   :  { %s43_s15 = sshll.u32 %s436_s14, 4  ;;  %s52_s17 = sshll.u32 %s437_s16, 4  ;;  %s44_s15 = int_to_ptr.vmem [resolvable:$true] %s43_s15  ;;  %s503_s17 = int_to_ptr.vmem [resolvable:$true] %s52_s17 }
  0x26   :  { %s358_s21 = scalar_lea.hbm %s558_s2, 16 }
  0x27   :  { %p359_p2 = scmp.ne.s32.totalorder %s558_s2, %s358_s21  ;;  %p362_p3 = scmp.lt.u32.totalorder %s358_s21, %s558_s2 }
  0x29   :  { %p364_p4 = pnand %p362_p3, %p359_p2 }
  0x2b   :  { %367 = shalt.err (!%p364_p4)
}
  0x2c   :  { %s368_s0 = scalar_lea.vmem %s44_s15, 16  ;;  %s372_s18 = scalar_lea.vmem %s44_s15, 32 }
  0x2d   :  { %p369_p5 = scmp.ne.s32.totalorder %s44_s15, %s368_s0  ;;  %p373_p6 = scmp.lt.s32.totalorder %s44_s15, %s44_s15 }
  0x2e   :  { %p374_p7 = scmp.lt.s32.totalorder %s372_s18, %s368_s0 }
  0x30   :  { %p375_p8 = por %p374_p7, %p373_p6 }
  0x32   :  { %p376_p9 = pnand %p375_p8, %p369_p5 }
  0x34   :  { %379 = shalt.err (!%p376_p9)
}
  0x35   :  { %46 = dma.hbm_to_vmem [thread:$0]  %s558_s2, 16, %s44_s15, [#allocation7]  }
  0x36   :  { %s380_s6 = scalar_lea.hbm %s559_s3, 128 }
  0x37   :  { %p381_p10 = scmp.ne.s32.totalorder %s559_s3, %s380_s6  ;;  %p384_p11 = scmp.lt.u32.totalorder %s380_s6, %s559_s3 }
  0x39   :  { %p386_p12 = pnand %p384_p11, %p381_p10 }
  0x3b   :  { %389 = shalt.err (!%p386_p12)
}
  0x3c   :  { %s390_s11 = scalar_lea.vmem %s503_s17, 128  ;;  %p395_p0 = scmp.lt.s32.totalorder %s503_s17, %s503_s17 }
  0x3d   :  { %p391_p13 = scmp.ne.s32.totalorder %s503_s17, %s390_s11  ;;  %p396_p1 = scmp.lt.s32.totalorder %s390_s11, %s390_s11 }
  0x3f   :  { %p397_p2 = por %p396_p1, %p395_p0 }
  0x41   :  { %p398_p3 = pnand %p397_p2, %p391_p13 }
  0x43   :  { %401 = shalt.err (!%p398_p3)
}
  0x44   :  { %58 = dma.hbm_to_vmem [thread:$0]  %s559_s3, 128, %s503_s17, [#allocation10], %s434_s27, %s434_s27, %s435_s28  }
  0x45   :  { %424 = dma.done.wait [#allocation4], 128  }
  0x46   :  { %425 = vsyncadd [#allocation4], 4294967168 }
  0x47   :  { %426 = dma.done.wait [#allocation7], 1040  }
  0x48   :  { %427 = vsyncadd [#allocation7], 4294966256 }
  0x49   :  { %428 = dma.done.wait [#allocation10], 128  }
  0x4a   :  { %429 = vsyncadd [#allocation10], 4294967168  ;;  %vm76_vm0 = vcmask 261120   ;;  %v438_v0 = vmov 0.0   ;;  %vm439_vm1 = vmmov 0   ;;  %v305_v1 = vld [vmem:[#allocation6] sm:$0xff]  }
  0x4b   :  { %276 = vmatprep.subr.bf16.mxu0 %v438_v0  ;;  %292 = vmatprep.mubr.msk.bf16.mxu0 %vm439_vm1, %v438_v0  ;;  %77 = vst.msk [vmem:[#allocation2] sm:$0xff] %vm76_vm0, %v438_v0  ;;  %78 = vst.msk [vmem:[#allocation2 + $0x8] sm:$0xff] %vm76_vm0, %v438_v0  ;;  %v306_v2 = vld [vmem:[#allocation6 + $0x8] sm:$0xff]   ;;  %v307_v3 = vld [vmem:[#allocation6 + $0x10] sm:$0xff]   ;;  %vm227_vm2 = vcmask 257024   ;;  %s440_s3 = smov [#allocation11]  }
  0x4c   :  { %277 = vmatpush3.bf16.msra.mxu0 %v305_v1  ;;  %v308_v4 = vld [vmem:[#allocation6 + $0x18] sm:$0xff]   ;;  %v309_v5 = vld [vmem:[#allocation6 + $0x20] sm:$0xff]   ;;  %v310_v6 = vld [vmem:[#allocation6 + $0x28] sm:$0xff]   ;;  %s235_s1 = sshll.u32 %s440_s3, 4  ;;  %s236_s1 = int_to_ptr.vmem [resolvable:$true] %s235_s1 }
  0x4d   :  { %278 = vmatprep.subr.bf16.mxu0 %v438_v0  ;;  %v311_v7 = vld [vmem:[#allocation6 + $0x30] sm:$0xff]   ;;  %v312_v8 = vld [vmem:[#allocation6 + $0x38] sm:$0xff]   ;;  %v264_v18 = vld [vmem:[#allocation9] sm:$0xff]   ;;  %s402_s13 = scalar_lea.vmem %s236_s1, 128  ;;  %p407_p5 = scmp.lt.s32.totalorder %s236_s1, %s236_s1 }
  0x4e   :  { %v313_v9 = vld [vmem:[#allocation3] sm:$0xff]   ;;  %v258_v19 = vld [vmem:[#allocation8] ss:$0 sm:$0xff]  ;;  %v265_v20 = vunpack.c.l.bf16 %v264_v18  ;;  %v266_v23 = vunpack.c.h.bf16 %v264_v18  ;;  %p403_p4 = scmp.ne.s32.totalorder %s236_s1, %s402_s13  ;;  %p408_p6 = scmp.lt.s32.totalorder %s402_s13, %s402_s13 }
  0x50   :  { %279 = vmatpush3.bf16.msra.mxu0 %v306_v2  ;;  %p409_p7 = por %p408_p6, %p407_p5 }
  0x51   :  { %280 = vmatprep.subr.bf16.mxu0 %v438_v0 }
  0x52   :  { %v81_v10 = vld [vmem:[#allocation2] sm:$0xff]  ;;  %v82_v12 = vld [vmem:[#allocation2 + $0x8] sm:$0xff]  ;;  %p410_p8 = pnand %p409_p7, %p403_p4 }
  0x54   :  { %281 = vmatpush3.bf16.msra.mxu0 %v307_v3 }
  0x55   :  { %282 = vmatprep.subr.bf16.mxu0 %v438_v0 }
  0x58   :  { %283 = vmatpush3.bf16.msra.mxu0 %v308_v4 }
  0x59   :  { %284 = vmatprep.subr.bf16.mxu0 %v438_v0 }
  0x5c   :  { %285 = vmatpush3.bf16.msra.mxu0 %v309_v5 }
  0x5d   :  { %286 = vmatprep.subr.bf16.mxu0 %v438_v0 }
  0x60   :  { %287 = vmatpush3.bf16.msra.mxu0 %v310_v6 }
  0x61   :  { %288 = vmatprep.subr.bf16.mxu0 %v438_v0 }
  0x64   :  { %289 = vmatpush3.bf16.msra.mxu0 %v311_v7 }
  0x65   :  { %290 = vmatprep.subr.bf16.mxu0 %v438_v0 }
  0x68   :  { %291 = vmatpush3.bf16.msra.mxu0 %v312_v8 }
  0x6b   :  { %293 = vmatmul.mubr.bf16.vlgmr.msra.gmra.mrb[0].mxu0 %v313_v9 }
 0x13e   :  { %v187_v11 = vpop.f32.mrb[0].mxu0 }
 0x13f   :  { %v194_v13 = vadd.f32 %v187_v11, %v81_v10  ;;  %v294_v14 = vpop.f32.mrb[1].mxu0 }
 0x140   :  { %v190_v15 = vpop.f32.mrb[2].mxu0 }
 0x141   :  { %197 = vst.msk [vmem:[#allocation2] sm:$0xff] %vm76_vm0, %v194_v13  ;;  %v195_v16 = vadd.f32 %v190_v15, %v82_v12  ;;  %v295_v17 = vpop.f32.mrb[3].mxu0 }
 0x143   :  { %198 = vst.msk [vmem:[#allocation2 + $0x8] sm:$0xff] %vm76_vm0, %v195_v16 }
 0x148   :  { %v202_v21 = vld [vmem:[#allocation2] sm:$0xff] }
 0x149   :  { %v211_v22 = vadd.f32 %v258_v19, %v202_v21 }
 0x14a   :  { %v203_v24 = vld [vmem:[#allocation2 + $0x8] sm:$0xff] }
 0x14b   :  { %v212_v25 = vadd.f32 %v258_v19, %v203_v24  ;;  %v217_v26 = vadd.f32 %v265_v20, %v211_v22 }
 0x14d   :  { %v218_v27 = vadd.f32 %v266_v23, %v212_v25  ;;  %v261_v28 = vpack.c.bf16 %v217_v26, %v217_v26 }
 0x14f   :  { %v262_v29 = vpack.c.bf16 %v218_v27, %v218_v27  ;;  %228 = vst.msk [vmem:[#allocation11] sm:$0xf] %vm227_vm2, %v261_v28 }
 0x151   :  { %229 = vst.msk [vmem:[#allocation11 + $0x4] sm:$0xf] %vm227_vm2, %v262_v29 }
 0x152   :  { %413 = shalt.err (!%p410_p8)
}
 0x153   :  { %s414_s16 = scalar_lea.hbm %s560_s4, 128 }
 0x154   :  { %p415_p9 = scmp.ne.s32.totalorder %s560_s4, %s414_s16  ;;  %p418_p10 = scmp.lt.u32.totalorder %s414_s16, %s560_s4 }
 0x156   :  { %p420_p11 = pnand %p418_p10, %p415_p9 }
 0x158   :  { %423 = shalt.err (!%p420_p11)
}
 0x159   :  { %241 = dma.vmem_to_hbm [thread:$0]  %s236_s1, 128, %s560_s4, [#allocation5], %s434_s27, %s434_s27, %s435_s28  }
 0x15a   :  { %430 = dma.done.wait [#allocation5], 128  }
 0x15b   :  { %431 = vsyncadd [#allocation5], 4294967168 }
 0x15c   :  { %245 = vsyncpa [#allocation4], 1 }
 0x15d   :  { %246 = vsyncpa [#allocation7], 1 }
 0x15e   :  { %247 = vsyncpa [#allocation10], 1 }
 0x15f   :  { %248 = vsyncpa [#allocation5], 1 }

// kernel: lora_decoder_forward.25
= control target key start
LH: loop header
LB: loop body
LE: loop exit
PB: predicated region body
PF: predicated region fallthrough
CT: control target
= control target key end

     0   :  { %8 = vsyncpa [#allocation4], 0  ;;  %s401_s0 = inlined_call_operand.hbm [shape: bf16[16,32], index: 0, kind: input, shape index: {}]   ;;  %s402_s1 = inlined_call_operand.hbm [shape: bf16[32,64], index: 1, kind: input, shape index: {}]   ;;  %s403_s2 = inlined_call_operand.hbm [shape: f32[1,64], index: 2, kind: input, shape index: {}]   ;;  %s404_s3 = inlined_call_operand.hbm [shape: bf16[16,64], index: 3, kind: output, shape index: {}]  }
   0x1   :  { %9 = vsyncpa [#allocation7], 0 }
   0x2   :  { %10 = vsyncpa [#allocation5], 0  ;;  %s305_s12 = smov [#allocation6]   ;;  %s306_s14 = smov [#allocation3]  }
   0x3   :  { %s28_s13 = sshll.u32 %s305_s12, 4  ;;  %s16_s15 = sshll.u32 %s306_s14, 4  ;;  %s29_s13 = int_to_ptr.vmem [resolvable:$true] %s28_s13  ;;  %s333_s15 = int_to_ptr.vmem [resolvable:$true] %s16_s15 }
   0x4   :  { %s211_s18 = scalar_lea.hbm %s402_s1, 256 }
   0x5   :  { %p212_p0 = scmp.ne.s32.totalorder %s402_s1, %s211_s18  ;;  %p215_p1 = scmp.lt.u32.totalorder %s211_s18, %s402_s1 }
   0x7   :  { %p217_p2 = pnand %p215_p1, %p212_p0 }
   0x9   :  { %220 = shalt.err (!%p217_p2)
}
   0xa   :  { %s221_s23 = scalar_lea.vmem %s29_s13, 256  ;;  %p226_p4 = scmp.lt.s32.totalorder %s29_s13, %s29_s13 }
   0xb   :  { %p222_p3 = scmp.ne.s32.totalorder %s29_s13, %s221_s23  ;;  %p227_p5 = scmp.lt.s32.totalorder %s221_s23, %s221_s23 }
   0xd   :  { %p228_p6 = por %p227_p5, %p226_p4 }
   0xf   :  { %p229_p7 = pnand %p228_p6, %p222_p3 }
  0x11   :  { %232 = shalt.err (!%p229_p7)
}
  0x12   :  { %s307_s24 = smov 64   ;;  %s308_s25 = smov 4  }
  0x13   :  { %34 = dma.hbm_to_vmem [thread:$0]  %s402_s1, 256, %s29_s13, [#allocation7], %s307_s24, %s307_s24, %s308_s25  }
  0x14   :  { %s233_s30 = scalar_lea.hbm %s401_s0, 128 }
  0x15   :  { %p234_p8 = scmp.ne.s32.totalorder %s401_s0, %s233_s30  ;;  %p237_p9 = scmp.lt.u32.totalorder %s233_s30, %s401_s0 }
  0x17   :  { %p239_p10 = pnand %p237_p9, %p234_p8 }
  0x19   :  { %242 = shalt.err (!%p239_p10)
}
  0x1a   :  { %s243_s8 = scalar_lea.vmem %s333_s15, 128  ;;  %p248_p12 = scmp.lt.s32.totalorder %s333_s15, %s333_s15 }
  0x1b   :  { %p244_p11 = scmp.ne.s32.totalorder %s333_s15, %s243_s8  ;;  %p249_p13 = scmp.lt.s32.totalorder %s243_s8, %s243_s8 }
  0x1d   :  { %p250_p0 = por %p249_p13, %p248_p12 }
  0x1f   :  { %p251_p1 = pnand %p250_p0, %p244_p11 }
  0x21   :  { %254 = shalt.err (!%p251_p1)
}
  0x22   :  { %22 = dma.hbm_to_vmem [thread:$0]  %s401_s0, 128, %s333_s15, [#allocation4], %s307_s24, %s307_s24, %s308_s25  }
  0x23   :  { %s309_s10 = smov [#allocation8]   ;;  %s255_s14 = scalar_lea.hbm %s403_s2, 16 }
  0x24   :  { %s41_s11 = sshll.u32 %s309_s10, 4  ;;  %p256_p2 = scmp.ne.s32.totalorder %s403_s2, %s255_s14  ;;  %s42_s11 = int_to_ptr.vmem [resolvable:$true] %s41_s11 }
  0x25   :  { %p259_p3 = scmp.lt.u32.totalorder %s255_s14, %s403_s2 }
  0x27   :  { %p261_p4 = pnand %p259_p3, %p256_p2 }
  0x29   :  { %264 = shalt.err (!%p261_p4)
}
  0x2a   :  { %s265_s20 = scalar_lea.vmem %s42_s11, 16  ;;  %s269_s0 = scalar_lea.vmem %s42_s11, 32 }
  0x2b   :  { %p266_p5 = scmp.ne.s32.totalorder %s42_s11, %s265_s20  ;;  %p270_p6 = scmp.lt.s32.totalorder %s42_s11, %s42_s11 }
  0x2c   :  { %p271_p7 = scmp.lt.s32.totalorder %s269_s0, %s265_s20 }
  0x2e   :  { %p272_p8 = por %p271_p7, %p270_p6 }
  0x30   :  { %p273_p9 = pnand %p272_p8, %p266_p5 }
  0x32   :  { %276 = shalt.err (!%p273_p9)
}
  0x33   :  { %44 = dma.hbm_to_vmem [thread:$0]  %s403_s2, 16, %s42_s11, [#allocation7]  }
  0x34   :  { %299 = dma.done.wait [#allocation4], 128  }
  0x35   :  { %300 = vsyncadd [#allocation4], 4294967168 }
  0x36   :  { %301 = dma.done.wait [#allocation7], 272  }
  0x37   :  { %302 = vsyncadd [#allocation7], 4294967024  ;;  %vm59_vm0 = vcmask 523264   ;;  %v310_v0 = vmov 0.0   ;;  %vm311_vm1 = vmmov 0   ;;  %v208_v1 = vld [vmem:[#allocation6] sm:$0xff]  }
  0x38   :  { %60 = vst.msk [vmem:[#allocation2] sm:$0xff] %vm59_vm0, %v310_v0  ;;  %61 = vst.msk [vmem:[#allocation2 + $0x8] sm:$0xff] %vm59_vm0, %v310_v0  ;;  %192 = vmatprep.subr.bf16.mxu0 %v310_v0  ;;  %196 = vmatprep.mubr.msk.bf16.mxu0 %vm311_vm1, %v310_v0  ;;  %v209_v2 = vld [vmem:[#allocation6 + $0x8] sm:$0xff]   ;;  %v210_v3 = vld [vmem:[#allocation3] sm:$0xff]   ;;  %vm87_vm2 = vcmask 261120   ;;  %vm159_vm3 = vcmask 519168  }
  0x39   :  { %193 = vmatpush3.bf16.msra.mxu0 %v208_v1  ;;  %v184_v12 = vld [vmem:[#allocation8] ss:$0 sm:$0xff]  ;;  %s312_s2 = smov [#allocation9]  }
  0x3a   :  { %194 = vmatprep.subr.bf16.mxu0 %v310_v0  ;;  %s167_s22 = sshll.u32 %s312_s2, 4  ;;  %s168_s22 = int_to_ptr.vmem [resolvable:$true] %s167_s22 }
  0x3b   :  { %s277_s23 = scalar_lea.vmem %s168_s22, 128  ;;  %p282_p11 = scmp.lt.s32.totalorder %s168_s22, %s168_s22 }
  0x3c   :  { %p278_p10 = scmp.ne.s32.totalorder %s168_s22, %s277_s23  ;;  %p283_p12 = scmp.lt.s32.totalorder %s277_s23, %s277_s23 }
  0x3d   :  { %195 = vmatpush3.bf16.msra.mxu0 %v209_v2 }
  0x3e   :  { %p284_p13 = por %p283_p12, %p282_p11 }
  0x3f   :  { %v64_v4 = vld [vmem:[#allocation2] sm:$0xff]  ;;  %v65_v6 = vld [vmem:[#allocation2 + $0x8] sm:$0xff] }
  0x40   :  { %197 = vmatmul.mubr.msk.bf16.vlgmr.msra.gmra.mrb[0].mxu0 %vm87_vm2, %v210_v3  ;;  %p285_p0 = pnand %p284_p13, %p278_p10 }
 0x113   :  { %v125_v5 = vpop.f32.mrb[0].mxu0 }
 0x114   :  { %v132_v7 = vadd.f32 %v125_v5, %v64_v4  ;;  %v198_v8 = vpop.f32.mrb[1].mxu0 }
 0x115   :  { %v128_v9 = vpop.f32.mrb[2].mxu0 }
 0x116   :  { %135 = vst.msk [vmem:[#allocation2] sm:$0xff] %vm59_vm0, %v132_v7  ;;  %v133_v10 = vadd.f32 %v128_v9, %v65_v6  ;;  %v199_v11 = vpop.f32.mrb[3].mxu0 }
 0x118   :  { %136 = vst.msk [vmem:[#allocation2 + $0x8] sm:$0xff] %vm59_vm0, %v133_v10 }
 0x11d   :  { %v140_v13 = vld [vmem:[#allocation2] sm:$0xff] }
 0x11e   :  { %v149_v14 = vadd.f32 %v184_v12, %v140_v13 }
 0x11f   :  { %v141_v15 = vld [vmem:[#allocation2 + $0x8] sm:$0xff] }
 0x120   :  { %v150_v16 = vadd.f32 %v184_v12, %v141_v15  ;;  %v187_v17 = vpack.c.bf16 %v149_v14, %v149_v14 }
 0x122   :  { %v188_v18 = vpack.c.bf16 %v150_v16, %v150_v16  ;;  %160 = vst.msk [vmem:[#allocation9] sm:$0xf] %vm159_vm3, %v187_v17 }
 0x124   :  { %161 = vst.msk [vmem:[#allocation9 + $0x4] sm:$0xf] %vm159_vm3, %v188_v18 }
 0x125   :  { %288 = shalt.err (!%p285_p0)
}
 0x126   :  { %s289_s28 = scalar_lea.hbm %s404_s3, 128 }
 0x127   :  { %p290_p1 = scmp.ne.s32.totalorder %s404_s3, %s289_s28  ;;  %p293_p2 = scmp.lt.u32.totalorder %s289_s28, %s404_s3 }
 0x129   :  { %p295_p3 = pnand %p293_p2, %p290_p1 }
 0x12b   :  { %298 = shalt.err (!%p295_p3)
}
 0x12c   :  { %173 = dma.vmem_to_hbm [thread:$0]  %s168_s22, 128, %s404_s3, [#allocation5], %s307_s24, %s307_s24, %s308_s25  }
 0x12d   :  { %303 = dma.done.wait [#allocation5], 128  }
 0x12e   :  { %304 = vsyncadd [#allocation5], 4294967168 }
 0x12f   :  { %177 = vsyncpa [#allocation4], 1 }
 0x130   :  { %178 = vsyncpa [#allocation7], 1 }
 0x131   :  { %179 = vsyncpa [#allocation5], 1 }

</bundles_post_ra>
